<compile_context>
chip_gen: v7x
topology: tpu7x:2x2x1
jax: 0.10.0
libtpu: 0.0.40
codegen_flags: <defaults>
</compile_context>

<pallas_src>
import functools
import math

import jax
import jax.numpy as jnp
from jax import lax
from jax.experimental import pallas as pl
from jax.experimental.pallas import tpu as pltpu


# ----------------------------- small helpers -----------------------------
def _layernorm(x, w, b, eps=1e-5):
    mu = jnp.mean(x, axis=-1, keepdims=True)
    xc = x - mu
    var = jnp.mean(xc * xc, axis=-1, keepdims=True)
    return xc * lax.rsqrt(var + eps) * w + b


def _gelu_tanh(x):
    c = math.sqrt(2.0 / math.pi)
    return 0.5 * x * (1.0 + jnp.tanh(c * (x + 0.044715 * x * x * x)))


# ------------------- kernel 1: x1 = x + MHA(LN1(x)) -------------------
def _attn_kernel(x_ref, ln1_w_ref, ln1_b_ref, wqkv_ref, bqkv_ref, wo_ref, bo_ref,
                 o_ref,
                 q_scr, k_scr, v_scr, m_scr, l_scr, acc_scr,
                 *, n_head, q_tile, kv_tile, compute_dtype):
    T, C = x_ref.shape
    dh = C // n_head
    scale = 1.0 / math.sqrt(dh)
    q_idx = pl.program_id(1)

    # ---- prologue (once per batch element): LN1 + QKV -> head-major scratch ----
    @pl.when(q_idx == 0)
    def _():
        x = x_ref[...].astype(jnp.float32)
        h = _layernorm(x, ln1_w_ref[...], ln1_b_ref[...]).astype(compute_dtype)
        qkv = jnp.dot(h, wqkv_ref[...],
                      preferred_element_type=jnp.float32) + bqkv_ref[...]

        def to_head_major(a2d):          # (T, C) -> (H, T, Dh), already compute_dtype
            return jnp.transpose(a2d.reshape(T, n_head, dh), (1, 0, 2))

        q_scr[...] = to_head_major((qkv[:, 0:C] * scale).astype(compute_dtype))
        k_scr[...] = to_head_major(qkv[:, C:2 * C].astype(compute_dtype))
        v_scr[...] = to_head_major(qkv[:, 2 * C:3 * C].astype(compute_dtype))

    # ---- per-q-tile flash attention over kv tiles (causal tiles only) ----
    row0 = pl.multiple_of(q_idx * q_tile, q_tile)
    q_t = q_scr[:, pl.ds(row0, q_tile), :]             # (H, q_tile, Dh), compute_dtype

    m_scr[...] = jnp.full_like(m_scr, -1e30)
    l_scr[...] = jnp.zeros_like(l_scr)
    acc_scr[...] = jnp.zeros_like(acc_scr)

    # iotas hoisted out of the kv loop (JAX does not CSE broadcast_in_dim)
    rows = row0 + lax.broadcasted_iota(jnp.int32, (q_tile, kv_tile), 0)
    cols_rel = lax.broadcasted_iota(jnp.int32, (q_tile, kv_tile), 1)

    # causal skip: only kv tiles at or below the diagonal of this q tile
    n_kv = (q_idx + 1) * (q_tile // kv_tile)

    @pl.loop(0, n_kv)
    def _kv(j):
        col0 = pl.multiple_of(j * kv_tile, kv_tile)
        k_t = k_scr[:, pl.ds(col0, kv_tile), :]         # (H, kv_tile, Dh)
        v_t = v_scr[:, pl.ds(col0, kv_tile), :]

        s = jnp.einsum("hqd,hkd->hqk", q_t, k_t,
                       preferred_element_type=jnp.float32)   # (H, q_tile, kv_tile)
        mask = rows >= (col0 + cols_rel)
        s = jnp.where(mask[None, :, :], s, -1e30)

        m_prev = m_scr[...]
        m_new = jnp.maximum(m_prev, jnp.max(s, axis=-1, keepdims=True))
        alpha = jnp.exp(m_prev - m_new)
        p = jnp.exp(s - m_new)
        l_scr[...] = alpha * l_scr[...] + jnp.sum(p, axis=-1, keepdims=True)
        acc_scr[...] = alpha * acc_scr[...] + jnp.einsum(
            "hqk,hkd->hqd", p.astype(compute_dtype), v_t,
            preferred_element_type=jnp.float32)
        m_scr[...] = m_new

    # normalize, merge heads (single transpose per q tile), project, residual
    y = acc_scr[...] * pl.reciprocal(l_scr[...], approx=True)   # (H, q_tile, Dh) f32
    y = jnp.transpose(y.astype(compute_dtype), (1, 0, 2)).reshape(q_tile, C)
    att = jnp.dot(y, wo_ref[...], preferred_element_type=jnp.float32) + bo_ref[...]
    x_t = x_ref[pl.ds(row0, q_tile), :].astype(jnp.float32)
    o_ref[...] = (x_t + att).astype(o_ref.dtype)


# ------------------- kernel 2: out = x1 + MLP(LN2(x1)) -------------------
def _mlp_kernel(x_ref, ln2_w_ref, ln2_b_ref, wfc_ref, bfc_ref, wpr_ref, bpr_ref,
                o_ref, h_scr, acc_scr, *, compute_dtype):
    c_idx = pl.program_id(2)

    @pl.when(c_idx == 0)
    def _():
        x = x_ref[...].astype(jnp.float32)
        h_scr[...] = _layernorm(x, ln2_w_ref[...], ln2_b_ref[...]).astype(compute_dtype)
        acc_scr[...] = jnp.zeros_like(acc_scr)

    # one streamed chunk of the 4C hidden dimension
    fc = jnp.dot(h_scr[...], wfc_ref[...],
                 preferred_element_type=jnp.float32) + bfc_ref[...]
    fc = _gelu_tanh(fc)                                   # elementwise -> chunking exact
    acc_scr[...] += jnp.dot(fc.astype(compute_dtype), wpr_ref[...],
                            preferred_element_type=jnp.float32)

    @pl.when(c_idx == pl.num_programs(2) - 1)
    def _():
        x = x_ref[...].astype(jnp.float32)
        o_ref[...] = (x + acc_scr[...] + bpr_ref[...]).astype(o_ref.dtype)


# ----------------------------- VMEM budgeting -----------------------------
def _vmem_limit_bytes(working_set_bytes):
    try:
        cap = int(pltpu.get_tpu_info().vmem_capacity_bytes)
    except Exception:  # pragma: no cover - fall back to most restrictive (v7x per-TC)
        cap = 64 << 20
    want = 2 * int(working_set_bytes) + (4 << 20)         # 2x margin + headroom
    return int(max(24 << 20, min(want, int(0.85 * cap))))


# ----------------------------- wrapper -----------------------------
def block_forward(x, params, n_head, *, q_tile=256, kv_tile=256,
                  mlp_row_tile=256, fc_tile=512, compute_dtype=jnp.bfloat16):
    B, T, C = x.shape
    assert C % n_head == 0
    dh = C // n_head
    hidden = 4 * C

    # clamp tiles to valid divisors of the small demo shapes
    if T % q_tile:
        q_tile = T
    kv_tile = min(kv_tile, q_tile)
    if (T % kv_tile) or (q_tile % kv_tile):
        kv_tile = q_tile
    if T % mlp_row_tile:
        mlp_row_tile = T
    if hidden % fc_tile:
        fc_tile = hidden

    cdt = jnp.dtype(compute_dtype)
    xs = jnp.dtype(x.dtype).itemsize

    # matmul weights cast once outside the kernels (halves weight DMA + VMEM);
    # biases / LN params stay f32 (f32 elementwise + f32 accumulation).
    w_qkv = params["w_qkv"].astype(compute_dtype)
    w_o = params["w_attn_proj"].astype(compute_dtype)
    w_fc = params["w_fc"].astype(compute_dtype)
    w_pr = params["w_mlp_proj"].astype(compute_dtype)

    # ---------------- kernel 1: x1 = x + MHA(LN1(x)) ----------------
    attn_ws = (
        2 * T * C * xs                                 # x block (double-buffered)
        + 2 * q_tile * C * xs                          # out block
        + 2 * (C * 3 * C + C * C) * cdt.itemsize       # matmul weights
        + 2 * (6 * C + 3 * C) * 4                      # biases + LN params
        + 3 * T * C * cdt.itemsize                     # Q/K/V scratch
        + T * 3 * C * 4 + T * C * 4                    # prologue qkv + h temporaries
        + 4 * n_head * q_tile * kv_tile * 4            # score temporaries
        + 2 * n_head * q_tile * dh * 4                 # softmax accumulators
        + 2 * q_tile * C * 4                           # merged y / att temporaries
    )

    x1 = pl.pallas_call(
        functools.partial(_attn_kernel, n_head=n_head, q_tile=q_tile,
                          kv_tile=kv_tile, compute_dtype=compute_dtype),
        out_shape=jax.ShapeDtypeStruct((B, T, C), x.dtype),
        grid_spec=pltpu.PrefetchScalarGridSpec(
            num_scalar_prefetch=0,
            grid=(B, T // q_tile),
            in_specs=[
                pl.BlockSpec((None, T, C), lambda b, q: (b, 0, 0)),     # x (full seq)
                pl.BlockSpec((1, C), lambda b, q: (0, 0)),              # ln1_w
                pl.BlockSpec((1, C), lambda b, q: (0, 0)),              # ln1_b
                pl.BlockSpec((C, 3 * C), lambda b, q: (0, 0)),          # w_qkv
                pl.BlockSpec((1, 3 * C), lambda b, q: (0, 0)),          # b_qkv
                pl.BlockSpec((C, C), lambda b, q: (0, 0)),              # w_attn_proj
                pl.BlockSpec((1, C), lambda b, q: (0, 0)),              # b_attn_proj
            ],
            out_specs=pl.BlockSpec((None, q_tile, C), lambda b, q: (b, q, 0)),
            scratch_shapes=[
                pltpu.VMEM((n_head, T, dh), compute_dtype),             # Q (scaled)
                pltpu.VMEM((n_head, T, dh), compute_dtype),             # K
                pltpu.VMEM((n_head, T, dh), compute_dtype),             # V
                pltpu.VMEM((n_head, q_tile, 1), jnp.float32),           # m
                pltpu.VMEM((n_head, q_tile, 1), jnp.float32),           # l
                pltpu.VMEM((n_head, q_tile, dh), jnp.float32),          # acc
            ],
        ),
        compiler_params=pltpu.CompilerParams(
            dimension_semantics=("parallel", "arbitrary"),
            vmem_limit_bytes=_vmem_limit_bytes(attn_ws),
        ),
    )(x, params["ln1_w"], params["ln1_b"], w_qkv, params["b_qkv"],
      w_o, params["b_attn_proj"])

    # ---------------- kernel 2: out = x1 + MLP(LN2(x1)) ----------------
    mlp_ws = (
        4 * mlp_row_tile * C * xs                       # x + out blocks (double-buf)
        + 2 * (C * fc_tile + fc_tile * C) * cdt.itemsize  # streamed weight chunks
        + 2 * (fc_tile + 3 * C) * 4                     # biases + LN params
        + mlp_row_tile * C * (cdt.itemsize + 4)         # h_scr + acc
        + 3 * mlp_row_tile * fc_tile * 4                # fc / gelu temporaries
    )

    out = pl.pallas_call(
        functools.partial(_mlp_kernel, compute_dtype=compute_dtype),
        out_shape=jax.ShapeDtypeStruct((B, T, C), x.dtype),
        grid_spec=pltpu.PrefetchScalarGridSpec(
            num_scalar_prefetch=0,
            grid=(B, T // mlp_row_tile, hidden // fc_tile),
            in_specs=[
                pl.BlockSpec((None, mlp_row_tile, C), lambda b, r, c: (b, r, 0)),  # x1
                pl.BlockSpec((1, C), lambda b, r, c: (0, 0)),                      # ln2_w
                pl.BlockSpec((1, C), lambda b, r, c: (0, 0)),                      # ln2_b
                pl.BlockSpec((C, fc_tile), lambda b, r, c: (0, c)),                # w_fc
                pl.BlockSpec((1, fc_tile), lambda b, r, c: (0, c)),                # b_fc
                pl.BlockSpec((fc_tile, C), lambda b, r, c: (c, 0)),                # w_proj
                pl.BlockSpec((1, C), lambda b, r, c: (0, 0)),                      # b_proj
            ],
            out_specs=pl.BlockSpec((None, mlp_row_tile, C), lambda b, r, c: (b, r, 0)),
            scratch_shapes=[
                pltpu.VMEM((mlp_row_tile, C), compute_dtype),   # LN2(x) tile
                pltpu.VMEM((mlp_row_tile, C), jnp.float32),     # projection accumulator
            ],
        ),
        compiler_params=pltpu.CompilerParams(
            dimension_semantics=("parallel", "parallel", "arbitrary"),
            vmem_limit_bytes=_vmem_limit_bytes(mlp_ws),
        ),
    )(x1, params["ln2_w"], params["ln2_b"], w_fc, params["b_fc"],
      w_pr, params["b_mlp_proj"])

    return out


# ------------------- pure-JAX reference for validation -------------------
def block_reference(x, params, n_head):
    def ln(x, w, b, eps=1e-5):
        mu = jnp.mean(x, axis=-1, keepdims=True)
        var = jnp.mean((x - mu) ** 2, axis=-1, keepdims=True)
        return (x - mu) / jnp.sqrt(var + eps) * w + b

    B, T, C = x.shape
    Dh = C // n_head
    h = ln(x, params["ln1_w"], params["ln1_b"])
    qkv = h @ params["w_qkv"] + params["b_qkv"]
    q, k, v = jnp.split(qkv, 3, axis=-1)
    q = q.reshape(B, T, n_head, Dh).transpose(0, 2, 1, 3)
    k = k.reshape(B, T, n_head, Dh).transpose(0, 2, 1, 3)
    v = v.reshape(B, T, n_head, Dh).transpose(0, 2, 1, 3)
    att = jnp.einsum("bhqd,bhkd->bhqk", q, k) / math.sqrt(Dh)
    mask = jnp.tril(jnp.ones((T, T), bool))
    att = jnp.where(mask, att, -jnp.inf)
    att = jax.nn.softmax(att, axis=-1)
    y = jnp.einsum("bhqk,bhkd->bhqd", att, v).transpose(0, 2, 1, 3).reshape(B, T, C)
    y = y @ params["w_attn_proj"] + params["b_attn_proj"]
    x1 = x + y
    h2 = ln(x1, params["ln2_w"], params["ln2_b"])
    fc = jax.nn.gelu(h2 @ params["w_fc"] + params["b_fc"], approximate=True)
    return x1 + fc @ params["w_mlp_proj"] + params["b_mlp_proj"]


if __name__ == "__main__":
    # Small config, C a multiple of 128 so stores are lane-dense: B=2, T=64, C=128, H=4.
    B, T, C, n_head = 2, 64, 128, 4
    key = jax.random.PRNGKey(0)
    ks = jax.random.split(key, 8)

    def init(k, shape, fan_in):
        return (jax.random.normal(k, shape, jnp.float32) / math.sqrt(fan_in)) * 0.5

    params = {
        "ln1_w": jnp.ones((1, C), jnp.float32),
        "ln1_b": jnp.zeros((1, C), jnp.float32),
        "w_qkv": init(ks[0], (C, 3 * C), C),
        "b_qkv": init(ks[1], (1, 3 * C), C),
        "w_attn_proj": init(ks[2], (C, C), C),
        "b_attn_proj": init(ks[3], (1, C), C),
        "ln2_w": jnp.ones((1, C), jnp.float32),
        "ln2_b": jnp.zeros((1, C), jnp.float32),
        "w_fc": init(ks[4], (C, 4 * C), C),
        "b_fc": init(ks[5], (1, 4 * C), C),
        "w_mlp_proj": init(ks[6], (4 * C, C), 4 * C),
        "b_mlp_proj": init(ks[7], (1, C), 4 * C),
    }

    x = jax.random.normal(jax.random.PRNGKey(1), (B, T, C), jnp.float32)
    ref = block_reference(x, params, n_head)

    # Default bf16-MXU path (f32 accumulation + f32 elementwise).  Small tiles so the
    # demo exercises multiple q tiles, the causal kv loop, and streamed MLP chunks.
    out = block_forward(x, params, n_head, q_tile=32, kv_tile=32,
                        mlp_row_tile=32, fc_tile=256)
    out = jax.block_until_ready(out)
    assert out.shape == (B, T, C)
    err_bf16 = jnp.max(jnp.abs(out - ref))
    assert jnp.allclose(out, ref, atol=8e-2, rtol=8e-2), f"bf16 max err {err_bf16}"

    # f32 MXU debug path, tight tolerance.
    out_f32 = block_forward(x, params, n_head, q_tile=32, kv_tile=32,
                            mlp_row_tile=32, fc_tile=256,
                            compute_dtype=jnp.float32)
    out_f32 = jax.block_until_ready(out_f32)
    err_f32 = jnp.max(jnp.abs(out_f32 - ref))
    assert jnp.allclose(out_f32, ref, atol=1e-2, rtol=1e-2), f"f32 max err {err_f32}"

    print("KERNEL_OK")
</pallas_src>

<mosaic_0001>
module attributes {stable_mosaic.version = 11 : i64} {
  func.func @_attn_kernel(%arg0: i32, %arg1: i32, %arg2: memref<1x64x128xf32, #tpu.memory_space<vmem>>, %arg3: memref<1x128xf32, #tpu.memory_space<vmem>>, %arg4: memref<1x128xf32, #tpu.memory_space<vmem>>, %arg5: memref<128x384xbf16, #tpu.memory_space<vmem>>, %arg6: memref<1x384xf32, #tpu.memory_space<vmem>>, %arg7: memref<128x128xbf16, #tpu.memory_space<vmem>>, %arg8: memref<1x128xf32, #tpu.memory_space<vmem>>, %arg9: memref<1x32x128xf32, #tpu.memory_space<vmem>>, %arg10: memref<4x64x32xbf16, #tpu.memory_space<vmem>>, %arg11: memref<4x64x32xbf16, #tpu.memory_space<vmem>>, %arg12: memref<4x64x32xbf16, #tpu.memory_space<vmem>>, %arg13: memref<4x32x1xf32, #tpu.memory_space<vmem>>, %arg14: memref<4x32x1xf32, #tpu.memory_space<vmem>>, %arg15: memref<4x32x32xf32, #tpu.memory_space<vmem>>) attributes {dimension_semantics = [#tpu.dimension_semantics<parallel>, #tpu.dimension_semantics<arbitrary>], iteration_bounds = array<i64: 2, 2>, scalar_prefetch = 0 : i64, scratch_operands = 6 : i64, tpu.core_type = #tpu.core_type<tc>, window_params = [{transform_indices = @transform_0, window_bounds = array<i64: 1, 64, 128>}, {pipeline_mode = #tpu.pipeline_mode<synchronous>, transform_indices = @transform_1, window_bounds = array<i64: 1, 128>}, {pipeline_mode = #tpu.pipeline_mode<synchronous>, transform_indices = @transform_2, window_bounds = array<i64: 1, 128>}, {pipeline_mode = #tpu.pipeline_mode<synchronous>, transform_indices = @transform_3, window_bounds = array<i64: 128, 384>}, {pipeline_mode = #tpu.pipeline_mode<synchronous>, transform_indices = @transform_4, window_bounds = array<i64: 1, 384>}, {pipeline_mode = #tpu.pipeline_mode<synchronous>, transform_indices = @transform_5, window_bounds = array<i64: 128, 128>}, {pipeline_mode = #tpu.pipeline_mode<synchronous>, transform_indices = @transform_6, window_bounds = array<i64: 1, 128>}, {transform_indices = @transform_7, window_bounds = array<i64: 1, 32, 128>}]} {
    %c0_i32 = arith.constant 0 : i32
    %0 = arith.cmpi eq, %arg1, %c0_i32 : i32
    %1 = arith.extui %0 : i1 to i32
    %c0_i32_0 = arith.constant 0 : i32
    %2 = arith.cmpi ne, %1, %c0_i32_0 : i32
    scf.if %2 {
      %c0_38 = arith.constant 0 : index
      %c0_39 = arith.constant 0 : index
      %c0_40 = arith.constant 0 : index
      %45 = vector.load %arg2[%c0_38, %c0_39, %c0_40] : memref<1x64x128xf32, #tpu.memory_space<vmem>>, vector<1x64x128xf32>
      %46 = vector.shape_cast %45 : vector<1x64x128xf32> to vector<64x128xf32>
      %c0_41 = arith.constant 0 : index
      %c0_42 = arith.constant 0 : index
      %47 = vector.load %arg3[%c0_41, %c0_42] : memref<1x128xf32, #tpu.memory_space<vmem>>, vector<1x128xf32>
      %c0_43 = arith.constant 0 : index
      %c0_44 = arith.constant 0 : index
      %48 = vector.load %arg4[%c0_43, %c0_44] : memref<1x128xf32, #tpu.memory_space<vmem>>, vector<1x128xf32>
      %cst_45 = arith.constant dense<0.000000e+00> : vector<64xf32>
      %49 = vector.multi_reduction <add>, %46, %cst_45 [1] : vector<64x128xf32> to vector<64xf32>
      %50 = vector.shape_cast %49 : vector<64xf32> to vector<64x1xf32>
      %cst_46 = arith.constant 1.280000e+02 : f32
      %51 = vector.broadcast %cst_46 : f32 to vector<64x1xf32>
      %52 = arith.divf %50, %51 : vector<64x1xf32>
      %53 = vector.broadcast %52 : vector<64x1xf32> to vector<64x128xf32>
      %54 = arith.subf %46, %53 : vector<64x128xf32>
      %55 = arith.mulf %54, %54 : vector<64x128xf32>
      %cst_47 = arith.constant dense<0.000000e+00> : vector<64xf32>
      %56 = vector.multi_reduction <add>, %55, %cst_47 [1] : vector<64x128xf32> to vector<64xf32>
      %57 = vector.shape_cast %56 : vector<64xf32> to vector<64x1xf32>
      %cst_48 = arith.constant 1.280000e+02 : f32
      %58 = vector.broadcast %cst_48 : f32 to vector<64x1xf32>
      %59 = arith.divf %57, %58 : vector<64x1xf32>
      %cst_49 = arith.constant 9.99999974E-6 : f32
      %60 = vector.broadcast %cst_49 : f32 to vector<64x1xf32>
      %61 = arith.addf %59, %60 : vector<64x1xf32>
      %62 = math.rsqrt %61 : vector<64x1xf32>
      %63 = vector.broadcast %62 : vector<64x1xf32> to vector<64x128xf32>
      %64 = arith.mulf %54, %63 : vector<64x128xf32>
      %65 = vector.broadcast %47 : vector<1x128xf32> to vector<64x128xf32>
      %66 = arith.mulf %64, %65 : vector<64x128xf32>
      %67 = vector.broadcast %48 : vector<1x128xf32> to vector<64x128xf32>
      %68 = arith.addf %66, %67 : vector<64x128xf32>
      %69 = arith.truncf %68 : vector<64x128xf32> to vector<64x128xbf16>
      %c0_50 = arith.constant 0 : index
      %c0_51 = arith.constant 0 : index
      %70 = vector.load %arg5[%c0_50, %c0_51] : memref<128x384xbf16, #tpu.memory_space<vmem>>, vector<128x384xbf16>
      %cst_52 = arith.constant dense<0.000000e+00> : vector<64x384xf32>
      %71 = tpu.matmul %69, %70, %cst_52 {dimension_numbers = #tpu.dot_dimension_numbers<[1], [0], [0], [1], [0, 0, 1, 1], [], []>} : vector<64x128xbf16>, vector<128x384xbf16>, vector<64x384xf32> -> vector<64x384xf32>
      %c0_53 = arith.constant 0 : index
      %c0_54 = arith.constant 0 : index
      %72 = vector.load %arg6[%c0_53, %c0_54] : memref<1x384xf32, #tpu.memory_space<vmem>>, vector<1x384xf32>
      %73 = vector.broadcast %72 : vector<1x384xf32> to vector<64x384xf32>
      %74 = arith.addf %71, %73 : vector<64x384xf32>
      %75 = vector.extract_strided_slice %74 {offsets = [0, 0], sizes = [64, 128], strides = [1, 1]} : vector<64x384xf32> to vector<64x128xf32>
      %cst_55 = arith.constant 0.176776692 : f32
      %76 = vector.broadcast %cst_55 : f32 to vector<64x128xf32>
      %77 = arith.mulf %75, %76 : vector<64x128xf32>
      %78 = arith.truncf %77 : vector<64x128xf32> to vector<64x128xbf16>
      %79 = vector.shape_cast %78 : vector<64x128xbf16> to vector<64x4x32xbf16>
      %80 = tpu.transpose %79, [1, 0, 2] : vector<64x4x32xbf16> -> vector<4x64x32xbf16>
      %c0_56 = arith.constant 0 : index
      %c0_57 = arith.constant 0 : index
      %c0_58 = arith.constant 0 : index
      %81 = vector.load %arg10[%c0_56, %c0_57, %c0_58] : memref<4x64x32xbf16, #tpu.memory_space<vmem>>, vector<4x64x32xbf16>
      tpu.vector_store %arg10[%c0_56, %c0_57, %c0_58], %80 {strides = array<i32>} : memref<4x64x32xbf16, #tpu.memory_space<vmem>>, vector<4x64x32xbf16>,
      %82 = vector.extract_strided_slice %74 {offsets = [0, 128], sizes = [64, 128], strides = [1, 1]} : vector<64x384xf32> to vector<64x128xf32>
      %83 = arith.truncf %82 : vector<64x128xf32> to vector<64x128xbf16>
      %84 = vector.shape_cast %83 : vector<64x128xbf16> to vector<64x4x32xbf16>
      %85 = tpu.transpose %84, [1, 0, 2] : vector<64x4x32xbf16> -> vector<4x64x32xbf16>
      %c0_59 = arith.constant 0 : index
      %c0_60 = arith.constant 0 : index
      %c0_61 = arith.constant 0 : index
      %86 = vector.load %arg11[%c0_59, %c0_60, %c0_61] : memref<4x64x32xbf16, #tpu.memory_space<vmem>>, vector<4x64x32xbf16>
      tpu.vector_store %arg11[%c0_59, %c0_60, %c0_61], %85 {strides = array<i32>} : memref<4x64x32xbf16, #tpu.memory_space<vmem>>, vector<4x64x32xbf16>,
      %87 = vector.extract_strided_slice %74 {offsets = [0, 256], sizes = [64, 128], strides = [1, 1]} : vector<64x384xf32> to vector<64x128xf32>
      %88 = arith.truncf %87 : vector<64x128xf32> to vector<64x128xbf16>
      %89 = vector.shape_cast %88 : vector<64x128xbf16> to vector<64x4x32xbf16>
      %90 = tpu.transpose %89, [1, 0, 2] : vector<64x4x32xbf16> -> vector<4x64x32xbf16>
      %c0_62 = arith.constant 0 : index
      %c0_63 = arith.constant 0 : index
      %c0_64 = arith.constant 0 : index
      %91 = vector.load %arg12[%c0_62, %c0_63, %c0_64] : memref<4x64x32xbf16, #tpu.memory_space<vmem>>, vector<4x64x32xbf16>
      tpu.vector_store %arg12[%c0_62, %c0_63, %c0_64], %90 {strides = array<i32>} : memref<4x64x32xbf16, #tpu.memory_space<vmem>>, vector<4x64x32xbf16>,
    } else {
    }
    %c32_i32 = arith.constant 32 : i32
    %3 = arith.muli %arg1, %c32_i32 : i32
    %4 = tpu.assume_multiple %3, 32 : i32
    %c0 = arith.constant 0 : index
    %5 = arith.index_cast %4 : i32 to index
    %c0_1 = arith.constant 0 : index
    %6 = vector.load %arg10[%c0, %5, %c0_1] : memref<4x64x32xbf16, #tpu.memory_space<vmem>>, vector<4x32x32xbf16>
    %cst = arith.constant -1.000000e+30 : f32
    %7 = vector.broadcast %cst : f32 to vector<4x32x1xf32>
    %c0_2 = arith.constant 0 : index
    %c0_3 = arith.constant 0 : index
    %c0_4 = arith.constant 0 : index
    %8 = vector.load %arg13[%c0_2, %c0_3, %c0_4] : memref<4x32x1xf32, #tpu.memory_space<vmem>>, vector<4x32x1xf32>
    tpu.vector_store %arg13[%c0_2, %c0_3, %c0_4], %7 {strides = array<i32>} : memref<4x32x1xf32, #tpu.memory_space<vmem>>, vector<4x32x1xf32>,
    %cst_5 = arith.constant 0.000000e+00 : f32
    %9 = vector.broadcast %cst_5 : f32 to vector<4x32x1xf32>
    %c0_6 = arith.constant 0 : index
    %c0_7 = arith.constant 0 : index
    %c0_8 = arith.constant 0 : index
    %10 = vector.load %arg14[%c0_6, %c0_7, %c0_8] : memref<4x32x1xf32, #tpu.memory_space<vmem>>, vector<4x32x1xf32>
    tpu.vector_store %arg14[%c0_6, %c0_7, %c0_8], %9 {strides = array<i32>} : memref<4x32x1xf32, #tpu.memory_space<vmem>>, vector<4x32x1xf32>,
    %cst_9 = arith.constant 0.000000e+00 : f32
    %11 = vector.broadcast %cst_9 : f32 to vector<4x32x32xf32>
    %c0_10 = arith.constant 0 : index
    %c0_11 = arith.constant 0 : index
    %c0_12 = arith.constant 0 : index
    %12 = vector.load %arg15[%c0_10, %c0_11, %c0_12] : memref<4x32x32xf32, #tpu.memory_space<vmem>>, vector<4x32x32xf32>
    tpu.vector_store %arg15[%c0_10, %c0_11, %c0_12], %11 {strides = array<i32>} : memref<4x32x32xf32, #tpu.memory_space<vmem>>, vector<4x32x32xf32>,
    %13 = tpu.iota {dimensions = array<i32: 0>} : vector<32x32xi32>
    %14 = vector.broadcast %4 : i32 to vector<32x32xi32>
    %15 = arith.addi %14, %13 : vector<32x32xi32>
    %16 = tpu.iota {dimensions = array<i32: 1>} : vector<32x32xi32>
    %c1_i32 = arith.constant 1 : i32
    %17 = arith.addi %arg1, %c1_i32 : i32
    %c1_i32_13 = arith.constant 1 : i32
    %18 = arith.muli %17, %c1_i32_13 : i32
    %c0_i32_14 = arith.constant 0 : i32
    %19 = arith.subi %18, %c0_i32_14 : i32
    %c1_i32_15 = arith.constant 1 : i32
    %c1_i32_16 = arith.constant 1 : i32
    %20 = arith.subi %c1_i32_15, %c1_i32_16 : i32
    %21 = arith.addi %19, %20 : i32
    %c1_i32_17 = arith.constant 1 : i32
    %22 = arith.divsi %21, %c1_i32_17 : i32
    %c1_i32_18 = arith.constant 1 : i32
    %c0_i32_19 = arith.constant 0 : i32
    %c0_i32_20 = arith.constant 0 : i32
    %23 = arith.subi %22, %c0_i32_20 : i32
    %24 = arith.addi %c0_i32_20, %23 : i32
    %c1_i32_21 = arith.constant 1 : i32
    scf.for %arg16 = %c0_i32_20 to %24 step %c1_i32_21  : i32 {
      %45 = arith.muli %arg16, %c1_i32_18 : i32
      %46 = arith.addi %c0_i32_19, %45 : i32
      %c32_i32_38 = arith.constant 32 : i32
      %47 = arith.muli %46, %c32_i32_38 : i32
      %48 = tpu.assume_multiple %47, 32 : i32
      %c0_39 = arith.constant 0 : index
      %49 = arith.index_cast %48 : i32 to index
      %c0_40 = arith.constant 0 : index
      %50 = vector.load %arg11[%c0_39, %49, %c0_40] : memref<4x64x32xbf16, #tpu.memory_space<vmem>>, vector<4x32x32xbf16>
      %c0_41 = arith.constant 0 : index
      %51 = arith.index_cast %48 : i32 to index
      %c0_42 = arith.constant 0 : index
      %52 = vector.load %arg12[%c0_41, %51, %c0_42] : memref<4x64x32xbf16, #tpu.memory_space<vmem>>, vector<4x32x32xbf16>
      "tpu.trace_start"() <{level = 10 : i32, message = "hqd,hkd->hqk"}> : () -> ()
      %cst_43 = arith.constant dense<0.000000e+00> : vector<4x32x32xf32>
      %53 = tpu.matmul %6, %50, %cst_43 {dimension_numbers = #tpu.dot_dimension_numbers<[2], [2], [1], [1], [0, 0, 0, 1, 1, 1], [0], [0]>} : vector<4x32x32xbf16>, vector<4x32x32xbf16>, vector<4x32x32xf32> -> vector<4x32x32xf32>
      "tpu.trace_stop"() : () -> ()
      %54 = vector.broadcast %48 : i32 to vector<32x32xi32>
      %55 = arith.addi %54, %16 : vector<32x32xi32>
      %56 = arith.cmpi sge, %15, %55 : vector<32x32xi32>
      %57 = vector.shape_cast %56 : vector<32x32xi1> to vector<1x32x32xi1>
      %cst_44 = arith.constant -1.000000e+30 : f32
      %58 = vector.shape_cast %57 : vector<1x32x32xi1> to vector<1x32x32xi1>
      %59 = vector.broadcast %58 : vector<1x32x32xi1> to vector<4x32x32xi1>
      %60 = vector.broadcast %cst_44 : f32 to vector<4x32x32xf32>
      %61 = arith.select %59, %53, %60 : vector<4x32x32xi1>, vector<4x32x32xf32>
      %c0_45 = arith.constant 0 : index
      %c0_46 = arith.constant 0 : index
      %c0_47 = arith.constant 0 : index
      %62 = vector.load %arg13[%c0_45, %c0_46, %c0_47] : memref<4x32x1xf32, #tpu.memory_space<vmem>>, vector<4x32x1xf32>
      %cst_48 = arith.constant dense<0xFF800000> : vector<4x32xf32>
      %63 = vector.multi_reduction <maximumf>, %61, %cst_48 [2] : vector<4x32x32xf32> to vector<4x32xf32>
      %64 = vector.shape_cast %63 : vector<4x32xf32> to vector<4x32x1xf32>
      %65 = arith.maximumf %62, %64 : vector<4x32x1xf32>
      %66 = arith.subf %62, %65 : vector<4x32x1xf32>
      %67 = math.exp %66 : vector<4x32x1xf32>
      %68 = vector.broadcast %65 : vector<4x32x1xf32> to vector<4x32x32xf32>
      %69 = arith.subf %61, %68 : vector<4x32x32xf32>
      %70 = math.exp %69 : vector<4x32x32xf32>
      %c0_49 = arith.constant 0 : index
      %c0_50 = arith.constant 0 : index
      %c0_51 = arith.constant 0 : index
      %71 = vector.load %arg14[%c0_49, %c0_50, %c0_51] : memref<4x32x1xf32, #tpu.memory_space<vmem>>, vector<4x32x1xf32>
      %72 = arith.mulf %67, %71 : vector<4x32x1xf32>
      %cst_52 = arith.constant dense<0.000000e+00> : vector<4x32xf32>
      %73 = vector.multi_reduction <add>, %70, %cst_52 [2] : vector<4x32x32xf32> to vector<4x32xf32>
      %74 = vector.shape_cast %73 : vector<4x32xf32> to vector<4x32x1xf32>
      %75 = arith.addf %72, %74 : vector<4x32x1xf32>
      %c0_53 = arith.constant 0 : index
      %c0_54 = arith.constant 0 : index
      %c0_55 = arith.constant 0 : index
      %76 = vector.load %arg14[%c0_53, %c0_54, %c0_55] : memref<4x32x1xf32, #tpu.memory_space<vmem>>, vector<4x32x1xf32>
      tpu.vector_store %arg14[%c0_53, %c0_54, %c0_55], %75 {strides = array<i32>} : memref<4x32x1xf32, #tpu.memory_space<vmem>>, vector<4x32x1xf32>,
      %c0_56 = arith.constant 0 : index
      %c0_57 = arith.constant 0 : index
      %c0_58 = arith.constant 0 : index
      %77 = vector.load %arg15[%c0_56, %c0_57, %c0_58] : memref<4x32x32xf32, #tpu.memory_space<vmem>>, vector<4x32x32xf32>
      %78 = vector.broadcast %67 : vector<4x32x1xf32> to vector<4x32x32xf32>
      %79 = arith.mulf %78, %77 : vector<4x32x32xf32>
      %80 = arith.truncf %70 : vector<4x32x32xf32> to vector<4x32x32xbf16>
      "tpu.trace_start"() <{level = 10 : i32, message = "hqk,hkd->hqd"}> : () -> ()
      %cst_59 = arith.constant dense<0.000000e+00> : vector<4x32x32xf32>
      %81 = tpu.matmul %80, %52, %cst_59 {dimension_numbers = #tpu.dot_dimension_numbers<[2], [1], [1], [2], [0, 0, 0, 1, 1, 2], [0], [0]>} : vector<4x32x32xbf16>, vector<4x32x32xbf16>, vector<4x32x32xf32> -> vector<4x32x32xf32>
      "tpu.trace_stop"() : () -> ()
      %82 = arith.addf %79, %81 : vector<4x32x32xf32>
      %c0_60 = arith.constant 0 : index
      %c0_61 = arith.constant 0 : index
      %c0_62 = arith.constant 0 : index
      %83 = vector.load %arg15[%c0_60, %c0_61, %c0_62] : memref<4x32x32xf32, #tpu.memory_space<vmem>>, vector<4x32x32xf32>
      tpu.vector_store %arg15[%c0_60, %c0_61, %c0_62], %82 {strides = array<i32>} : memref<4x32x32xf32, #tpu.memory_space<vmem>>, vector<4x32x32xf32>,
      %c0_63 = arith.constant 0 : index
      %c0_64 = arith.constant 0 : index
      %c0_65 = arith.constant 0 : index
      %84 = vector.load %arg13[%c0_63, %c0_64, %c0_65] : memref<4x32x1xf32, #tpu.memory_space<vmem>>, vector<4x32x1xf32>
      tpu.vector_store %arg13[%c0_63, %c0_64, %c0_65], %65 {strides = array<i32>} : memref<4x32x1xf32, #tpu.memory_space<vmem>>, vector<4x32x1xf32>,
    }
    %c0_22 = arith.constant 0 : index
    %c0_23 = arith.constant 0 : index
    %c0_24 = arith.constant 0 : index
    %25 = vector.load %arg15[%c0_22, %c0_23, %c0_24] : memref<4x32x32xf32, #tpu.memory_space<vmem>>, vector<4x32x32xf32>
    %c0_25 = arith.constant 0 : index
    %c0_26 = arith.constant 0 : index
    %c0_27 = arith.constant 0 : index
    %26 = vector.load %arg14[%c0_25, %c0_26, %c0_27] : memref<4x32x1xf32, #tpu.memory_space<vmem>>, vector<4x32x1xf32>
    %27 = tpu.reciprocal %26 {approx = true} : vector<4x32x1xf32> -> vector<4x32x1xf32>
    %28 = vector.broadcast %27 : vector<4x32x1xf32> to vector<4x32x32xf32>
    %29 = arith.mulf %25, %28 : vector<4x32x32xf32>
    %30 = arith.truncf %29 : vector<4x32x32xf32> to vector<4x32x32xbf16>
    %31 = tpu.transpose %30, [1, 0, 2] : vector<4x32x32xbf16> -> vector<32x4x32xbf16>
    %32 = vector.shape_cast %31 : vector<32x4x32xbf16> to vector<32x128xbf16>
    %c0_28 = arith.constant 0 : index
    %c0_29 = arith.constant 0 : index
    %33 = vector.load %arg7[%c0_28, %c0_29] : memref<128x128xbf16, #tpu.memory_space<vmem>>, vector<128x128xbf16>
    %cst_30 = arith.constant dense<0.000000e+00> : vector<32x128xf32>
    %34 = tpu.matmul %32, %33, %cst_30 {dimension_numbers = #tpu.dot_dimension_numbers<[1], [0], [0], [1], [0, 0, 1, 1], [], []>} : vector<32x128xbf16>, vector<128x128xbf16>, vector<32x128xf32> -> vector<32x128xf32>
    %c0_31 = arith.constant 0 : index
    %c0_32 = arith.constant 0 : index
    %35 = vector.load %arg8[%c0_31, %c0_32] : memref<1x128xf32, #tpu.memory_space<vmem>>, vector<1x128xf32>
    %36 = vector.broadcast %35 : vector<1x128xf32> to vector<32x128xf32>
    %37 = arith.addf %34, %36 : vector<32x128xf32>
    %c0_33 = arith.constant 0 : index
    %38 = arith.index_cast %4 : i32 to index
    %c0_34 = arith.constant 0 : index
    %39 = vector.load %arg2[%c0_33, %38, %c0_34] : memref<1x64x128xf32, #tpu.memory_space<vmem>>, vector<1x32x128xf32>
    %40 = vector.shape_cast %39 : vector<1x32x128xf32> to vector<32x128xf32>
    %41 = arith.addf %40, %37 : vector<32x128xf32>
    %c0_35 = arith.constant 0 : index
    %c0_36 = arith.constant 0 : index
    %c0_37 = arith.constant 0 : index
    %42 = vector.load %arg9[%c0_35, %c0_36, %c0_37] : memref<1x32x128xf32, #tpu.memory_space<vmem>>, vector<1x32x128xf32>
    %43 = vector.shape_cast %42 : vector<1x32x128xf32> to vector<32x128xf32>
    %44 = vector.shape_cast %41 : vector<32x128xf32> to vector<1x32x128xf32>
    tpu.vector_store %arg9[%c0_35, %c0_36, %c0_37], %44 {strides = array<i32>} : memref<1x32x128xf32, #tpu.memory_space<vmem>>, vector<1x32x128xf32>,
    return
  }
  func.func @transform_0(%arg0: i32, %arg1: i32) -> (i32, i32, i32) {
    %c0_i32 = arith.constant 0 : i32
    %c0_i32_0 = arith.constant 0 : i32
    %c0_i32_1 = arith.constant 0 : i32
    return %arg0, %c0_i32, %c0_i32_0 : i32, i32, i32
  }
  func.func @transform_1(%arg0: i32, %arg1: i32) -> (i32, i32) {
    %c0_i32 = arith.constant 0 : i32
    %c0_i32_0 = arith.constant 0 : i32
    %c0_i32_1 = arith.constant 0 : i32
    return %c0_i32, %c0_i32_0 : i32, i32
  }
  func.func @transform_2(%arg0: i32, %arg1: i32) -> (i32, i32) {
    %c0_i32 = arith.constant 0 : i32
    %c0_i32_0 = arith.constant 0 : i32
    %c0_i32_1 = arith.constant 0 : i32
    return %c0_i32, %c0_i32_0 : i32, i32
  }
  func.func @transform_3(%arg0: i32, %arg1: i32) -> (i32, i32) {
    %c0_i32 = arith.constant 0 : i32
    %c0_i32_0 = arith.constant 0 : i32
    %c0_i32_1 = arith.constant 0 : i32
    return %c0_i32, %c0_i32_0 : i32, i32
  }
  func.func @transform_4(%arg0: i32, %arg1: i32) -> (i32, i32) {
    %c0_i32 = arith.constant 0 : i32
    %c0_i32_0 = arith.constant 0 : i32
    %c0_i32_1 = arith.constant 0 : i32
    return %c0_i32, %c0_i32_0 : i32, i32
  }
  func.func @transform_5(%arg0: i32, %arg1: i32) -> (i32, i32) {
    %c0_i32 = arith.constant 0 : i32
    %c0_i32_0 = arith.constant 0 : i32
    %c0_i32_1 = arith.constant 0 : i32
    return %c0_i32, %c0_i32_0 : i32, i32
  }
  func.func @transform_6(%arg0: i32, %arg1: i32) -> (i32, i32) {
    %c0_i32 = arith.constant 0 : i32
    %c0_i32_0 = arith.constant 0 : i32
    %c0_i32_1 = arith.constant 0 : i32
    return %c0_i32, %c0_i32_0 : i32, i32
  }
  func.func @transform_7(%arg0: i32, %arg1: i32) -> (i32, i32, i32) {
    %c0_i32 = arith.constant 0 : i32
    %c0_i32_0 = arith.constant 0 : i32
    return %arg0, %arg1, %c0_i32 : i32, i32, i32
  }
}

</mosaic_0001>

<bundles_post_ra>
// kernel: tpu_custom_call.1
= control target key start
LH: loop header
LB: loop body
LE: loop exit
PB: predicated region body
PF: predicated region fallthrough
CT: control target
= control target key end

     0   :  { %s8970_s0 = inlined_call_operand.hbm [shape: f32[2,64,128], index: 0, kind: input, shape index: {}]   ;;  %s8971_s1 = inlined_call_operand.vmem [shape: f32[1,128], index: 1, kind: input, shape index: {}]   ;;  %s8972_s2 = inlined_call_operand.vmem [shape: f32[1,128], index: 2, kind: input, shape index: {}]   ;;  %s8973_s3 = inlined_call_operand.hbm [shape: bf16[128,384], index: 3, kind: input, shape index: {}]   ;;  %s8974_s4 = inlined_call_operand.vmem [shape: f32[1,384], index: 4, kind: input, shape index: {}]   ;;  %s8975_s5 = inlined_call_operand.hbm [shape: bf16[128,128], index: 5, kind: input, shape index: {}]   ;;  %s8976_s6 = inlined_call_operand.vmem [shape: f32[1,128], index: 6, kind: input, shape index: {}]   ;;  %s8977_s7 = inlined_call_operand.hbm [shape: f32[2,64,128], index: 7, kind: output, shape index: {}]  }
   0x1   :  { %8991 = sst [smem:[#allocation26_spill]] %s8973_s3 }
   0x2   :  { %8992 = sst [smem:[#allocation27_spill]] %s8975_s5 }
   0x3   :  { %8993 = sst [smem:[#allocation28_spill]] %s8976_s6 }
   0x4   :  { %8994 = sst [smem:[#allocation29_spill]] %s8977_s7 }
   0x5   :  { %12 = vsyncpa [#allocation9], 0 }
   0x6   :  { %14 = vsyncpa [#allocation9 + $0x1], 0 }
   0x7   :  { %15 = vsyncpa [#allocation12], 0 }
   0x8   :  { %16 = vsyncpa [#allocation10], 0 }
   0x9   :  { %18 = vsyncpa [#allocation10 + $0x1], 0  ;;  %s7134_s24 = smov 0   ;;  %s7136_s25 = smov 0  }
   0xa   :  { %s7138_s26 = smov 0   ;;  %s7140_s27 = smov 0  }
   0xb   :  { %s7142_s28 = smov 0   ;;  %s7144_s29 = smov 0  }
   0xc   :  { %s7146_s30 = smov 0   ;;  %s7148_s8 = smov 0  }
   0xd   :  { %s7150_s9 = smov 0   ;;  %s7152_s10 = smov 0  }
   0xe   :  { %s7154_s11 = smov 0  }
   0xf LB: > { %8995 = sst [smem:[#allocation18_spill]] %s7021_s24  ;;  %s6230_s12 = sadd.s32 4294967295, %s7061_s11   ;;  %s7061_s11 = sphi %s7154_s11, %s24_s11   ;;  %s7057_s10 = sphi %s7152_s10, %s9037_s10   ;;  %s7053_s9 = sphi %s7150_s9, %s9029_s9   ;;  %s7049_s8 = sphi %s7148_s8, %s9036_s8   ;;  %s7045_s30 = sphi %s7146_s30, %s9028_s30   ;;  %s7041_s29 = sphi %s7144_s29, %s9035_s29   ;;  %s7037_s28 = sphi %s7142_s28, %s9034_s28   ;;  %s7033_s27 = sphi %s7140_s27, %s9033_s27   ;;  %s7029_s26 = sphi %s7138_s26, %s9032_s26   ;;  %s7025_s25 = sphi %s7136_s25, %s9031_s25   ;;  %s7021_s24 = sphi %s7134_s24, %s9030_s24  }
  0x10   : > { %8996 = sst [smem:[#allocation19_spill]] %s7049_s8  ;;  %s6231_s13 = sadd.s32 4294967294, %s7061_s11  }
  0x11   : > { %8997 = sst [smem:[#allocation20_spill]] %s7053_s9  ;;  %p56_p0 = scmp.ne.s32.totalorder %s7037_s28, %s7033_s27 }
  0x12   : > { %p7190_p1 = scmp.eq.s32.totalorder %s6230_s12, 0  ;;  %p207_p2 = scmp.ne.s32.totalorder %s7029_s26, %s7025_s25 }
  0x13   : > { %p208_p4 = scmp.eq.s32.totalorder %s6230_s12, 3  ;;  %p213_p5 = scmp.ne.s32.totalorder %s7025_s25, %s7021_s24 }
  0x14   : > { %s8998_s14 = scalar_select %p7190_p1, 1, 0 }
  0x15   : > { %p7199_p3 = por %p7190_p1, %p56_p0  ;;  %p214_p6 = scmp.eq.s32.totalorder %s6231_s13, 3 }
  0x16   : > { %p7205_p7 = por %p208_p4, %p207_p2  ;;  %p6232_p8 = scmp.ge.s32.totalorder %s7061_s11, 1 }
  0x17   : > { %s8999_s16 = scalar_select %p7199_p3, 1, 0 }
  0x18   : > { %s9000_s17 = scalar_select %p7205_p7, 1, 0 }
  0x19   : > { %p7210_p9 = por %p214_p6, %p213_p5  ;;  %p221_p10 = scmp.lt.s32.totalorder %s7061_s11, 5 }
  0x1a   : > { %9001 = sst [smem:[#allocation21_spill]] %s9000_s17  ;;  %s7067_s20 = smov [#allocation11]  }
  0x1b   : > { %s9002_s18 = scalar_select %p7210_p9, 1, 0 }
  0x1c   : > { %p7215_p11 = pnand %p6232_p8, %p221_p10  ;;  %s239_s21 = sshll.u32 %s7067_s20, 4  ;;  %s240_s21 = int_to_ptr.vmem [resolvable:$true] %s239_s21 }
  0x1d   : > { %9003 = sst [smem:[#allocation22_spill]] %s9002_s18  ;;  %s7068_s23 = smov [#allocation13]  }
  0x1e   : > { %s9004_s19 = scalar_select %p7215_p11, 1, 0 }
  0x1f   : > { %p6547_p12 = pneg %p7215_p11  ;;  %s255_s27 = sshll.u32 %s7068_s23, 4  ;;  %s7227_s27 = int_to_ptr.vmem [resolvable:$true] %s255_s27 }
  0x20   : > { %s9006_s3 = sld [smem:[#allocation26_spill]] }
  0x21   : > { %p7223_p13 = pnand %p6547_p12, %p7190_p1 }
  0x23   : > { %p6847_p2 = pneg %p7223_p13 }
  0x26   : > { %s6845_s15 = scalar_lea.hbm %s9006_s3, 3072 }
  0x27   : > { %p6846_p0 = scmp.ne.s32.totalorder %s9006_s3, %s6845_s15  ;;  %p6852_p6 = scmp.lt.u32.totalorder %s6845_s15, %s9006_s3 }
  0x29   : > { %p6848_p4 = pnand %p6847_p2, %p6846_p0 }
  0x2b   : > { %p6849_p5 = pneg %p6848_p4 }
  0x2d   : > { %p6854_p8 = pnand %p6852_p6, %p6849_p5 }
  0x2f   : > { %6857 = shalt.err (!%p6854_p8)
}
  0x30   : > { %s6858_s23 = scalar_lea.vmem %s240_s21, 3072  ;;  %p6866_p7 = scmp.lt.s32.totalorder %s240_s21, %s240_s21 }
  0x31   : > { %p6859_p10 = scmp.ne.s32.totalorder %s240_s21, %s6858_s23  ;;  %p6867_p1 = scmp.lt.s32.totalorder %s6858_s23, %s6858_s23 }
  0x33   : > { %p6861_p12 = pnand %p6859_p10, %p6847_p2  ;;  %p6868_p3 = por %p6867_p1, %p6866_p7 }
  0x35   : > { %p6862_p9 = pneg %p6861_p12 }
  0x37   : > { %p6869_p11 = pnand %p6868_p3, %p6862_p9 }
  0x39   : > { %6872 = shalt.err (!%p6869_p11)
}
  0x3a   : > { %s7069_s18 = smov 192   ;;  %s7070_s12 = smov 12  }
  0x3b   : > { %6550 = dma.hbm_to_vmem [thread:$0]  (!%p7223_p13), %s9006_s3, 3072, %s240_s21, [#allocation12], %s7069_s18, %s7069_s18, %s7070_s12  }
  0x3c   : > { %s9007_s5 = sld [smem:[#allocation27_spill]] }
  0x42   : > { %s6873_s20 = scalar_lea.hbm %s9007_s5, 1024 }
  0x43   : > { %p6874_p0 = scmp.ne.s32.totalorder %s9007_s5, %s6873_s20  ;;  %p6880_p7 = scmp.lt.u32.totalorder %s6873_s20, %s9007_s5 }
  0x45   : > { %p6876_p1 = pnand %p6874_p0, %p6847_p2 }
  0x47   : > { %p6877_p3 = pneg %p6876_p1 }
  0x49   : > { %p6882_p9 = pnand %p6880_p7, %p6877_p3 }
  0x4b   : > { %6885 = shalt.err (!%p6882_p9)
}
  0x4c   : > { %s6886_s21 = scalar_lea.vmem %s7227_s27, 1024  ;;  %p6894_p6 = scmp.lt.s32.totalorder %s7227_s27, %s7227_s27 }
  0x4d   : > { %p6887_p11 = scmp.ne.s32.totalorder %s7227_s27, %s6886_s21  ;;  %p6895_p8 = scmp.lt.s32.totalorder %s6886_s21, %s6886_s21 }
  0x4f   : > { %p6889_p4 = pnand %p6887_p11, %p6847_p2  ;;  %p6896_p10 = por %p6895_p8, %p6894_p6 }
  0x51   : > { %p6890_p5 = pneg %p6889_p4 }
  0x53   : > { %p6897_p12 = pnand %p6896_p10, %p6890_p5 }
  0x55   : > { %6900 = shalt.err (!%p6897_p12)
}
  0x56   : > { %s7071_s6 = smov 64   ;;  %s7072_s8 = smov 4  }
  0x57   : > { %6553 = dma.hbm_to_vmem [thread:$0]  (!%p7223_p13), %s9007_s5, 1024, %s7227_s27, [#allocation12], %s7071_s6, %s7071_s6, %s7072_s8  }
  0x58   : > { %s33_s12 = sadd.s32 1, %s7053_s9  ;;  %s36_s7 = sadd.s32 1, %s7057_s10 }
  0x59   : > { %p34_p2 = scmp.ge.s32.totalorder %s33_s12, 2  ;;  %s43_s24 = sadd.s32 1, %s7041_s29 }
  0x5a   : > { %p50_p0 = scmp.ne.s32.totalorder %s7041_s29, %s7037_s28  ;;  %p51_p1 = scmp.eq.s32.totalorder %s7061_s11, 0 }
  0x5b   : > { %s9039_s12 = smov (%p34_p2, %s33_s12), 0  ;;  %s9041_s7 = smov (!%p34_p2, %s36_s7), %s7057_s10 }
  0x5c   : > { %9008 = sst [smem:[#allocation23_spill]] %s9039_s12  ;;  %p7285_p3 = por %p51_p1, %p50_p0 }
  0x5d   : > { %s193_s15 = ssub.s32 %s7053_s9, %s9039_s12  ;;  %p38_p13 = scmp.ge.s32.totalorder %s9041_s7, 2 }
  0x5e   : > { %p6564_p7 = scmp.lt.s32.totalorder %s7061_s11, 4  ;;  %s272_s27 = sand.u32 1, %s7041_s29  }
  0x5f   : > { %s6364_s13 = sshll.u32 %s7057_s10, 10  ;;  %s9043_s7 = smov (%p38_p13, %s9041_s7), 0 }
  0x60   : > { %s6236_s20 = sshll.u32 %s272_s27, 6  ;;  %s40_s23 = ssub.s32 %s7057_s10, %s9043_s7 }
  0x61   : > { %p41_p9 = scmp.eq.s32.totalorder %s40_s23, 0  ;;  %s194_s21 = sor.u32 %s193_s15, %s40_s23 }
  0x62   : > { %p195_p11 = scmp.eq.s32.totalorder %s194_s21, 0  ;;  %s7301_s17 = scalar_lea.hbm %s8970_s0, %s6364_s13 }
  0x63   : > { %s7304_s18 = scalar_select %p41_p9, %s7041_s29, %s43_s24  }
  0x64   : > { %s9010_s3 = sadd.s32 1, %s7029_s26  ;;  %s276_s12 = scalar_lea.vmem [#allocation8], %s6236_s20 }
  0x65   : > { %s7309_s5 = scalar_select %p195_p11, %s7029_s26, %s9010_s3  }
  0x66   : > { %s283_s9 = sshll.u32 %s276_s12, 4  ;;  %p7315_p4 = pnand %p6564_p7, %p7285_p3  ;;  %s7319_s9 = int_to_ptr.vmem [resolvable:$true] %s283_s9 }
  0x67   : > { %s7321_s13 = scalar_lea.sflag [#allocation9], %s272_s27  ;;  %s6901_s24 = scalar_lea.hbm %s7301_s17, 1024 }
  0x68   : > { %p6902_p5 = scmp.ne.s32.totalorder %s7301_s17, %s6901_s24  ;;  %p6903_p6 = pneg %p7315_p4 }
  0x69   : > { %s6906_s22 = scalar_lea.hbm %s8970_s0, 2048  ;;  %p6907_p12 = scmp.lt.u32.totalorder %s7301_s17, %s8970_s0 }
  0x6a   : > { %p6904_p8 = pnand %p6903_p6, %p6902_p5  ;;  %p6908_p2 = scmp.lt.u32.totalorder %s6906_s22, %s6901_s24 }
  0x6b   : > { %p6910_p1 = scmp.lt.u32.totalorder %s6901_s24, %s7301_s17 }
  0x6c   : > { %p6905_p10 = pneg %p6904_p8  ;;  %p6909_p0 = por %p6908_p2, %p6907_p12 }
  0x6e   : > { %p6911_p3 = por %p6910_p1, %p6909_p0 }
  0x70   : > { %p6912_p13 = pnand %p6911_p3, %p6905_p10 }
  0x72   : > { %6915 = shalt.err (!%p6912_p13)
}
  0x73   : > { %s6916_s27 = scalar_lea.vmem %s7319_s9, 1024  ;;  %s7073_s21 = smov [#allocation8]  }
  0x74   : > { %p6917_p7 = scmp.ne.s32.totalorder %s7319_s9, %s6916_s27  ;;  %s6921_s6 = sshll.u32 %s7073_s21, 4  ;;  %s6922_s6 = int_to_ptr.vmem [resolvable:$false] %s6921_s6 }
  0x75   : > { %s6923_s8 = scalar_lea.vmem %s6922_s6, 2048  ;;  %p6924_p5 = scmp.lt.s32.totalorder %s7319_s9, %s6922_s6 }
  0x76   : > { %p6919_p9 = pnand %p6917_p7, %p6903_p6  ;;  %p6925_p8 = scmp.lt.s32.totalorder %s6923_s8, %s6916_s27 }
  0x78   : > { %p6920_p11 = pneg %p6919_p9  ;;  %p6926_p12 = por %p6925_p8, %p6924_p5 }
  0x7a   : > { %p6927_p2 = pnand %p6926_p12, %p6920_p11 }
  0x7c   : > { %6930 = shalt.err (!%p6927_p2)
}
  0x7d   : > { %s7074_s24 = smov 128   ;;  %s7075_s3 = smov 8  }
  0x7e   : > { %6557 = dma.hbm_to_vmem [thread:$0]  (!%p7315_p4), %s7301_s17, 1024, %s7319_s9, %s7321_s13, %s7074_s24, %s7074_s24, %s7075_s3  }
  0x7f   : > { %p9012_p6 = scmp.ne.s32.totalorder %s9004_s19, 0 }
  0x81   : > { %295 = sbr.rel (%p9012_p6) target bundleno = 2391 (0x957), region = 48 }
  0x88   : > { %s297_s12 = sand.u32 1, %s7037_s28   ;;  %p9013_p10 = scmp.ne.s32.totalorder %s8999_s16, 0 }
  0x89   : > { %s6240_s22 = sshll.u32 %s297_s12, 6  ;;  %s298_s20 = scalar_lea.sflag [#allocation9], %s297_s12 }
  0x8a   : > { %s7352_s23 = scalar_lea.vmem [#allocation8], %s6240_s22 }
  0x8b   : > { %7008 = dma.done.wait (%p9013_p10), %s298_s20, 1024  }
  0x8c   : > { %7010 = vsyncadd (%p9013_p10), %s298_s20, 4294966272  ;;  %p9014_p0 = scmp.ne.s32.totalorder %s8998_s14, 0 }
  0x8e   : > { %7012 = dma.done.wait (%p9014_p0), [#allocation12], 4096  }
  0x8f   : > { %7014 = vsyncadd (%p9014_p0), [#allocation12], 4294963200  ;;  %s337_s9 = sand.u32 1, %s7025_s25   ;;  %p6244_p4 = scmp.ne.s32.totalorder %s7045_s30, 0 }
  0x90   : > { %s6243_s19 = sshll.u32 %s337_s9, 5  ;;  %v346_v0 = vld [vmem:[%s7352_s23] sm:$0xff] (!%p6244_p4)  ;;  %v348_v1 = vld [vmem:[%s7352_s23 + $0x10] sm:$0xff] (!%p6244_p4)  ;;  %v347_v2 = vld [vmem:[%s7352_s23 + $0x8] sm:$0xff] (!%p6244_p4)  ;;  %v7076_v63 = vmov (!%p6244_p4), 0   ;;  %s7077_s6 = smov (!%p6244_p4), 96  }
  0x91   : > { %s7365_s17 = scalar_lea.vmem [#allocation14], %s6243_s19  ;;  %345 = sbr.rel (%p6244_p4) target bundleno = 1026 (0x402), region = 64  ;;  %356 = vadd.xlane.f32.xlu0 (!%p6244_p4), %v346_v0  ;;  %360 = vadd.xlane.f32.xlu1 (!%p6244_p4), %v348_v1  ;;  %v349_v3 = vld [vmem:[%s7352_s23 + $0x18] sm:$0xff] (!%p6244_p4)  ;;  %v350_v4 = vld [vmem:[%s7352_s23 + $0x20] sm:$0xff] (!%p6244_p4)  ;;  %v351_v5 = vld [vmem:[%s7352_s23 + $0x28] sm:$0xff] (!%p6244_p4)  ;;  %vm1894_vm0 = vcmask (!%p6244_p4), 261120  }
  0x92   : > { %v352_v6 = vld [vmem:[%s7352_s23 + $0x30] sm:$0xff] (!%p6244_p4)  ;;  %v353_v7 = vld [vmem:[%s7352_s23 + $0x38] sm:$0xff] (!%p6244_p4)  ;;  %v6691_v9 = vld [vmem:[#allocation11] ss:$12 sps:$4 sm:$0xff] (!%p6244_p4)   ;;  %686 = vmatprep.mubr.bf16.mxu0 (!%p6244_p4), %v7076_v63  ;;  %s7078_s8 = smov (!%p6244_p4), 64   ;;  %s7079_s24 = smov (!%p6244_p4), 32  }
  0x93   : > { %v6689_v8 = vld [vmem:[#allocation11 + $0x4] ss:$12 sps:$4 sm:$0xff] (!%p6244_p4)   ;;  %v6692_v10 = vld [vmem:[#allocation11 + $0x1c] ss:$12 sps:$4 sm:$0xff] (!%p6244_p4)   ;;  %v6696_v45 = vld [vmem:[#allocation11 + $0x34] ss:$12 sps:$4 sm:$0xff] (!%p6244_p4)  }
  0x94   : > { %v6694_v11 = vld [vmem:[#allocation11 + $0x8] ss:$12 sps:$4 sm:$0xff] (!%p6244_p4)   ;;  %654 = vmatprep.subr.bf16.mxu0 (!%p6244_p4), %v6689_v8  ;;  %v6695_v44 = vld [vmem:[#allocation11 + $0x18] ss:$12 sps:$4 sm:$0xff] (!%p6244_p4)   ;;  %v6698_v46 = vld [vmem:[#allocation11 + $0x20] ss:$12 sps:$4 sm:$0xff] (!%p6244_p4)  }
  0x95   : > { %358 = vadd.xlane.f32.xlu0 (!%p6244_p4), %v347_v2  ;;  %362 = vadd.xlane.f32.xlu1 (!%p6244_p4), %v349_v3  ;;  %v6699_v47 = vld [vmem:[#allocation11 + $0x30] ss:$12 sps:$4 sm:$0xff] (!%p6244_p4)   ;;  %v6700_v48 = vld [vmem:[#allocation11 + $0x4c] ss:$12 sps:$4 sm:$0xff] (!%p6244_p4)   ;;  %v6703_v50 = vld [vmem:[#allocation11 + $0x48] ss:$12 sps:$4 sm:$0xff] (!%p6244_p4)  }
  0x96   : > { %655 = vmatpush1.bf16.msra.mxu0 (!%p6244_p4), %v6691_v9  ;;  %6419 = vmatprep.subr.bf16.mxu1 (!%p6244_p4), %v6694_v11  ;;  %v6702_v49 = vld [vmem:[#allocation11 + $0x38] ss:$12 sps:$4 sm:$0xff] (!%p6244_p4)   ;;  %v6706_v52 = vld [vmem:[#allocation11 + $0x50] ss:$12 sps:$4 sm:$0xff] (!%p6244_p4)   ;;  %v6707_v53 = vld [vmem:[#allocation11 + $0x60] ss:$12 sps:$4 sm:$0xff] (!%p6244_p4)  }
  0x97   : > { %656 = vmatprep.subr.bf16.mxu0 (!%p6244_p4), %v6692_v10  ;;  %6420 = vmatpush3.bf16.msra.mxu1 (!%p6244_p4), %v6694_v11  ;;  %v6704_v51 = vld [vmem:[#allocation11 + $0x64] ss:$12 sps:$4 sm:$0xff] (!%p6244_p4)   ;;  %v6708_v54 = vld [vmem:[#allocation11 + $0x7c] ss:$12 sps:$4 sm:$0xff] (!%p6244_p4)   ;;  %v6712_v57 = vld [vmem:[#allocation11 + $0x94] ss:$12 sps:$4 sm:$0xff] (!%p6244_p4)  }
  0x98   : > { %6421 = vmatprep.subr.bf16.mxu1 %v6698_v46  ;;  %v6710_v55 = vld [vmem:[#allocation11 + $0x68] ss:$12 sps:$4 sm:$0xff]   ;;  %v6711_v56 = vld [vmem:[#allocation11 + $0x78] ss:$12 sps:$4 sm:$0xff]   ;;  %v6714_v58 = vld [vmem:[#allocation11 + $0x80] ss:$12 sps:$4 sm:$0xff]  }
  0x99   : > { %364 = vadd.xlane.f32.xlu0 %v350_v4  ;;  %366 = vadd.xlane.f32.xlu1 %v351_v5  ;;  %v6715_v59 = vld [vmem:[#allocation11 + $0x90] ss:$12 sps:$4 sm:$0xff]   ;;  %v6716_v60 = vld [vmem:[#allocation11 + $0xac] ss:$12 sps:$4 sm:$0xff]   ;;  %v6719_v62 = vld [vmem:[#allocation11 + $0xa8] ss:$12 sps:$4 sm:$0xff]  }
  0x9a   : > { %657 = vmatpush1.bf16.msra.mxu0 %v6695_v44  ;;  %v6718_v61 = vld [vmem:[#allocation11 + $0x98] ss:$12 sps:$4 sm:$0xff]  }
  0x9b   : > { %658 = vmatprep.subr.bf16.mxu0 %v6696_v45  ;;  %6422 = vmatpush3.bf16.msra.mxu1 %v6698_v46 }
  0x9c   : > { %6423 = vmatprep.subr.bf16.mxu1 %v6702_v49 }
  0x9d   : > { %368 = vadd.xlane.f32.xlu0 %v352_v6  ;;  %370 = vadd.xlane.f32.xlu1 %v353_v7 }
  0x9e   : > { %659 = vmatpush1.bf16.msra.mxu0 %v6699_v47 }
  0x9f   : > { %660 = vmatprep.subr.bf16.mxu0 %v6700_v48  ;;  %6424 = vmatpush3.bf16.msra.mxu1 %v6702_v49 }
  0xa0   : > { %6425 = vmatprep.subr.bf16.mxu1 %v6706_v52 }
  0xa2   : > { %661 = vmatpush1.bf16.msra.mxu0 %v6703_v50 }
  0xa3   : > { %662 = vmatprep.subr.bf16.mxu0 %v6704_v51  ;;  %6426 = vmatpush3.bf16.msra.mxu1 %v6706_v52 }
  0xa4   : > { %6427 = vmatprep.subr.bf16.mxu1 %v6710_v55 }
  0xa6   : > { %663 = vmatpush1.bf16.msra.mxu0 %v6707_v53 }
  0xa7   : > { %664 = vmatprep.subr.bf16.mxu0 %v6708_v54  ;;  %6428 = vmatpush3.bf16.msra.mxu1 %v6710_v55 }
  0xa8   : > { %6429 = vmatprep.subr.bf16.mxu1 %v6714_v58 }
  0xaa   : > { %665 = vmatpush1.bf16.msra.mxu0 %v6711_v56 }
  0xab   : > { %666 = vmatprep.subr.bf16.mxu0 %v6712_v57  ;;  %6430 = vmatpush3.bf16.msra.mxu1 %v6714_v58 }
  0xac   : > { %6431 = vmatprep.subr.bf16.mxu1 %v6718_v61 }
  0xae   : > { %667 = vmatpush1.bf16.msra.mxu0 %v6715_v59 }
  0xaf   : > { %668 = vmatprep.subr.bf16.mxu0 %v6716_v60  ;;  %6432 = vmatpush3.bf16.msra.mxu1 %v6718_v61 }
  0xb2   : > { %669 = vmatpush1.bf16.msra.mxu0 %v6719_v62 }
 0x11e   : > { %v357_v12 = vpop.xlane.xlu0 %356  ;;  %v361_v13 = vpop.xlane.xlu1 %360 }
 0x11f   : > { %v373_v14 = vmul.f32 0.0078125, %v357_v12  ;;  %v375_v15 = vmul.f32 0.0078125, %v361_v13 }
 0x121   : > { %v7376_v16 = vsub.f32 %v346_v0, %v373_v14  ;;  %v7378_v17 = vsub.f32 %v348_v1, %v375_v15  ;;  %v6720_v0 = vld [vmem:[#allocation11 + $0xb0] ss:$12 sps:$4 sm:$0xff]  }
 0x122   : > { %v359_v18 = vpop.xlane.xlu0 %358  ;;  %v363_v19 = vpop.xlane.xlu1 %362  ;;  %6433 = vmatprep.subr.bf16.mxu1 %v6720_v0 }
 0x123   : > { %v374_v20 = vmul.f32 0.0078125, %v359_v18  ;;  %v389_v21 = vmul.f32 %v7376_v16, %v7376_v16  ;;  %v376_v22 = vmul.f32 0.0078125, %v363_v19  ;;  %v391_v25 = vmul.f32 %v7378_v17, %v7378_v17  ;;  %6434 = vmatpush3.bf16.msra.mxu1 %v6720_v0 }
 0x125   : > { %v7382_v23 = vsub.f32 %v347_v2, %v374_v20  ;;  %397 = vadd.xlane.f32.xlu0 %v389_v21  ;;  %v7384_v24 = vsub.f32 %v349_v3, %v376_v22 }
 0x126   : > { %v365_v26 = vpop.xlane.xlu0 %364  ;;  %v367_v27 = vpop.xlane.xlu1 %366 }
 0x127   : > { %v377_v28 = vmul.f32 0.0078125, %v365_v26  ;;  %v390_v29 = vmul.f32 %v7382_v23, %v7382_v23  ;;  %v378_v30 = vmul.f32 0.0078125, %v367_v27  ;;  %v392_v33 = vmul.f32 %v7384_v24, %v7384_v24 }
 0x129   : > { %v7390_v31 = vsub.f32 %v350_v4, %v377_v28  ;;  %401 = vadd.xlane.f32.xlu0 %v391_v25  ;;  %399 = vadd.xlane.f32.xlu1 %v390_v29  ;;  %v7392_v32 = vsub.f32 %v351_v5, %v378_v30  ;;  %v6245_v30 = vld [vmem:[%s8971_s1] ss:$0 sm:$0xff] }
 0x12a   : > { %v369_v34 = vpop.xlane.xlu0 %368  ;;  %v371_v35 = vpop.xlane.xlu1 %370 }
 0x12b   : > { %v379_v36 = vmul.f32 0.0078125, %v369_v34  ;;  %v393_v37 = vmul.f32 %v7390_v31, %v7390_v31  ;;  %v380_v38 = vmul.f32 0.0078125, %v371_v35  ;;  %v394_v41 = vmul.f32 %v7392_v32, %v7392_v32 }
 0x12d   : > { %v7398_v39 = vsub.f32 %v352_v6, %v379_v36  ;;  %403 = vadd.xlane.f32.xlu1 %v392_v33  ;;  %405 = vadd.xlane.f32.xlu0 %v393_v37  ;;  %v7400_v40 = vsub.f32 %v353_v7, %v380_v38  ;;  %v6246_v38 = vld [vmem:[%s8972_s2] ss:$0 sm:$0xff] }
 0x12f   : > { %v395_v42 = vmul.f32 %v7398_v39, %v7398_v39  ;;  %v396_v43 = vmul.f32 %v7400_v40, %v7400_v40 }
 0x131   : > { %407 = vadd.xlane.f32.xlu1 %v394_v41  ;;  %409 = vadd.xlane.f32.xlu0 %v395_v42 }
 0x135   : > { %411 = vadd.xlane.f32.xlu1 %v396_v43 }
 0x1b2   : > { %v398_v1 = vpop.xlane.xlu0 %397 }
 0x1b3   : > { %v413_v2 = vmul.f32 0.0078125, %v398_v1 }
 0x1b5   : > { %v421_v3 = vadd.f32 1e-05, %v413_v2 }
 0x1b6   : > { %v400_v4 = vpop.xlane.xlu1 %399  ;;  %v402_v5 = vpop.xlane.xlu0 %401 }
 0x1b7   : > { %6721 = vrsqrt.f32 %v421_v3  ;;  %v414_v6 = vmul.f32 0.0078125, %v400_v4  ;;  %v415_v7 = vmul.f32 0.0078125, %v402_v5  ;;  %v509_v3 = vld [vmem:[%s8974_s4] sm:$0x7] }
 0x1b9   : > { %v422_v8 = vadd.f32 1e-05, %v414_v6  ;;  %v423_v9 = vadd.f32 1e-05, %v415_v7 }
 0x1ba   : > { %v404_v10 = vpop.xlane.xlu1 %403  ;;  %v406_v11 = vpop.xlane.xlu0 %405 }
 0x1bb   : > { %6723 = vrsqrt.f32 %v422_v8  ;;  %v416_v12 = vmul.f32 0.0078125, %v404_v10  ;;  %v417_v13 = vmul.f32 0.0078125, %v406_v11 }
 0x1bc   : > { %6725 = vrsqrt.f32 %v423_v9 }
 0x1bd   : > { %v424_v14 = vadd.f32 1e-05, %v416_v12  ;;  %v425_v15 = vadd.f32 1e-05, %v417_v13 }
 0x1be   : > { %v408_v18 = vpop.xlane.xlu1 %407  ;;  %v410_v19 = vpop.xlane.xlu0 %409 }
 0x1bf   : > { %6727 = vrsqrt.f32 %v424_v14  ;;  %v418_v20 = vmul.f32 0.0078125, %v408_v18  ;;  %v419_v21 = vmul.f32 0.0078125, %v410_v19 }
 0x1c0   : > { %6729 = vrsqrt.f32 %v425_v15 }
 0x1c1   : > { %v6722_v22 = vpop.eup %6721  ;;  %v426_v25 = vadd.f32 1e-05, %v418_v20  ;;  %v427_v26 = vadd.f32 1e-05, %v419_v21 }
 0x1c2   : > { %v412_v27 = vpop.xlane.xlu1 %411  ;;  %v437_v28 = vmul.f32 %v6722_v22, %v7376_v16 }
 0x1c3   : > { %6731 = vrsqrt.f32 %v426_v25  ;;  %v420_v29 = vmul.f32 0.0078125, %v412_v27 }
 0x1c4   : > { %6733 = vrsqrt.f32 %v427_v26  ;;  %v451_v37 = vmul.f32 %v6245_v30, %v437_v28 }
 0x1c5   : > { %v6724_v33 = vpop.eup %6723  ;;  %v428_v34 = vadd.f32 1e-05, %v420_v29 }
 0x1c6   : > { %v6726_v35 = vpop.eup %6725  ;;  %v438_v36 = vmul.f32 %v6724_v33, %v7382_v23  ;;  %v465_v45 = vadd.f32 %v6246_v38, %v451_v37 }
 0x1c7   : > { %6735 = vrsqrt.f32 %v428_v34  ;;  %v439_v16 = vmul.f32 %v6726_v35, %v7378_v17 }
 0x1c8   : > { %v452_v41 = vmul.f32 %v6245_v30, %v438_v36 }
 0x1c9   : > { %v6728_v42 = vpop.eup %6727  ;;  %v453_v43 = vmul.f32 %v6245_v30, %v439_v16 }
 0x1ca   : > { %v6730_v44 = vpop.eup %6729  ;;  %v466_v46 = vadd.f32 %v6246_v38, %v452_v41  ;;  %v440_v47 = vmul.f32 %v6728_v42, %v7384_v24 }
 0x1cb   : > { %v441_v48 = vmul.f32 %v6730_v44, %v7390_v31  ;;  %v467_v51 = vadd.f32 %v6246_v38, %v453_v43 }
 0x1cc   : > { %v473_v49 = vpack.c.bf16 %v466_v46, %v465_v45  ;;  %v454_v23 = vmul.f32 %v6245_v30, %v440_v47 }
 0x1cd   : > { %v6732_v50 = vpop.eup %6731  ;;  %v455_v54 = vmul.f32 %v6245_v30, %v441_v48 }
 0x1ce   : > { %v6734_v52 = vpop.eup %6733  ;;  %687 = vmatmul.mubr.bf16.vlgmr.msra.gmra.mrb[0].mxu0 %v473_v49  ;;  %6435 = vmatprep.mubr.bf16.mxu1 %v473_v49  ;;  %v468_v53 = vadd.f32 %v6246_v38, %v454_v23  ;;  %v442_v17 = vmul.f32 %v6732_v50, %v7392_v32 }
 0x1cf   : > { %696 = vmatprep.mubr.bf16.mxu0 %v7076_v63  ;;  %v443_v55 = vmul.f32 %v6734_v52, %v7398_v39  ;;  %v469_v31 = vadd.f32 %v6246_v38, %v455_v54  ;;  %v511_v39 = vlaneseq }
 0x1d0   : > { %v474_v56 = vpack.c.bf16 %v468_v53, %v467_v51  ;;  %v456_v57 = vmul.f32 %v6245_v30, %v442_v17 }
 0x1d1   : > { %v6736_v24 = vpop.eup %6735  ;;  %v457_v60 = vmul.f32 %v6245_v30, %v443_v55  ;;  %v7426_v2 = vshrl.u32 %v511_v39, 7 }
 0x1d2   : > { %6436 = vmatmul.mubr.bf16.vlgmr.msra.gmra.mrb[0].mxu1 %v474_v56  ;;  %v470_v58 = vadd.f32 %v6246_v38, %v456_v57  ;;  %v444_v59 = vmul.f32 %v6736_v24, %v7400_v40 }
 0x1d3   : > { %v471_v0 = vadd.f32 %v6246_v38, %v457_v60  ;;  %v513_v40 = vsub.s32 0, %v7426_v2  ;;  %v517_v4 = vsub.s32 1, %v7426_v2  ;;  %v521_v6 = vsub.s32 2, %v7426_v2 }
 0x1d4   : > { %v475_v61 = vpack.c.bf16 %v470_v58, %v469_v31  ;;  %v458_v62 = vmul.f32 %v6245_v30, %v444_v59 }
 0x1d5   : > { %v7433_v5 = vrot.slane %v509_v3, %v513_v40  ;;  %v7436_v8 = vrot.slane %v509_v3, %v517_v4  ;;  %v522_v14 = vrot.slane %v509_v3, %v521_v6 }
 0x1d6   : > { %697 = vmatmul.mubr.bf16.gmra.mrb[4].mxu0 %v474_v56  ;;  %6439 = vmatprep.mubr.bf16.mxu1 %v475_v61  ;;  %v472_v32 = vadd.f32 %v6246_v38, %v458_v62 }
 0x1d7   : > { %706 = vmatprep.mubr.bf16.mxu0 %v7076_v63 }
 0x1d8   : > { %v476_v1 = vpack.c.bf16 %v472_v32, %v471_v0 }
 0x1da   : > { %6440 = vmatmul.mubr.bf16.gmra.mrb[4].mxu1 %v476_v1 }
 0x1de   : > { %707 = vmatmul.mubr.bf16.gmra.mrb[8].mxu0 %v475_v61 }
 0x1df   : > { %716 = vmatprep.mubr.bf16.mxu0 %v7076_v63 }
 0x1e6   : > { %717 = vmatmul.mubr.bf16.gmra.mrb[12].mxu0 %v476_v1 }
 0x2a1   : > { %v688_v7 = vpop.f32.mrb[0].mxu0 }
 0x2a2   : > { %v689_v9 = vadd.f32 %v688_v7, %v7433_v5  ;;  %v690_v10 = vpop.f32.mrb[1].mxu0 }
 0x2a3   : > { %v692_v11 = vpop.f32.mrb[2].mxu0  ;;  %v691_v15 = vadd.f32 %v690_v10, %v7436_v8 }
 0x2a4   : > { %v693_v12 = vadd.f32 %v692_v11, %v7433_v5  ;;  %v694_v13 = vpop.f32.mrb[3].mxu0  ;;  %v792_v20 = vmul.f32 0.17677669, %v689_v9 }
 0x2a5   : > { %v695_v18 = vadd.f32 %v694_v13, %v7436_v8  ;;  %v6437_v19 = vpop.f32.mrb[0].mxu1 }
 0x2a6   : > { %v793_v21 = vmul.f32 0.17677669, %v693_v12  ;;  %v761_v22 = vpop.f32.mrb[1].mxu1  ;;  %v770_v28 = vadd.f32 %v6437_v19, %v522_v14  ;;  %v7081_v19 = vmov 1934713408  }
 0x2a7   : > { %v7442_v25 = vpack.c.bf16 %v695_v18, %v691_v15  ;;  %v6438_v26 = vpop.f32.mrb[2].mxu1  ;;  %v762_v33 = vadd.f32 %v761_v22, %v522_v14 }
 0x2a8   : > { %v7444_v27 = vpack.c.bf16 %v793_v21, %v792_v20  ;;  %v773_v29 = vadd.f32 %v6438_v26, %v522_v14  ;;  %v764_v30 = vpop.f32.mrb[3].mxu1  ;;  %v935_v20 = vunpack.c.l.s4 %v7081_v19  ;;  %v7552_v21 = vpack.i.b16 %v7076_v63, %v7076_v63 }
 0x2a9   : > { %v765_v34 = vadd.f32 %v764_v30, %v522_v14  ;;  %1919 = vrot.lane.b32.xlu0 %v7442_v25, %s7077_s6  ;;  %v698_v35 = vpop.f32.mrb[4].mxu0 }
 0x2aa   : > { %v7448_v36 = vpack.c.bf16 %v773_v29, %v770_v28  ;;  %v699_v37 = vadd.f32 %v698_v35, %v7433_v5  ;;  %v700_v38 = vpop.f32.mrb[5].mxu0  ;;  %v936_v28 = vunpack.c.0.s8 %v935_v20  ;;  %v1947_v29 = vshrl.u32 %v7442_v25, 16 }
 0x2ab   : > { %v7451_v16 = vpack.c.bf16 %v765_v34, %v762_v33  ;;  %v702_v41 = vpop.f32.mrb[6].mxu0  ;;  %v701_v44 = vadd.f32 %v700_v38, %v7436_v8 }
 0x2ac   : > { %v703_v42 = vadd.f32 %v702_v41, %v7433_v5  ;;  %3025 = vrot.lane.b32.xlu1 %v7448_v36, %s7077_s6  ;;  %v704_v43 = vpop.f32.mrb[7].mxu0  ;;  %v794_v47 = vmul.f32 0.17677669, %v699_v37  ;;  %v3067_v41 = vshrl.u32 %v7448_v36, 16 }
 0x2ad   : > { %v705_v45 = vadd.f32 %v704_v43, %v7436_v8  ;;  %1927 = vrot.lane.b32.xlu0 %v7442_v25, %s7078_s8  ;;  %v6441_v46 = vpop.f32.mrb[4].mxu1  ;;  %v7562_v43 = vsub.s32 %v936_v28, %v7426_v2 }
 0x2ae   : > { %v795_v48 = vmul.f32 0.17677669, %v703_v42  ;;  %v777_v49 = vpop.f32.mrb[5].mxu1  ;;  %v786_v52 = vadd.f32 %v6441_v46, %v522_v14 }
 0x2af   : > { %v7460_v23 = vpack.c.bf16 %v705_v45, %v701_v44  ;;  %v6442_v50 = vpop.f32.mrb[6].mxu1  ;;  %v778_v54 = vadd.f32 %v777_v49, %v522_v14  ;;  %v836_v45 = vshrl.u32 %v7444_v27, 16 }
 0x2b0   : > { %v7462_v51 = vpack.c.bf16 %v795_v48, %v794_v47  ;;  %v789_v53 = vadd.f32 %v6442_v50, %v522_v14  ;;  %3033 = vrot.lane.b32.xlu1 %v7448_v36, %s7078_s8  ;;  %v780_v17 = vpop.f32.mrb[7].mxu1  ;;  %v3051_v48 = vshrl.u32 %v7451_v16, 16 }
 0x2b1   : > { %v781_v55 = vadd.f32 %v780_v17, %v522_v14  ;;  %1935 = vrot.lane.b32.xlu0 %v7442_v25, %s7079_s24  ;;  %v708_v56 = vpop.f32.mrb[8].mxu0  ;;  %v1963_v50 = vshrl.u32 %v7460_v23, 16 }
 0x2b2   : > { %v7468_v57 = vpack.c.bf16 %v789_v53, %v786_v52  ;;  %v709_v24 = vadd.f32 %v708_v56, %v7433_v5  ;;  %v710_v31 = vpop.f32.mrb[9].mxu0  ;;  %v858_v52 = vshrl.u32 %v7462_v51, 16 }
 0x2b3   : > { %v7471_v58 = vpack.c.bf16 %v781_v55, %v778_v54  ;;  %v712_v59 = vpop.f32.mrb[10].mxu0  ;;  %v711_v62 = vadd.f32 %v710_v31, %v7436_v8 }
 0x2b4   : > { %v713_v60 = vadd.f32 %v712_v59, %v7433_v5  ;;  %3041 = vrot.lane.b32.xlu1 %v7448_v36, %s7079_s24  ;;  %v714_v61 = vpop.f32.mrb[11].mxu0  ;;  %v796_v32 = vmul.f32 0.17677669, %v709_v24 }
 0x2b5   : > { %v715_v0 = vadd.f32 %v714_v61, %v7436_v8  ;;  %808 = vrot.lane.b32.xlu0 %v7444_v27, %s7077_s6 }
 0x2b6   : > { %v797_v1 = vmul.f32 0.17677669, %v713_v60 }
 0x2b7   : > { %v7480_v39 = vpack.c.bf16 %v715_v0, %v711_v62 }
 0x2b8   : > { %v7482_v40 = vpack.c.bf16 %v797_v1, %v796_v32  ;;  %1921 = vrot.lane.b32.xlu1 %v7460_v23, %s7077_s6 }
 0x2b9   : > { %816 = vrot.lane.b32.xlu0 %v7444_v27, %s7078_s8  ;;  %v718_v3 = vpop.f32.mrb[12].mxu0  ;;  %v1979_v55 = vshrl.u32 %v7480_v39, 16 }
 0x2ba   : > { %v719_v4 = vadd.f32 %v718_v3, %v7433_v5  ;;  %v720_v6 = vpop.f32.mrb[13].mxu0  ;;  %v874_v56 = vshrl.u32 %v7482_v40, 16 }
 0x2bb   : > { %v722_v7 = vpop.f32.mrb[14].mxu0  ;;  %v721_v11 = vadd.f32 %v720_v6, %v7436_v8 }
 0x2bc   : > { %v723_v9 = vadd.f32 %v722_v7, %v7433_v5  ;;  %1929 = vrot.lane.b32.xlu1 %v7460_v23, %s7078_s8  ;;  %v724_v10 = vpop.f32.mrb[15].mxu0  ;;  %v798_v13 = vmul.f32 0.17677669, %v719_v4  ;;  %v7080_v5 = vmov 1983009808  }
 0x2bd   : > { %v725_v12 = vadd.f32 %v724_v10, %v7436_v8  ;;  %824 = vrot.lane.b32.xlu0 %v7444_v27, %s7079_s24  ;;  %v904_v8 = vunpack.c.l.s4 %v7080_v5 }
 0x2be   : > { %v799_v14 = vmul.f32 0.17677669, %v723_v9 }
 0x2bf   : > { %v7496_v15 = vpack.c.bf16 %v725_v12, %v721_v11  ;;  %v905_v22 = vunpack.c.0.s8 %v904_v8 }
 0x2c0   : > { %v7498_v18 = vpack.c.bf16 %v799_v14, %v798_v13  ;;  %1937 = vrot.lane.b32.xlu1 %v7460_v23, %s7079_s24 }
 0x2c1   : > { %3023 = vrot.lane.b32.xlu0 %v7451_v16, %s7077_s6  ;;  %v7557_v37 = vsub.s32 %v905_v22, %v7426_v2  ;;  %v3083_v2 = vshrl.u32 %v7471_v58, 16 }
 0x2c4   : > { %3029 = vrot.lane.b32.xlu1 %v7468_v57, %s7077_s6 }
 0x2c5   : > { %3031 = vrot.lane.b32.xlu0 %v7451_v16, %s7078_s8 }
 0x2c8   : > { %3037 = vrot.lane.b32.xlu1 %v7468_v57, %s7078_s8 }
 0x2c9   : > { %3039 = vrot.lane.b32.xlu0 %v7451_v16, %s7079_s24 }
 0x2cc   : > { %810 = vrot.lane.b32.xlu1 %v7462_v51, %s7077_s6 }
 0x2cd   : > { %3027 = vrot.lane.b32.xlu0 %v7471_v58, %s7077_s6 }
 0x2d0   : > { %818 = vrot.lane.b32.xlu1 %v7462_v51, %s7078_s8 }
 0x2d1   : > { %3035 = vrot.lane.b32.xlu0 %v7471_v58, %s7078_s8 }
 0x2d4   : > { %826 = vrot.lane.b32.xlu1 %v7462_v51, %s7079_s24 }
 0x2d5   : > { %1923 = vrot.lane.b32.xlu0 %v7480_v39, %s7077_s6 }
 0x2d8   : > { %812 = vrot.lane.b32.xlu1 %v7482_v40, %s7077_s6 }
 0x2d9   : > { %1931 = vrot.lane.b32.xlu0 %v7480_v39, %s7078_s8 }
 0x2dc   : > { %1925 = vrot.lane.b32.xlu1 %v7496_v15, %s7077_s6 }
 0x2dd   : > { %1939 = vrot.lane.b32.xlu0 %v7480_v39, %s7079_s24 }
 0x2e0   : > { %1933 = vrot.lane.b32.xlu1 %v7496_v15, %s7078_s8 }
 0x2e1   : > { %820 = vrot.lane.b32.xlu0 %v7482_v40, %s7078_s8 }
 0x2e4   : > { %1941 = vrot.lane.b32.xlu1 %v7496_v15, %s7079_s24 }
 0x2e5   : > { %828 = vrot.lane.b32.xlu0 %v7482_v40, %s7079_s24 }
 0x2e8   : > { %814 = vrot.lane.b32.xlu1 %v7498_v18, %s7077_s6 }
 0x2e9   : > { %3043 = vrot.lane.b32.xlu0 %v7471_v58, %s7079_s24 }
 0x2ec   : > { %822 = vrot.lane.b32.xlu1 %v7498_v18, %s7078_s8 }
 0x2f0   : > { %830 = vrot.lane.b32.xlu1 %v7498_v18, %s7079_s24 }
 0x2f4   : > { %3045 = vrot.lane.b32.xlu1 %v7468_v57, %s7079_s24 }
 0x31b   : > { %v1920_v26 = vpop.permute.xlu0 %1919 }
 0x31c   : > { %v1945_v30 = vpack.i.b16 %v1920_v26, %v7442_v25  ;;  %v1948_v33 = vshrl.u32 %v1920_v26, 16 }
 0x31e   : > { %v1949_v34 = vpack.i.b16 %v1948_v33, %v1947_v29  ;;  %v3026_v35 = vpop.permute.xlu1 %3025  ;;  %v2007_v44 = vcombine.high %v1945_v30, %v7552_v21  ;;  %v2014_v53 = vrot.slane %v1945_v30, %v7557_v37 }
 0x31f   : > { %v3065_v38 = vpack.i.b16 %v3026_v35, %v7448_v36  ;;  %v3068_v42 = vshrl.u32 %v3026_v35, 16  ;;  %v1928_v63 = vpop.permute.xlu0 %1927  ;;  %v3099_v36 = vshrl.u32 %v7468_v57, 16 }
 0x320   : > { %v2073_v25 = vcombine.high %v1949_v34, %v7552_v21  ;;  %v2021_v24 = vrot.slane %v2007_v44, %v7557_v37  ;;  %v1955_v31 = vshrl.u32 %v1928_v63, 16  ;;  %v2080_v61 = vrot.slane %v1949_v34, %v7557_v37 }
 0x321   : > { %v3069_v46 = vpack.i.b16 %v3068_v42, %v3067_v41  ;;  %v3243_v47 = vcombine.high %v3065_v38, %v7552_v21  ;;  %v3250_v0 = vrot.slane %v3065_v38, %v7557_v37 }
 0x322   : > { %v3034_v49 = vpop.permute.xlu1 %3033  ;;  %v2087_v62 = vrot.slane %v2073_v25, %v7557_v37 }
 0x323   : > { %v3309_v17 = vcombine.high %v3069_v46, %v7552_v21  ;;  %v1936_v54 = vpop.permute.xlu0 %1935  ;;  %v7582_v32 = vrot.slane %v3243_v47, %v7557_v37  ;;  %v7585_v1 = vrot.slane %v3069_v46, %v7557_v37  ;;  %v3075_v10 = vshrl.u32 %v3034_v49, 16 }
 0x324   : > { %v1953_v59 = vpack.i.b16 %v1936_v54, %v1928_v63  ;;  %v1956_v60 = vshrl.u32 %v1936_v54, 16 }
 0x325   : > { %v7590_v9 = vrot.slane %v3309_v17, %v7557_v37 }
 0x326   : > { %v1957_v3 = vpack.i.b16 %v1956_v60, %v1955_v31  ;;  %v2022_v4 = vcombine.high %v1953_v59, %v7552_v21  ;;  %v2029_v6 = vrot.slane %v1953_v59, %v7557_v37  ;;  %v3042_v7 = vpop.permute.xlu1 %3041 }
 0x327   : > { %v3073_v11 = vpack.i.b16 %v3042_v7, %v3034_v49  ;;  %v3076_v12 = vshrl.u32 %v3042_v7, 16 }
 0x328   : > { %v2036_v13 = vrot.slane %v2022_v4, %v7557_v37  ;;  %v2037_v14 = vcombine.low %v2014_v53, %v2029_v6  ;;  %v2038_v5 = vcombine.high %v2014_v53, %v2029_v6  ;;  %v2088_v8 = vcombine.high %v1957_v3, %v7552_v21 }
 0x329   : > { %v2095_v19 = vrot.slane %v1957_v3, %v7557_v37  ;;  %v3077_v20 = vpack.i.b16 %v3076_v12, %v3075_v10  ;;  %v3258_v22 = vcombine.high %v3073_v11, %v7552_v21  ;;  %v3265_v26 = vrot.slane %v3073_v11, %v7557_v37 }
 0x32a   : > { %v2045_v28 = vrot.slane %v2037_v14, %v7562_v43  ;;  %v2052_v29 = vrot.slane %v2038_v5, %v7562_v43  ;;  %v2053_v30 = vcombine.low %v2021_v24, %v2036_v13  ;;  %v2054_v33 = vcombine.high %v2021_v24, %v2036_v13 }
 0x32b   : > { %v2102_v34 = vrot.slane %v2088_v8, %v7557_v37  ;;  %v2103_v35 = vcombine.low %v2080_v61, %v2095_v19  ;;  %v2104_v38 = vcombine.high %v2080_v61, %v2095_v19  ;;  %v3272_v41 = vrot.slane %v3258_v22, %v7557_v37 }
 0x32c   : > { %v2061_v42 = vrot.slane %v2053_v30, %v7562_v43  ;;  %v2068_v63 = vrot.slane %v2054_v33, %v7562_v43  ;;  %v2535_v44 = vcombine.low %v2045_v28, %v2052_v29  ;;  %v6287_v25 = vcombine.high %v2045_v28, %v2052_v29 }
 0x32d   : > { %v2111_v46 = vrot.slane %v2103_v35, %v7562_v43  ;;  %v2118_v47 = vrot.slane %v2104_v38, %v7562_v43  ;;  %v2119_v49 = vcombine.low %v2087_v62, %v2102_v34  ;;  %v2120_v53 = vcombine.high %v2087_v62, %v2102_v34 }
 0x32e   : > { %v2542_v17 = vrot.slane %v2535_v44, %v7557_v37  ;;  %v2550_v54 = vrot.slane %v6287_v25, %v7557_v37  ;;  %v2551_v24 = vcombine.low %v2061_v42, %v2068_v63  ;;  %v6288_v31 = vcombine.high %v2061_v42, %v2068_v63 }
 0x32f   : > { %v2127_v59 = vrot.slane %v2119_v49, %v7562_v43  ;;  %v2134_v60 = vrot.slane %v2120_v53, %v7562_v43  ;;  %v2585_v61 = vcombine.low %v2111_v46, %v2118_v47  ;;  %v6289_v3 = vcombine.high %v2111_v46, %v2118_v47 }
 0x330   : > { %v2558_v4 = vrot.slane %v2551_v24, %v7557_v37  ;;  %v2566_v6 = vrot.slane %v6288_v31, %v7557_v37  ;;  %v2567_v7 = vcombine.low %v2542_v17, %v2550_v54  ;;  %v3273_v10 = vcombine.low %v3250_v0, %v3265_v26 }
 0x331   : > { %v2592_v62 = vrot.slane %v2585_v61, %v7557_v37  ;;  %v2600_v11 = vrot.slane %v6289_v3, %v7557_v37  ;;  %v2601_v12 = vcombine.low %v2127_v59, %v2134_v60  ;;  %v6290_v13 = vcombine.high %v2127_v59, %v2134_v60  ;;  %v809_v3 = vpop.permute.xlu0 %808 }
 0x332   : > { %v2574_v14 = vrot.slane %v2567_v7, %v7562_v43  ;;  %v2575_v5 = vcombine.low %v2558_v4, %v2566_v6  ;;  %v3274_v8 = vcombine.high %v3250_v0, %v3265_v26  ;;  %v3281_v19 = vrot.slane %v3273_v10, %v7562_v43  ;;  %v1922_v4 = vpop.permute.xlu1 %1921 }
 0x333   : > { %v2608_v22 = vrot.slane %v2601_v12, %v7557_v37  ;;  %v2616_v28 = vrot.slane %v6290_v13, %v7557_v37  ;;  %v2617_v29 = vcombine.low %v2592_v62, %v2600_v11  ;;  %v3289_v30 = vcombine.low %v7582_v32, %v3272_v41 }
 0x334   : > { %v2582_v33 = vrot.slane %v2575_v5, %v7562_v43  ;;  %v3288_v34 = vrot.slane %v3274_v8, %v7562_v43  ;;  %v3290_v35 = vcombine.high %v7582_v32, %v3272_v41  ;;  %v3324_v38 = vcombine.high %v3077_v20, %v7552_v21 }
 0x335   : > { %v2624_v42 = vrot.slane %v2617_v29, %v7562_v43  ;;  %v2625_v0 = vcombine.low %v2608_v22, %v2616_v28  ;;  %v3297_v26 = vrot.slane %v3289_v30, %v7562_v43  ;;  %v3331_v63 = vrot.slane %v3077_v20, %v7557_v37 }
 0x336   : > { %v2583_v44 = vcombine.low %v2574_v14, %v2582_v33  ;;  %v2584_v25 = vcombine.high %v2574_v14, %v2582_v33  ;;  %v3304_v46 = vrot.slane %v3290_v35, %v7562_v43  ;;  %v3338_v47 = vrot.slane %v3324_v38, %v7557_v37 }
 0x337   : > { %v2632_v49 = vrot.slane %v2625_v0, %v7562_v43  ;;  %v3339_v53 = vcombine.low %v7585_v1, %v3331_v63  ;;  %v3340_v32 = vcombine.high %v7585_v1, %v3331_v63  ;;  %v3739_v41 = vcombine.low %v3281_v19, %v3288_v34  ;;  %v817_v63 = vpop.permute.xlu0 %816 }
 0x338   : > { %v2939_v17 = vshrl.u32 %v2583_v44, 16  ;;  %v2947_v54 = vshrl.u32 %v2584_v25, 16  ;;  %v3355_v24 = vcombine.low %v7590_v9, %v3338_v47  ;;  %v3356_v31 = vcombine.high %v7590_v9, %v3338_v47 }
 0x339   : > { %v2633_v20 = vcombine.low %v2624_v42, %v2632_v49  ;;  %v2634_v59 = vcombine.high %v2624_v42, %v2632_v49  ;;  %v3347_v60 = vrot.slane %v3339_v53, %v7562_v43  ;;  %v3354_v61 = vrot.slane %v3340_v32, %v7562_v43 }
 0x33a   : > { %v3363_v6 = vrot.slane %v3355_v24, %v7562_v43  ;;  %v3370_v7 = vrot.slane %v3356_v31, %v7562_v43  ;;  %v3746_v1 = vrot.slane %v3739_v41, %v7557_v37  ;;  %v6307_v10 = vcombine.high %v3281_v19, %v3288_v34 }
 0x33b   : > { %v2937_v62 = vpack.i.b16 %v2633_v20, %v2583_v44  ;;  %v2940_v11 = vshrl.u32 %v2633_v20, 16  ;;  %v2945_v12 = vpack.i.b16 %v2634_v59, %v2584_v25  ;;  %v2948_v13 = vshrl.u32 %v2634_v59, 16  ;;  %v1930_v44 = vpop.permute.xlu1 %1929 }
 0x33c   : > { %v3754_v9 = vrot.slane %v6307_v10, %v7557_v37  ;;  %v3755_v14 = vcombine.low %v3297_v26, %v3304_v46  ;;  %v6308_v5 = vcombine.high %v3297_v26, %v3304_v46  ;;  %v3789_v8 = vcombine.low %v3347_v60, %v3354_v61 }
 0x33d   : > { %v2941_v22 = vpack.i.b16 %v2940_v11, %v2939_v17  ;;  %v2949_v28 = vpack.i.b16 %v2948_v13, %v2947_v54  ;;  %2999 = vst.msk [vmem:[#allocation3] sm:$0xff] %vm1894_vm0, %v2937_v62  ;;  %3007 = vst.msk [vmem:[#allocation3 + $0x40] sm:$0xff] %vm1894_vm0, %v2945_v12  ;;  %v6309_v29 = vcombine.high %v3347_v60, %v3354_v61  ;;  %v837_v47 = vshrl.u32 %v809_v3, 16  ;;  %v825_v11 = vpop.permute.xlu0 %824 }
 0x33e   : > { %v3805_v30 = vcombine.low %v3363_v6, %v3370_v7  ;;  %v3762_v33 = vrot.slane %v3755_v14, %v7557_v37  ;;  %v3770_v19 = vrot.slane %v6308_v5, %v7557_v37  ;;  %v3771_v34 = vcombine.low %v3746_v1, %v3754_v9 }
 0x33f   : > { %v3796_v35 = vrot.slane %v3789_v8, %v7557_v37  ;;  %3003 = vst.msk [vmem:[#allocation3 + $0x20] sm:$0xff] %vm1894_vm0, %v2941_v22  ;;  %3011 = vst.msk [vmem:[#allocation3 + $0x60] sm:$0xff] %vm1894_vm0, %v2949_v28  ;;  %v3804_v38 = vrot.slane %v6309_v29, %v7557_v37  ;;  %v6310_v0 = vcombine.high %v3363_v6, %v3370_v7  ;;  %v1964_v31 = vshrl.u32 %v1922_v4, 16  ;;  %v1938_v12 = vpop.permute.xlu1 %1937 }
 0x340   : > { %v3812_v42 = vrot.slane %v3805_v30, %v7557_v37  ;;  %v834_v26 = vpack.i.b16 %v809_v3, %v7444_v27  ;;  %v3778_v25 = vrot.slane %v3771_v34, %v7562_v43  ;;  %v3779_v46 = vcombine.low %v3762_v33, %v3770_v19 }
 0x341   : > { %v1961_v49 = vpack.i.b16 %v1922_v4, %v7460_v23  ;;  %v3820_v53 = vrot.slane %v6310_v0, %v7557_v37  ;;  %v3821_v32 = vcombine.low %v3796_v35, %v3804_v38  ;;  %v838_v24 = vpack.i.b16 %v837_v47, %v836_v45 }
 0x342   : > { %v902_v41 = vcombine.high %v834_v26, %v7552_v21  ;;  %v909_v17 = vrot.slane %v834_v26, %v7557_v37  ;;  %v3786_v54 = vrot.slane %v3779_v46, %v7562_v43  ;;  %v1965_v45 = vpack.i.b16 %v1964_v31, %v1963_v50 }
 0x343   : > { %v2139_v20 = vcombine.high %v1961_v49, %v7552_v21  ;;  %v3828_v59 = vrot.slane %v3821_v32, %v7562_v43  ;;  %v3829_v60 = vcombine.low %v3812_v42, %v3820_v53  ;;  %v7660_v3 = vrot.slane %v1961_v49, %v7557_v37 }
 0x344   : > { %v916_v61 = vrot.slane %v902_v41, %v7557_v37  ;;  %v3787_v6 = vcombine.low %v3778_v25, %v3786_v54  ;;  %v3788_v7 = vcombine.high %v3778_v25, %v3786_v54  ;;  %v968_v1 = vcombine.high %v838_v24, %v7552_v21 }
 0x345   : > { %v975_v10 = vrot.slane %v838_v24, %v7557_v37  ;;  %v3836_v27 = vrot.slane %v3829_v60, %v7562_v43  ;;  %v7668_v4 = vrot.slane %v2139_v20, %v7557_v37  ;;  %v844_v62 = vshrl.u32 %v817_v63, 16 }
 0x346   : > { %v4059_v13 = vshrl.u32 %v3787_v6, 16  ;;  %v4067_v9 = vshrl.u32 %v3788_v7, 16  ;;  %v982_v14 = vrot.slane %v968_v1, %v7557_v37  ;;  %v1971_v5 = vshrl.u32 %v1930_v44, 16 }
 0x347   : > { %v3837_v8 = vcombine.low %v3828_v59, %v3836_v27  ;;  %v3838_v22 = vcombine.high %v3828_v59, %v3836_v27  ;;  %v2205_v28 = vcombine.high %v1965_v45, %v7552_v21  ;;  %v7673_v29 = vrot.slane %v1965_v45, %v7557_v37 }
 0x348   : > { %v842_v23 = vpack.i.b16 %v825_v11, %v817_v63  ;;  %v845_v50 = vshrl.u32 %v825_v11, 16  ;;  %v1969_v30 = vpack.i.b16 %v1938_v12, %v1930_v44  ;;  %v1972_v33 = vshrl.u32 %v1938_v12, 16 }
 0x349   : > { %v4057_v19 = vpack.i.b16 %v3837_v8, %v3787_v6  ;;  %v4060_v34 = vshrl.u32 %v3837_v8, 16  ;;  %v4065_v35 = vpack.i.b16 %v3838_v22, %v3788_v7  ;;  %v4068_v38 = vshrl.u32 %v3838_v22, 16 }
 0x34a   : > { %v7676_v42 = vrot.slane %v2205_v28, %v7557_v37  ;;  %v846_v0 = vpack.i.b16 %v845_v50, %v844_v62  ;;  %v917_v26 = vcombine.high %v842_v23, %v7552_v21  ;;  %v924_v25 = vrot.slane %v842_v23, %v7557_v37 }
 0x34b   : > { %v4061_v46 = vpack.i.b16 %v4060_v34, %v4059_v13  ;;  %v4069_v47 = vpack.i.b16 %v4068_v38, %v4067_v9  ;;  %4104 = vst.msk [vmem:[#allocation4 + $0x8] sm:$0xff] %vm1894_vm0, %v4057_v19  ;;  %4112 = vst.msk [vmem:[#allocation4 + $0x48] sm:$0xff] %vm1894_vm0, %v4065_v35  ;;  %v1973_v63 = vpack.i.b16 %v1972_v33, %v1971_v5 }
 0x34c   : > { %v2154_v44 = vcombine.high %v1969_v30, %v7552_v21  ;;  %v931_v49 = vrot.slane %v917_v26, %v7557_v37  ;;  %v932_v53 = vcombine.low %v909_v17, %v924_v25  ;;  %v933_v32 = vcombine.high %v909_v17, %v924_v25 }
 0x34d   : > { %v983_v41 = vcombine.high %v846_v0, %v7552_v21  ;;  %4108 = vst.msk [vmem:[#allocation4 + $0x28] sm:$0xff] %vm1894_vm0, %v4061_v46  ;;  %4116 = vst.msk [vmem:[#allocation4 + $0x68] sm:$0xff] %vm1894_vm0, %v4069_v47  ;;  %v990_v54 = vrot.slane %v846_v0, %v7557_v37  ;;  %v2161_v24 = vrot.slane %v1969_v30, %v7557_v37 }
 0x34e   : > { %v2168_v31 = vrot.slane %v2154_v44, %v7557_v37  ;;  %v2220_v20 = vcombine.high %v1973_v63, %v7552_v21  ;;  %v940_v59 = vrot.slane %v932_v53, %v7562_v43  ;;  %v947_v60 = vrot.slane %v933_v32, %v7562_v43 }
 0x34f   : > { %v948_v6 = vcombine.low %v916_v61, %v931_v49  ;;  %v949_v17 = vcombine.high %v916_v61, %v931_v49  ;;  %v997_v7 = vrot.slane %v983_v41, %v7557_v37  ;;  %v998_v1 = vcombine.low %v975_v10, %v990_v54 }
 0x350   : > { %v999_v27 = vcombine.high %v975_v10, %v990_v54  ;;  %v2169_v45 = vcombine.low %v7660_v3, %v2161_v24  ;;  %v1430_v12 = vcombine.low %v940_v59, %v947_v60  ;;  %v6271_v13 = vcombine.high %v940_v59, %v947_v60 }
 0x351   : > { %v956_v62 = vrot.slane %v948_v6, %v7562_v43  ;;  %v963_v11 = vrot.slane %v949_v17, %v7562_v43  ;;  %v1006_v9 = vrot.slane %v998_v1, %v7562_v43  ;;  %v1014_v8 = vcombine.low %v982_v14, %v997_v7 }
 0x352   : > { %v1013_v5 = vrot.slane %v999_v27, %v7562_v43  ;;  %v1015_v22 = vcombine.high %v982_v14, %v997_v7  ;;  %v1437_v61 = vrot.slane %v1430_v12, %v7557_v37  ;;  %v1445_v28 = vrot.slane %v6271_v13, %v7557_v37 }
 0x353   : > { %v1446_v23 = vcombine.low %v956_v62, %v963_v11  ;;  %v6272_v10 = vcombine.high %v956_v62, %v963_v11  ;;  %v1022_v50 = vrot.slane %v1014_v8, %v7562_v43  ;;  %v2170_v0 = vcombine.high %v7660_v3, %v2161_v24 }
 0x354   : > { %v1029_v30 = vrot.slane %v1015_v22, %v7562_v43  ;;  %v1480_v33 = vcombine.low %v1006_v9, %v1013_v5  ;;  %v6273_v19 = vcombine.high %v1006_v9, %v1013_v5  ;;  %v1462_v38 = vcombine.low %v1437_v61, %v1445_v28  ;;  %v3024_v22 = vpop.permute.xlu0 %3023 }
 0x355   : > { %v1453_v34 = vrot.slane %v1446_v23, %v7557_v37  ;;  %v1461_v35 = vrot.slane %v6272_v10, %v7557_v37  ;;  %v2177_v49 = vrot.slane %v2169_v45, %v7562_v43  ;;  %v2184_v53 = vrot.slane %v2170_v0, %v7562_v43 }
 0x356   : > { %v1487_v14 = vrot.slane %v1480_v33, %v7557_v37  ;;  %v1495_v26 = vrot.slane %v6273_v19, %v7557_v37  ;;  %v1496_v25 = vcombine.low %v1022_v50, %v1029_v30  ;;  %v6274_v46 = vcombine.high %v1022_v50, %v1029_v30 }
 0x357   : > { %v1469_v47 = vrot.slane %v1462_v38, %v7562_v43  ;;  %v1470_v44 = vcombine.low %v1453_v34, %v1461_v35  ;;  %v2185_v3 = vcombine.low %v7668_v4, %v2168_v31  ;;  %v2186_v59 = vcombine.high %v7668_v4, %v2168_v31  ;;  %v3030_v38 = vpop.permute.xlu1 %3029 }
 0x358   : > { %v1503_v32 = vrot.slane %v1496_v25, %v7557_v37  ;;  %v1511_v41 = vrot.slane %v6274_v46, %v7557_v37  ;;  %v1512_v54 = vcombine.low %v1487_v14, %v1495_v26  ;;  %v2227_v60 = vrot.slane %v1973_v63, %v7557_v37 }
 0x359   : > { %v1477_v24 = vrot.slane %v1470_v44, %v7562_v43  ;;  %v2234_v6 = vrot.slane %v2220_v20, %v7557_v37  ;;  %v2193_v1 = vrot.slane %v2185_v3, %v7562_v43  ;;  %v2635_v27 = vcombine.low %v2177_v49, %v2184_v53  ;;  %v3032_v3 = vpop.permute.xlu0 %3031 }
 0x35a   : > { %v1519_v17 = vrot.slane %v1512_v54, %v7562_v43  ;;  %v1520_v7 = vcombine.low %v1503_v32, %v1511_v41  ;;  %v2200_v11 = vrot.slane %v2186_v59, %v7562_v43  ;;  %v2235_v12 = vcombine.low %v7673_v29, %v2227_v60 }
 0x35b   : > { %v1478_v45 = vcombine.low %v1469_v47, %v1477_v24  ;;  %v1479_v62 = vcombine.high %v1469_v47, %v1477_v24  ;;  %v2236_v4 = vcombine.high %v7673_v29, %v2227_v60  ;;  %v2251_v63 = vcombine.low %v7676_v42, %v2234_v6 }
 0x35c   : > { %v1527_v13 = vrot.slane %v1520_v7, %v7562_v43  ;;  %v2252_v31 = vcombine.high %v7676_v42, %v2234_v6  ;;  %v2243_v5 = vrot.slane %v2235_v12, %v7562_v43  ;;  %v2642_v8 = vrot.slane %v2635_v27, %v7557_v37 }
 0x35d   : > { %v1834_v20 = vshrl.u32 %v1478_v45, 16  ;;  %v1842_v9 = vshrl.u32 %v1479_v62, 16  ;;  %v2250_v23 = vrot.slane %v2236_v4, %v7562_v43  ;;  %v2259_v10 = vrot.slane %v2251_v63, %v7562_v43 }
 0x35e   : > { %v1528_v61 = vcombine.low %v1519_v17, %v1527_v13  ;;  %v1529_v28 = vcombine.high %v1519_v17, %v1527_v13  ;;  %v2266_v50 = vrot.slane %v2252_v31, %v7562_v43  ;;  %v6291_v29 = vcombine.high %v2177_v49, %v2184_v53  ;;  %v7750_v13 = vpop.permute.xlu1 %3037 }
 0x35f   : > { %v2651_v30 = vcombine.low %v2193_v1, %v2200_v11  ;;  %v6292_v33 = vcombine.high %v2193_v1, %v2200_v11  ;;  %v2685_v25 = vcombine.low %v2243_v5, %v2250_v23  ;;  %v6293_v44 = vcombine.high %v2243_v5, %v2250_v23  ;;  %v3040_v23 = vpop.permute.xlu0 %3039 }
 0x360   : > { %v1832_v19 = vpack.i.b16 %v1528_v61, %v1478_v45  ;;  %v1835_v42 = vshrl.u32 %v1528_v61, 16  ;;  %v1840_v34 = vpack.i.b16 %v1529_v28, %v1479_v62  ;;  %v1843_v35 = vshrl.u32 %v1529_v28, 16 }
 0x361   : > { %v2650_v0 = vrot.slane %v6291_v29, %v7557_v37  ;;  %v2658_v14 = vrot.slane %v2651_v30, %v7557_v37  ;;  %v2666_v26 = vrot.slane %v6292_v33, %v7557_v37  ;;  %v2701_v49 = vcombine.low %v2259_v10, %v2266_v50 }
 0x362   : > { %v1836_v46 = vpack.i.b16 %v1835_v42, %v1834_v20  ;;  %v1844_v47 = vpack.i.b16 %v1843_v35, %v1842_v9  ;;  %1895 = vst.msk [vmem:[#allocation2] sm:$0xff] %vm1894_vm0, %v1832_v19  ;;  %1903 = vst.msk [vmem:[#allocation2 + $0x40] sm:$0xff] %vm1894_vm0, %v1840_v34  ;;  %v2692_v41 = vrot.slane %v2685_v25, %v7557_v37  ;;  %v3052_v6 = vshrl.u32 %v3024_v22, 16 }
 0x363   : > { %v2667_v53 = vcombine.low %v2642_v8, %v2650_v0  ;;  %v2675_v32 = vcombine.low %v2658_v14, %v2666_v26  ;;  %v6294_v54 = vcombine.high %v2259_v10, %v2266_v50  ;;  %v2700_v24 = vrot.slane %v6293_v44, %v7557_v37  ;;  %v811_v0 = vpop.permute.xlu1 %810 }
 0x364   : > { %1899 = vst.msk [vmem:[#allocation2 + $0x20] sm:$0xff] %vm1894_vm0, %v1836_v46  ;;  %1907 = vst.msk [vmem:[#allocation2 + $0x60] sm:$0xff] %vm1894_vm0, %v1844_v47  ;;  %v2708_v59 = vrot.slane %v2701_v49, %v7557_v37  ;;  %v3049_v60 = vpack.i.b16 %v3024_v22, %v7451_v16  ;;  %v1995_v27 = vshrl.u32 %v7496_v15, 16  ;;  %v3053_v62 = vpack.i.b16 %v3052_v6, %v3051_v48 }
 0x365   : > { %v2674_v17 = vrot.slane %v2667_v53, %v7562_v43  ;;  %v2682_v7 = vrot.slane %v2675_v32, %v7562_v43  ;;  %v2716_v1 = vrot.slane %v6294_v54, %v7557_v37  ;;  %v2717_v45 = vcombine.low %v2692_v41, %v2700_v24 }
 0x366   : > { %v3111_v11 = vcombine.high %v3049_v60, %v7552_v21  ;;  %v3097_v12 = vpack.i.b16 %v3030_v38, %v7468_v57  ;;  %v3100_v20 = vshrl.u32 %v3030_v38, 16  ;;  %v3118_v5 = vrot.slane %v3049_v60, %v7557_v37 }
 0x367   : > { %v2683_v4 = vcombine.low %v2674_v17, %v2682_v7  ;;  %v2684_v63 = vcombine.high %v2674_v17, %v2682_v7  ;;  %v2725_v31 = vcombine.low %v2708_v59, %v2716_v1  ;;  %v2724_v9 = vrot.slane %v2717_v45, %v7562_v43  ;;  %v3028_v17 = vpop.permute.xlu0 %3027 }
 0x368   : > { %v3177_v8 = vcombine.high %v3053_v62, %v7552_v21  ;;  %v890_v22 = vshrl.u32 %v7498_v18, 16  ;;  %v3125_v48 = vrot.slane %v3111_v11, %v7557_v37  ;;  %v3184_v61 = vrot.slane %v3053_v62, %v7557_v37 }
 0x369   : > { %v2732_v16 = vrot.slane %v2725_v31, %v7562_v43  ;;  %v7761_v28 = vpack.i.b16 %v3100_v20, %v3099_v36  ;;  %v2955_v10 = vshrl.u32 %v2683_v4, 16  ;;  %v2963_v50 = vshrl.u32 %v2684_v63, 16 }
 0x36a   : > { %v3191_v29 = vrot.slane %v3177_v8, %v7557_v37  ;;  %v3507_v30 = vcombine.high %v3097_v12, %v7552_v21  ;;  %v7766_v42 = vrot.slane %v3097_v12, %v7557_v37  ;;  %v3059_v34 = vshrl.u32 %v3032_v3, 16 }
 0x36b   : > { %v2733_v33 = vcombine.low %v2724_v9, %v2732_v16  ;;  %v2734_v19 = vcombine.high %v2724_v9, %v2732_v16  ;;  %v3573_v35 = vcombine.high %v7761_v28, %v7552_v21  ;;  %v7772_v57 = vrot.slane %v7761_v28, %v7557_v37 }
 0x36c   : > { %v3057_v36 = vpack.i.b16 %v3040_v23, %v3032_v3  ;;  %v3060_v38 = vshrl.u32 %v3040_v23, 16  ;;  %v7775_v47 = vrot.slane %v3507_v30, %v7557_v37  ;;  %v856_v54 = vpack.i.b16 %v811_v0, %v7462_v51 }
 0x36d   : > { %v2953_v14 = vpack.i.b16 %v2733_v33, %v2683_v4  ;;  %v2956_v26 = vshrl.u32 %v2733_v33, 16  ;;  %v2961_v25 = vpack.i.b16 %v2734_v19, %v2684_v63  ;;  %v2964_v46 = vshrl.u32 %v2734_v19, 16 }
 0x36e   : > { %v3061_v44 = vpack.i.b16 %v3060_v38, %v3059_v34  ;;  %v3126_v49 = vcombine.high %v3057_v36, %v7552_v21  ;;  %v3133_v53 = vrot.slane %v3057_v36, %v7557_v37  ;;  %v859_v3 = vshrl.u32 %v811_v0, 16  ;;  %v7805_v36 = vpop.permute.xlu0 %3035 }
 0x36f   : > { %v2957_v32 = vpack.i.b16 %v2956_v26, %v2955_v10  ;;  %v2965_v41 = vpack.i.b16 %v2964_v46, %v2963_v50  ;;  %3000 = vst.msk [vmem:[#allocation3 + $0x8] sm:$0xff] %vm1894_vm0, %v2953_v14  ;;  %3008 = vst.msk [vmem:[#allocation3 + $0x48] sm:$0xff] %vm1894_vm0, %v2961_v25  ;;  %v1034_v45 = vcombine.high %v856_v54, %v7552_v21 }
 0x370   : > { %v3140_v24 = vrot.slane %v3126_v49, %v7557_v37  ;;  %v3141_v59 = vcombine.low %v3118_v5, %v3133_v53  ;;  %v3142_v60 = vcombine.high %v3118_v5, %v3133_v53  ;;  %v3192_v6 = vcombine.high %v3061_v44, %v7552_v21 }
 0x371   : > { %3004 = vst.msk [vmem:[#allocation3 + $0x28] sm:$0xff] %vm1894_vm0, %v2957_v32  ;;  %3012 = vst.msk [vmem:[#allocation3 + $0x68] sm:$0xff] %vm1894_vm0, %v2965_v41  ;;  %v3199_v7 = vrot.slane %v3061_v44, %v7557_v37  ;;  %v860_v1 = vpack.i.b16 %v859_v3, %v858_v52  ;;  %v7791_v62 = vrot.slane %v856_v54, %v7557_v37 }
 0x372   : > { %v3149_v11 = vrot.slane %v3141_v59, %v7562_v43  ;;  %v3156_v12 = vrot.slane %v3142_v60, %v7562_v43  ;;  %v3157_v4 = vcombine.low %v3125_v48, %v3140_v24  ;;  %v3158_v63 = vcombine.high %v3125_v48, %v3140_v24  ;;  %v819_v48 = vpop.permute.xlu1 %818 }
 0x373   : > { %v3206_v31 = vrot.slane %v3192_v6, %v7557_v37  ;;  %v3207_v20 = vcombine.low %v3184_v61, %v3199_v7  ;;  %v3208_v9 = vcombine.high %v3184_v61, %v3199_v7  ;;  %v7797_v5 = vrot.slane %v1034_v45, %v7557_v37 }
 0x374   : > { %v3165_v51 = vrot.slane %v3157_v4, %v7562_v43  ;;  %v3172_v52 = vrot.slane %v3158_v63, %v7562_v43  ;;  %v3639_v8 = vcombine.low %v3149_v11, %v3156_v12  ;;  %v6303_v16 = vcombine.high %v3149_v11, %v3156_v12 }
 0x375   : > { %v3215_v23 = vrot.slane %v3207_v20, %v7562_v43  ;;  %v3222_v10 = vrot.slane %v3208_v9, %v7562_v43  ;;  %v3223_v50 = vcombine.low %v3191_v29, %v3206_v31  ;;  %v3224_v30 = vcombine.high %v3191_v29, %v3206_v31  ;;  %v1924_v20 = vpop.permute.xlu0 %1923 }
 0x376   : > { %v3646_v33 = vrot.slane %v3639_v8, %v7557_v37  ;;  %v3654_v61 = vrot.slane %v6303_v16, %v7557_v37  ;;  %v3655_v19 = vcombine.low %v3165_v51, %v3172_v52  ;;  %v6304_v34 = vcombine.high %v3165_v51, %v3172_v52  ;;  %v827_v11 = vpop.permute.xlu1 %826 }
 0x377   : > { %v3231_v38 = vrot.slane %v3223_v50, %v7562_v43  ;;  %v3238_v0 = vrot.slane %v3224_v30, %v7562_v43  ;;  %v3689_v14 = vcombine.low %v3215_v23, %v3222_v10  ;;  %v6305_v26 = vcombine.high %v3215_v23, %v3222_v10 }
 0x378   : > { %v3662_v25 = vrot.slane %v3655_v19, %v7557_v37  ;;  %v3670_v46 = vrot.slane %v6304_v34, %v7557_v37  ;;  %v3671_v29 = vcombine.low %v3646_v33, %v3654_v61  ;;  %v1100_v44 = vcombine.high %v860_v1, %v7552_v21 }
 0x379   : > { %v3696_v49 = vrot.slane %v3689_v14, %v7557_v37  ;;  %v3704_v53 = vrot.slane %v6305_v26, %v7557_v37  ;;  %v3705_v32 = vcombine.low %v3231_v38, %v3238_v0  ;;  %v6306_v41 = vcombine.high %v3231_v38, %v3238_v0 }
 0x37a   : > { %v3678_v54 = vrot.slane %v3671_v29, %v7562_v43  ;;  %v3679_v3 = vcombine.low %v3662_v25, %v3670_v46  ;;  %v7816_v24 = vrot.slane %v860_v1, %v7557_v37  ;;  %v7819_v59 = vrot.slane %v1100_v44, %v7557_v37 }
 0x37b   : > { %v3712_v60 = vrot.slane %v3705_v32, %v7557_v37  ;;  %v3720_v6 = vrot.slane %v6306_v41, %v7557_v37  ;;  %v3721_v7 = vcombine.low %v3696_v49, %v3704_v53  ;;  %v3081_v45 = vpack.i.b16 %v3028_v17, %v7471_v58 }
 0x37c   : > { %v3686_v12 = vrot.slane %v3679_v3, %v7562_v43  ;;  %v3084_v4 = vshrl.u32 %v3028_v17, 16  ;;  %v866_v63 = vshrl.u32 %v819_v48, 16  ;;  %v3091_v31 = vshrl.u32 %v7805_v36, 16 }
 0x37d   : > { %v3728_v1 = vrot.slane %v3721_v7, %v7562_v43  ;;  %v3729_v9 = vcombine.low %v3712_v60, %v3720_v6  ;;  %v3375_v51 = vcombine.high %v3081_v45, %v7552_v21  ;;  %v7829_v52 = vrot.slane %v3081_v45, %v7557_v37 }
 0x37e   : > { %v3687_v8 = vcombine.low %v3678_v54, %v3686_v12  ;;  %v3688_v16 = vcombine.high %v3678_v54, %v3686_v12  ;;  %v3085_v23 = vpack.i.b16 %v3084_v4, %v3083_v2  ;;  %v864_v10 = vpack.i.b16 %v827_v11, %v819_v48 }
 0x37f   : > { %v3736_v17 = vrot.slane %v3729_v9, %v7562_v43  ;;  %v7835_v50 = vrot.slane %v3375_v51, %v7557_v37  ;;  %v867_v30 = vshrl.u32 %v827_v11, 16  ;;  %v1977_v33 = vpack.i.b16 %v1924_v20, %v7480_v39 }
 0x380   : > { %v4043_v61 = vshrl.u32 %v3687_v8, 16  ;;  %v4051_v19 = vshrl.u32 %v3688_v16, 16  ;;  %v3441_v34 = vcombine.high %v3085_v23, %v7552_v21  ;;  %v7840_v38 = vrot.slane %v3085_v23, %v7557_v37 }
 0x381   : > { %v3737_v0 = vcombine.low %v3728_v1, %v3736_v17  ;;  %v3738_v14 = vcombine.high %v3728_v1, %v3736_v17  ;;  %v868_v58 = vpack.i.b16 %v867_v30, %v866_v63  ;;  %v1049_v2 = vcombine.high %v864_v10, %v7552_v21  ;;  %v813_v17 = vpop.permute.xlu1 %812 }
 0x382   : > { %v7844_v48 = vrot.slane %v3441_v34, %v7557_v37  ;;  %v1056_v26 = vrot.slane %v864_v10, %v7557_v37  ;;  %v1980_v25 = vshrl.u32 %v1924_v20, 16  ;;  %v2271_v46 = vcombine.high %v1977_v33, %v7552_v21 }
 0x383   : > { %v4041_v29 = vpack.i.b16 %v3737_v0, %v3687_v8  ;;  %v4044_v44 = vshrl.u32 %v3737_v0, 16  ;;  %v4049_v49 = vpack.i.b16 %v3738_v14, %v3688_v16  ;;  %v4052_v53 = vshrl.u32 %v3738_v14, 16 }
 0x384   : > { %v1063_v32 = vrot.slane %v1049_v2, %v7557_v37  ;;  %v1064_v41 = vcombine.low %v7791_v62, %v1056_v26  ;;  %v1065_v54 = vcombine.high %v7791_v62, %v1056_v26  ;;  %v1115_v3 = vcombine.high %v868_v58, %v7552_v21 }
 0x385   : > { %v4045_v60 = vpack.i.b16 %v4044_v44, %v4043_v61  ;;  %v4053_v6 = vpack.i.b16 %v4052_v53, %v4051_v19  ;;  %4103 = vst.msk [vmem:[#allocation4] sm:$0xff] %vm1894_vm0, %v4041_v29  ;;  %4111 = vst.msk [vmem:[#allocation4 + $0x40] sm:$0xff] %vm1894_vm0, %v4049_v49  ;;  %v1122_v7 = vrot.slane %v868_v58, %v7557_v37  ;;  %v1932_v19 = vpop.permute.xlu0 %1931 }
 0x386   : > { %v1981_v45 = vpack.i.b16 %v1980_v25, %v1979_v55  ;;  %v1072_v11 = vrot.slane %v1064_v41, %v7562_v43  ;;  %v1079_v12 = vrot.slane %v1065_v54, %v7562_v43  ;;  %v1080_v4 = vcombine.low %v7797_v5, %v1063_v32 }
 0x387   : > { %v1081_v62 = vcombine.high %v7797_v5, %v1063_v32  ;;  %4107 = vst.msk [vmem:[#allocation4 + $0x20] sm:$0xff] %vm1894_vm0, %v4045_v60  ;;  %4115 = vst.msk [vmem:[#allocation4 + $0x60] sm:$0xff] %vm1894_vm0, %v4053_v6  ;;  %v1129_v63 = vrot.slane %v1115_v3, %v7557_v37  ;;  %v1130_v20 = vcombine.low %v7816_v24, %v1122_v7 }
 0x388   : > { %v1131_v1 = vcombine.high %v7816_v24, %v1122_v7  ;;  %v7867_v39 = vrot.slane %v1977_v33, %v7557_v37  ;;  %v1088_v55 = vrot.slane %v1080_v4, %v7562_v43  ;;  %v1530_v51 = vcombine.low %v1072_v11, %v1079_v12 }
 0x389   : > { %v1095_v9 = vrot.slane %v1081_v62, %v7562_v43  ;;  %v6275_v8 = vcombine.high %v1072_v11, %v1079_v12  ;;  %v1138_v5 = vrot.slane %v1130_v20, %v7562_v43  ;;  %v1146_v23 = vcombine.low %v7819_v59, %v1129_v63  ;;  %v1926_v11 = vpop.permute.xlu1 %1925  ;;  %v1940_v20 = vpop.permute.xlu0 %1939 }
 0x38a   : > { %v1145_v16 = vrot.slane %v1131_v1, %v7562_v43  ;;  %v1147_v10 = vcombine.high %v7819_v59, %v1129_v63  ;;  %v1537_v24 = vrot.slane %v1530_v51, %v7557_v37  ;;  %v7882_v59 = vrot.slane %v2271_v46, %v7557_v37 }
 0x38b   : > { %v1545_v30 = vrot.slane %v6275_v8, %v7557_v37  ;;  %v1546_v33 = vcombine.low %v1088_v55, %v1095_v9  ;;  %v6276_v61 = vcombine.high %v1088_v55, %v1095_v9  ;;  %v1154_v34 = vrot.slane %v1146_v23, %v7562_v43 }
 0x38c   : > { %v1161_v0 = vrot.slane %v1147_v10, %v7562_v43  ;;  %v1580_v14 = vcombine.low %v1138_v5, %v1145_v16  ;;  %v6277_v58 = vcombine.high %v1138_v5, %v1145_v16  ;;  %v2337_v54 = vcombine.high %v1981_v45, %v7552_v21 }
 0x38d   : > { %v1553_v2 = vrot.slane %v1546_v33, %v7557_v37  ;;  %v1561_v26 = vrot.slane %v6276_v61, %v7557_v37  ;;  %v1562_v25 = vcombine.low %v1537_v24, %v1545_v30  ;;  %v7889_v3 = vrot.slane %v1981_v45, %v7557_v37 }
 0x38e   : > { %v1587_v29 = vrot.slane %v1580_v14, %v7557_v37  ;;  %v1595_v44 = vrot.slane %v6277_v58, %v7557_v37  ;;  %v1596_v49 = vcombine.low %v1154_v34, %v1161_v0  ;;  %v6278_v53 = vcombine.high %v1154_v34, %v1161_v0 }
 0x38f   : > { %v1569_v32 = vrot.slane %v1562_v25, %v7562_v43  ;;  %v1570_v41 = vcombine.low %v1553_v2, %v1561_v26  ;;  %v872_v7 = vpack.i.b16 %v813_v17, %v7482_v40  ;;  %v7896_v4 = vrot.slane %v2337_v54, %v7557_v37 }
 0x390   : > { %v1603_v60 = vrot.slane %v1596_v49, %v7557_v37  ;;  %v1611_v6 = vrot.slane %v6278_v53, %v7557_v37  ;;  %v1612_v46 = vcombine.low %v1587_v29, %v1595_v44  ;;  %v875_v62 = vshrl.u32 %v813_v17, 16  ;;  %v7924_v53 = vpop.permute.xlu1 %1933 }
 0x391   : > { %v1577_v12 = vrot.slane %v1570_v41, %v7562_v43  ;;  %v1987_v63 = vshrl.u32 %v1932_v19, 16  ;;  %v1166_v55 = vcombine.high %v872_v7, %v7552_v21  ;;  %v7901_v9 = vrot.slane %v872_v7, %v7557_v37  ;;  %v7937_v7 = vpop.permute.xlu0 %820 }
 0x392   : > { %v1619_v1 = vrot.slane %v1612_v46, %v7562_v43  ;;  %v1620_v45 = vcombine.low %v1603_v60, %v1611_v6  ;;  %v876_v5 = vpack.i.b16 %v875_v62, %v874_v56  ;;  %v1993_v16 = vpack.i.b16 %v1926_v11, %v7496_v15 }
 0x393   : > { %v1578_v51 = vcombine.low %v1569_v32, %v1577_v12  ;;  %v1579_v8 = vcombine.high %v1569_v32, %v1577_v12  ;;  %v7908_v10 = vrot.slane %v1166_v55, %v7557_v37  ;;  %v1996_v17 = vshrl.u32 %v1926_v11, 16 }
 0x394   : > { %v1627_v23 = vrot.slane %v1620_v45, %v7562_v43  ;;  %v1985_v24 = vpack.i.b16 %v1940_v20, %v1932_v19  ;;  %v1232_v61 = vcombine.high %v876_v5, %v7552_v21  ;;  %v7912_v34 = vrot.slane %v876_v5, %v7557_v37 }
 0x395   : > { %v1850_v30 = vshrl.u32 %v1578_v51, 16  ;;  %v1858_v33 = vshrl.u32 %v1579_v8, 16  ;;  %v1997_v40 = vpack.i.b16 %v1996_v17, %v1995_v27  ;;  %v2403_v56 = vcombine.high %v1993_v16, %v7552_v21 }
 0x396   : > { %v1628_v0 = vcombine.low %v1619_v1, %v1627_v23  ;;  %v1629_v14 = vcombine.high %v1619_v1, %v1627_v23  ;;  %v7918_v58 = vrot.slane %v1232_v61, %v7557_v37  ;;  %v7921_v2 = vrot.slane %v1993_v16, %v7557_v37 }
 0x397   : > { %v1988_v19 = vshrl.u32 %v1940_v20, 16  ;;  %v2286_v26 = vcombine.high %v1985_v24, %v7552_v21  ;;  %v7927_v15 = vrot.slane %v2403_v56, %v7557_v37  ;;  %v2469_v27 = vcombine.high %v1997_v40, %v7552_v21 }
 0x398   : > { %v1848_v25 = vpack.i.b16 %v1628_v0, %v1578_v51  ;;  %v1851_v29 = vshrl.u32 %v1628_v0, 16  ;;  %v1856_v44 = vpack.i.b16 %v1629_v14, %v1579_v8  ;;  %v1859_v49 = vshrl.u32 %v1629_v14, 16 }
 0x399   : > { %v7931_v32 = vrot.slane %v1997_v40, %v7557_v37  ;;  %v1989_v41 = vpack.i.b16 %v1988_v19, %v1987_v63  ;;  %v2293_v6 = vrot.slane %v1985_v24, %v7557_v37  ;;  %v2300_v46 = vrot.slane %v2286_v26, %v7557_v37 }
 0x39a   : > { %v1852_v54 = vpack.i.b16 %v1851_v29, %v1850_v30  ;;  %v1860_v60 = vpack.i.b16 %v1859_v49, %v1858_v33  ;;  %1896 = vst.msk [vmem:[#allocation2 + $0x8] sm:$0xff] %vm1894_vm0, %v1848_v25  ;;  %1904 = vst.msk [vmem:[#allocation2 + $0x48] sm:$0xff] %vm1894_vm0, %v1856_v44  ;;  %v7940_v11 = vrot.slane %v2469_v27, %v7557_v37  ;;  %v2003_v63 = vshrl.u32 %v7924_v53, 16  ;;  %v1942_v29 = vpop.permute.xlu1 %1941 }
 0x39b   : > { %v2352_v12 = vcombine.high %v1989_v41, %v7552_v21  ;;  %v2359_v62 = vrot.slane %v1989_v41, %v7557_v37  ;;  %v2301_v20 = vcombine.low %v7867_v39, %v2293_v6  ;;  %v2302_v1 = vcombine.high %v7867_v39, %v2293_v6 }
 0x39c   : > { %1900 = vst.msk [vmem:[#allocation2 + $0x28] sm:$0xff] %vm1894_vm0, %v1852_v54  ;;  %1908 = vst.msk [vmem:[#allocation2 + $0x68] sm:$0xff] %vm1894_vm0, %v1860_v60  ;;  %v2317_v45 = vcombine.low %v7882_v59, %v2300_v46  ;;  %v2318_v55 = vcombine.high %v7882_v59, %v2300_v46  ;;  %v882_v16 = vshrl.u32 %v7937_v7, 16 }
 0x39d   : > { %v2366_v51 = vrot.slane %v2352_v12, %v7557_v37  ;;  %v2367_v8 = vcombine.low %v7889_v3, %v2359_v62  ;;  %v2368_v5 = vcombine.high %v7889_v3, %v2359_v62  ;;  %v2309_v23 = vrot.slane %v2301_v20, %v7562_v43 }
 0x39e   : > { %v2316_v17 = vrot.slane %v2302_v1, %v7562_v43  ;;  %v2325_v24 = vrot.slane %v2317_v45, %v7562_v43  ;;  %v2332_v39 = vrot.slane %v2318_v55, %v7562_v43  ;;  %v2001_v20 = vpack.i.b16 %v1942_v29, %v7924_v53 }
 0x39f   : > { %v2375_v30 = vrot.slane %v2367_v8, %v7562_v43  ;;  %v2382_v59 = vrot.slane %v2368_v5, %v7562_v43  ;;  %v2383_v33 = vcombine.low %v7896_v4, %v2366_v51  ;;  %v2384_v61 = vcombine.high %v7896_v4, %v2366_v51  ;;  %v7969_v4 = vpop.permute.xlu0 %828 }
 0x3a0   : > { %v2735_v0 = vcombine.low %v2309_v23, %v2316_v17  ;;  %v6295_v3 = vcombine.high %v2309_v23, %v2316_v17  ;;  %v2751_v14 = vcombine.low %v2325_v24, %v2332_v39  ;;  %v6296_v40 = vcombine.high %v2325_v24, %v2332_v39 }
 0x3a1   : > { %v2391_v56 = vrot.slane %v2383_v33, %v7562_v43  ;;  %v2398_v19 = vrot.slane %v2384_v61, %v7562_v43  ;;  %v2785_v26 = vcombine.low %v2375_v30, %v2382_v59  ;;  %v6297_v25 = vcombine.high %v2375_v30, %v2382_v59 }
 0x3a2   : > { %v2742_v44 = vrot.slane %v2735_v0, %v7557_v37  ;;  %v2750_v49 = vrot.slane %v6295_v3, %v7557_v37  ;;  %v2758_v27 = vrot.slane %v2751_v14, %v7557_v37  ;;  %v2766_v41 = vrot.slane %v6296_v40, %v7557_v37 }
 0x3a3   : > { %v2792_v54 = vrot.slane %v2785_v26, %v7557_v37  ;;  %v2800_v60 = vrot.slane %v6297_v25, %v7557_v37  ;;  %v2801_v6 = vcombine.low %v2391_v56, %v2398_v19  ;;  %v6298_v46 = vcombine.high %v2391_v56, %v2398_v19 }
 0x3a4   : > { %v2767_v12 = vcombine.low %v2742_v44, %v2750_v49  ;;  %v2775_v62 = vcombine.low %v2758_v27, %v2766_v41  ;;  %v2004_v1 = vshrl.u32 %v1942_v29, 16  ;;  %v7978_v8 = vpack.i.b16 %v7969_v4, %v7937_v7 }
 0x3a5   : > { %v2808_v45 = vrot.slane %v2801_v6, %v7557_v37  ;;  %v2816_v55 = vrot.slane %v6298_v46, %v7557_v37  ;;  %v2817_v51 = vcombine.low %v2792_v54, %v2800_v60  ;;  %v2418_v24 = vcombine.high %v2001_v20, %v7552_v21 }
 0x3a6   : > { %v2774_v5 = vrot.slane %v2767_v12, %v7562_v43  ;;  %v2782_v23 = vrot.slane %v2775_v62, %v7562_v43  ;;  %v2005_v17 = vpack.i.b16 %v2004_v1, %v2003_v63  ;;  %v2425_v30 = vrot.slane %v2001_v20, %v7557_v37 }
 0x3a7   : > { %v2824_v39 = vrot.slane %v2817_v51, %v7562_v43  ;;  %v2825_v53 = vcombine.low %v2808_v45, %v2816_v55  ;;  %v883_v59 = vshrl.u32 %v7969_v4, 16  ;;  %v2432_v0 = vrot.slane %v2418_v24, %v7557_v37 }
 0x3a8   : > { %v2783_v33 = vcombine.low %v2774_v5, %v2782_v23  ;;  %v2784_v61 = vcombine.high %v2774_v5, %v2782_v23  ;;  %v2484_v3 = vcombine.high %v2005_v17, %v7552_v21  ;;  %v2433_v40 = vcombine.low %v7921_v2, %v2425_v30 }
 0x3a9   : > { %v2832_v14 = vrot.slane %v2825_v53, %v7562_v43  ;;  %v2434_v63 = vcombine.high %v7921_v2, %v2425_v30  ;;  %v2491_v56 = vrot.slane %v2005_v17, %v7557_v37  ;;  %v2449_v25 = vcombine.low %v7927_v15, %v2432_v0 }
 0x3aa   : > { %v2971_v19 = vshrl.u32 %v2783_v33, 16  ;;  %v2979_v26 = vshrl.u32 %v2784_v61, 16  ;;  %v2450_v29 = vcombine.high %v7927_v15, %v2432_v0  ;;  %v2441_v27 = vrot.slane %v2433_v40, %v7562_v43 }
 0x3ab   : > { %v2833_v44 = vcombine.low %v2824_v39, %v2832_v14  ;;  %v2834_v49 = vcombine.high %v2824_v39, %v2832_v14  ;;  %v2448_v41 = vrot.slane %v2434_v63, %v7562_v43  ;;  %v2457_v4 = vrot.slane %v2449_v25, %v7562_v43 }
 0x3ac   : > { %v2464_v54 = vrot.slane %v2450_v29, %v7562_v43  ;;  %v2498_v2 = vrot.slane %v2484_v3, %v7557_v37  ;;  %v2499_v60 = vcombine.low %v7931_v32, %v2491_v56  ;;  %v2500_v15 = vcombine.high %v7931_v32, %v2491_v56 }
 0x3ad   : > { %v2969_v6 = vpack.i.b16 %v2833_v44, %v2783_v33  ;;  %v2972_v46 = vshrl.u32 %v2833_v44, 16  ;;  %v2977_v12 = vpack.i.b16 %v2834_v49, %v2784_v61  ;;  %v2980_v62 = vshrl.u32 %v2834_v49, 16 }
 0x3ae   : > { %v2507_v20 = vrot.slane %v2499_v60, %v7562_v43  ;;  %v2515_v1 = vcombine.low %v7940_v11, %v2498_v2  ;;  %v2516_v45 = vcombine.high %v7940_v11, %v2498_v2  ;;  %v2835_v5 = vcombine.low %v2441_v27, %v2448_v41 }
 0x3af   : > { %v2973_v55 = vpack.i.b16 %v2972_v46, %v2971_v19  ;;  %v2981_v51 = vpack.i.b16 %v2980_v62, %v2979_v26  ;;  %3001 = vst.msk [vmem:[#allocation3 + $0x10] sm:$0xff] %vm1894_vm0, %v2969_v6  ;;  %3009 = vst.msk [vmem:[#allocation3 + $0x50] sm:$0xff] %vm1894_vm0, %v2977_v12  ;;  %v6299_v23 = vcombine.high %v2441_v27, %v2448_v41 }
 0x3b0   : > { %v2514_v17 = vrot.slane %v2500_v15, %v7562_v43  ;;  %v2523_v24 = vrot.slane %v2515_v1, %v7562_v43  ;;  %v2530_v32 = vrot.slane %v2516_v45, %v7562_v43  ;;  %v2851_v39 = vcombine.low %v2457_v4, %v2464_v54 }
 0x3b1   : > { %3005 = vst.msk [vmem:[#allocation3 + $0x30] sm:$0xff] %vm1894_vm0, %v2973_v55  ;;  %3013 = vst.msk [vmem:[#allocation3 + $0x70] sm:$0xff] %vm1894_vm0, %v2981_v51  ;;  %v2842_v11 = vrot.slane %v2835_v5, %v7557_v37  ;;  %v2850_v53 = vrot.slane %v6299_v23, %v7557_v37  ;;  %v6300_v30 = vcombine.high %v2457_v4, %v2464_v54 }
 0x3b2   : > { %v884_v33 = vpack.i.b16 %v883_v59, %v882_v16  ;;  %v2858_v61 = vrot.slane %v2851_v39, %v7557_v37  ;;  %v2885_v0 = vcombine.low %v2507_v20, %v2514_v17  ;;  %v6301_v3 = vcombine.high %v2507_v20, %v2514_v17 }
 0x3b3   : > { %v2901_v14 = vcombine.low %v2523_v24, %v2530_v32  ;;  %v2866_v40 = vrot.slane %v6300_v30, %v7557_v37  ;;  %v2867_v63 = vcombine.low %v2842_v11, %v2850_v53  ;;  %v6302_v56 = vcombine.high %v2523_v24, %v2530_v32 }
 0x3b4   : > { %v1181_v19 = vcombine.high %v7978_v8, %v7552_v21  ;;  %v2892_v26 = vrot.slane %v2885_v0, %v7557_v37  ;;  %v2900_v25 = vrot.slane %v6301_v3, %v7557_v37  ;;  %v1188_v7 = vrot.slane %v7978_v8, %v7557_v37 }
 0x3b5   : > { %v2908_v29 = vrot.slane %v2901_v14, %v7557_v37  ;;  %v2874_v16 = vrot.slane %v2867_v63, %v7562_v43  ;;  %v2875_v59 = vcombine.low %v2858_v61, %v2866_v40  ;;  %v2916_v44 = vrot.slane %v6302_v56, %v7557_v37  ;;  %v815_v14 = vpop.permute.xlu1 %814 }
 0x3b6   : > { %v1195_v49 = vrot.slane %v1181_v19, %v7557_v37  ;;  %v2917_v27 = vcombine.low %v2892_v26, %v2900_v25  ;;  %v1196_v41 = vcombine.low %v7901_v9, %v1188_v7  ;;  %v1197_v4 = vcombine.high %v7901_v9, %v1188_v7 }
 0x3b7   : > { %v1247_v54 = vcombine.high %v884_v33, %v7552_v21  ;;  %v2882_v2 = vrot.slane %v2875_v59, %v7562_v43  ;;  %v2925_v60 = vcombine.low %v2908_v29, %v2916_v44  ;;  %v1254_v15 = vrot.slane %v884_v33, %v7557_v37 }
 0x3b8   : > { %v1212_v6 = vcombine.low %v7908_v10, %v1195_v49  ;;  %v1213_v8 = vcombine.high %v7908_v10, %v1195_v49  ;;  %v2924_v46 = vrot.slane %v2917_v27, %v7562_v43  ;;  %v1204_v12 = vrot.slane %v1196_v41, %v7562_v43 }
 0x3b9   : > { %v1211_v62 = vrot.slane %v1197_v4, %v7562_v43  ;;  %v2883_v20 = vcombine.low %v2874_v16, %v2882_v2  ;;  %v2884_v1 = vcombine.high %v2874_v16, %v2882_v2  ;;  %v2932_v9 = vrot.slane %v2925_v60, %v7562_v43 }
 0x3ba   : > { %v1220_v45 = vrot.slane %v1212_v6, %v7562_v43  ;;  %v1227_v55 = vrot.slane %v1213_v8, %v7562_v43  ;;  %v1261_v51 = vrot.slane %v1247_v54, %v7557_v37  ;;  %v1262_v10 = vcombine.low %v7912_v34, %v1254_v15  ;;  %v3044_v6 = vpop.permute.xlu0 %3043 }
 0x3bb   : > { %v1263_v5 = vcombine.high %v7912_v34, %v1254_v15  ;;  %v2933_v23 = vcombine.low %v2924_v46, %v2932_v9  ;;  %v2934_v17 = vcombine.high %v2924_v46, %v2932_v9  ;;  %v2987_v24 = vshrl.u32 %v2883_v20, 16  ;;  %v8062_v15 = vpop.permute.xlu1 %822 }
 0x3bc   : > { %v2995_v32 = vshrl.u32 %v2884_v1, 16  ;;  %v1270_v39 = vrot.slane %v1262_v10, %v7562_v43  ;;  %v1278_v53 = vcombine.low %v7918_v58, %v1261_v51  ;;  %v1279_v30 = vcombine.high %v7918_v58, %v1261_v51 }
 0x3bd   : > { %v1277_v11 = vrot.slane %v1263_v5, %v7562_v43  ;;  %v2985_v33 = vpack.i.b16 %v2933_v23, %v2883_v20  ;;  %v2988_v61 = vshrl.u32 %v2933_v23, 16  ;;  %v2993_v0 = vpack.i.b16 %v2934_v17, %v2884_v1 }
 0x3be   : > { %v2996_v3 = vshrl.u32 %v2934_v17, 16  ;;  %v1286_v40 = vrot.slane %v1278_v53, %v7562_v43  ;;  %v1293_v34 = vrot.slane %v1279_v30, %v7562_v43  ;;  %v1630_v63 = vcombine.low %v1204_v12, %v1211_v62 }
 0x3bf   : > { %v6279_v56 = vcombine.high %v1204_v12, %v1211_v62  ;;  %v2989_v19 = vpack.i.b16 %v2988_v61, %v2987_v24  ;;  %3002 = vst.msk [vmem:[#allocation3 + $0x18] sm:$0xff] %vm1894_vm0, %v2985_v33  ;;  %3010 = vst.msk [vmem:[#allocation3 + $0x58] sm:$0xff] %vm1894_vm0, %v2993_v0  ;;  %v1646_v25 = vcombine.low %v1220_v45, %v1227_v55  ;;  %v891_v62 = vshrl.u32 %v815_v14, 16 }
 0x3c0   : > { %v2997_v26 = vpack.i.b16 %v2996_v3, %v2995_v32  ;;  %v6280_v29 = vcombine.high %v1220_v45, %v1227_v55  ;;  %v1637_v58 = vrot.slane %v1630_v63, %v7557_v37  ;;  %v1680_v16 = vcombine.low %v1270_v39, %v1277_v11 }
 0x3c1   : > { %v1645_v7 = vrot.slane %v6279_v56, %v7557_v37  ;;  %v6281_v59 = vcombine.high %v1270_v39, %v1277_v11  ;;  %3006 = vst.msk [vmem:[#allocation3 + $0x38] sm:$0xff] %vm1894_vm0, %v2989_v19  ;;  %v1653_v44 = vrot.slane %v1646_v25, %v7557_v37  ;;  %v1696_v27 = vcombine.low %v1286_v40, %v1293_v34 }
 0x3c2   : > { %3014 = vst.msk [vmem:[#allocation3 + $0x78] sm:$0xff] %vm1894_vm0, %v2997_v26  ;;  %v1661_v49 = vrot.slane %v6280_v29, %v7557_v37  ;;  %v6282_v41 = vcombine.high %v1286_v40, %v1293_v34  ;;  %v1687_v54 = vrot.slane %v1680_v16, %v7557_v37  ;;  %v888_v60 = vpack.i.b16 %v815_v14, %v7498_v18 }
 0x3c3   : > { %v1662_v4 = vcombine.low %v1637_v58, %v1645_v7  ;;  %v1695_v2 = vrot.slane %v6281_v59, %v7557_v37  ;;  %v1703_v46 = vrot.slane %v1696_v27, %v7557_v37  ;;  %v892_v10 = vpack.i.b16 %v891_v62, %v890_v22  ;;  %v831_v59 = vpop.permute.xlu1 %830 }
 0x3c4   : > { %v1670_v8 = vcombine.low %v1653_v44, %v1661_v49  ;;  %v1711_v12 = vrot.slane %v6282_v41, %v7557_v37  ;;  %v1298_v9 = vcombine.high %v888_v60, %v7552_v21  ;;  %v8067_v45 = vrot.slane %v888_v60, %v7557_v37 }
 0x3c5   : > { %v1669_v20 = vrot.slane %v1662_v4, %v7562_v43  ;;  %v1712_v1 = vcombine.low %v1687_v54, %v1695_v2  ;;  %v3089_v5 = vpack.i.b16 %v3044_v6, %v7805_v36  ;;  %v3092_v24 = vshrl.u32 %v3044_v6, 16 }
 0x3c6   : > { %v1677_v55 = vrot.slane %v1670_v8, %v7562_v43  ;;  %v1720_v51 = vcombine.low %v1703_v46, %v1711_v12  ;;  %v8075_v17 = vrot.slane %v1298_v9, %v7557_v37  ;;  %v898_v32 = vshrl.u32 %v8062_v15, 16 }
 0x3c7   : > { %v1719_v23 = vrot.slane %v1712_v1, %v7562_v43  ;;  %v1364_v30 = vcombine.high %v892_v10, %v7552_v21  ;;  %v8081_v33 = vrot.slane %v892_v10, %v7557_v37  ;;  %v3093_v18 = vpack.i.b16 %v3092_v24, %v3091_v31 }
 0x3c8   : > { %v1678_v39 = vcombine.low %v1669_v20, %v1677_v55  ;;  %v1679_v11 = vcombine.high %v1669_v20, %v1677_v55  ;;  %v1727_v53 = vrot.slane %v1720_v51, %v7562_v43  ;;  %v3390_v22 = vcombine.high %v3089_v5, %v7552_v21 }
 0x3c9   : > { %v3397_v61 = vrot.slane %v3089_v5, %v7557_v37  ;;  %v8088_v34 = vrot.slane %v1364_v30, %v7557_v37  ;;  %v3463_v27 = vrot.slane %v3093_v18, %v7557_v37  ;;  %v896_v8 = vpack.i.b16 %v831_v59, %v8062_v15 }
 0x3ca   : > { %v1728_v0 = vcombine.low %v1719_v23, %v1727_v53  ;;  %v1729_v3 = vcombine.high %v1719_v23, %v1727_v53  ;;  %v1866_v14 = vshrl.u32 %v1678_v39, 16  ;;  %v1874_v40 = vshrl.u32 %v1679_v11, 16 }
 0x3cb   : > { %v3404_v63 = vrot.slane %v3390_v22, %v7557_v37  ;;  %v3405_v56 = vcombine.low %v7829_v52, %v3397_v61  ;;  %v3406_v19 = vcombine.high %v7829_v52, %v3397_v61  ;;  %v3456_v52 = vcombine.high %v3093_v18, %v7552_v21 }
 0x3cc   : > { %v1864_v26 = vpack.i.b16 %v1728_v0, %v1678_v39  ;;  %v1867_v36 = vshrl.u32 %v1728_v0, 16  ;;  %v1872_v31 = vpack.i.b16 %v1729_v3, %v1679_v11  ;;  %v1875_v25 = vshrl.u32 %v1729_v3, 16 }
 0x3cd   : > { %v3413_v29 = vrot.slane %v3405_v56, %v7562_v43  ;;  %v3420_v58 = vrot.slane %v3406_v19, %v7562_v43  ;;  %v3421_v7 = vcombine.low %v7835_v50, %v3404_v63  ;;  %v3422_v16 = vcombine.high %v7835_v50, %v3404_v63 }
 0x3ce   : > { %v1868_v44 = vpack.i.b16 %v1867_v36, %v1866_v14  ;;  %v1876_v49 = vpack.i.b16 %v1875_v25, %v1874_v40  ;;  %1897 = vst.msk [vmem:[#allocation2 + $0x10] sm:$0xff] %vm1894_vm0, %v1864_v26  ;;  %1905 = vst.msk [vmem:[#allocation2 + $0x50] sm:$0xff] %vm1894_vm0, %v1872_v31  ;;  %v3470_v50 = vrot.slane %v3456_v52, %v7557_v37  ;;  %v899_v15 = vshrl.u32 %v831_v59, 16 }
 0x3cf   : > { %v3429_v41 = vrot.slane %v3421_v7, %v7562_v43  ;;  %v3436_v4 = vrot.slane %v3422_v16, %v7562_v43  ;;  %v3839_v54 = vcombine.low %v3413_v29, %v3420_v58  ;;  %v6311_v2 = vcombine.high %v3413_v29, %v3420_v58 }
 0x3d0   : > { %1901 = vst.msk [vmem:[#allocation2 + $0x30] sm:$0xff] %vm1894_vm0, %v1868_v44  ;;  %1909 = vst.msk [vmem:[#allocation2 + $0x70] sm:$0xff] %vm1894_vm0, %v1876_v49  ;;  %v3471_v60 = vcombine.low %v7840_v38, %v3463_v27  ;;  %v3472_v6 = vcombine.high %v7840_v38, %v3463_v27  ;;  %v3487_v55 = vcombine.low %v7844_v48, %v3470_v50 }
 0x3d1   : > { %v3846_v46 = vrot.slane %v3839_v54, %v7557_v37  ;;  %v3854_v12 = vrot.slane %v6311_v2, %v7557_v37  ;;  %v3855_v62 = vcombine.low %v3429_v41, %v3436_v4  ;;  %v6312_v20 = vcombine.high %v3429_v41, %v3436_v4 }
 0x3d2   : > { %v3479_v1 = vrot.slane %v3471_v60, %v7562_v43  ;;  %v3486_v9 = vrot.slane %v3472_v6, %v7562_v43  ;;  %v3488_v51 = vcombine.high %v7844_v48, %v3470_v50  ;;  %v3495_v23 = vrot.slane %v3487_v55, %v7562_v43 }
 0x3d3   : > { %v3862_v10 = vrot.slane %v3855_v62, %v7557_v37  ;;  %v3870_v38 = vrot.slane %v6312_v20, %v7557_v37  ;;  %v3871_v5 = vcombine.low %v3846_v46, %v3854_v12  ;;  %v900_v18 = vpack.i.b16 %v899_v15, %v898_v32 }
 0x3d4   : > { %v3502_v24 = vrot.slane %v3488_v51, %v7562_v43  ;;  %v3889_v39 = vcombine.low %v3479_v1, %v3486_v9  ;;  %v6313_v11 = vcombine.high %v3479_v1, %v3486_v9  ;;  %v1313_v22 = vcombine.high %v896_v8, %v7552_v21 }
 0x3d5   : > { %v3878_v53 = vrot.slane %v3871_v5, %v7562_v43  ;;  %v3879_v30 = vcombine.low %v3862_v10, %v3870_v38  ;;  %v1320_v40 = vrot.slane %v896_v8, %v7557_v37  ;;  %v1379_v56 = vcombine.high %v900_v18, %v7552_v21 }
 0x3d6   : > { %v3896_v48 = vrot.slane %v3889_v39, %v7557_v37  ;;  %v3904_v61 = vrot.slane %v6313_v11, %v7557_v37  ;;  %v3905_v0 = vcombine.low %v3495_v23, %v3502_v24  ;;  %v6314_v3 = vcombine.high %v3495_v23, %v3502_v24  ;;  %v3046_v39 = vpop.permute.xlu1 %3045 }
 0x3d7   : > { %v3886_v14 = vrot.slane %v3879_v30, %v7562_v43  ;;  %v1327_v63 = vrot.slane %v1313_v22, %v7557_v37  ;;  %v1386_v36 = vrot.slane %v900_v18, %v7557_v37  ;;  %v1328_v29 = vcombine.low %v8067_v45, %v1320_v40 }
 0x3d8   : > { %v3912_v19 = vrot.slane %v3905_v0, %v7557_v37  ;;  %v3920_v32 = vrot.slane %v6314_v3, %v7557_v37  ;;  %v3921_v26 = vcombine.low %v3896_v48, %v3904_v61  ;;  %v1329_v58 = vcombine.high %v8067_v45, %v1320_v40 }
 0x3d9   : > { %v3887_v31 = vcombine.low %v3878_v53, %v3886_v14  ;;  %v3888_v25 = vcombine.high %v3878_v53, %v3886_v14  ;;  %v1344_v59 = vcombine.low %v8075_v17, %v1327_v63  ;;  %v1345_v44 = vcombine.high %v8075_v17, %v1327_v63 }
 0x3da   : > { %v3928_v7 = vrot.slane %v3921_v26, %v7562_v43  ;;  %v3929_v16 = vcombine.low %v3912_v19, %v3920_v32  ;;  %v1336_v27 = vrot.slane %v1328_v29, %v7562_v43  ;;  %v1343_v41 = vrot.slane %v1329_v58, %v7562_v43 }
 0x3db   : > { %v4075_v49 = vshrl.u32 %v3887_v31, 16  ;;  %v4083_v52 = vshrl.u32 %v3888_v25, 16  ;;  %v1352_v54 = vrot.slane %v1344_v59, %v7562_v43  ;;  %v1359_v2 = vrot.slane %v1345_v44, %v7562_v43 }
 0x3dc   : > { %v3936_v4 = vrot.slane %v3929_v16, %v7562_v43  ;;  %v1393_v45 = vrot.slane %v1379_v56, %v7557_v37  ;;  %v1394_v50 = vcombine.low %v8081_v33, %v1386_v36  ;;  %v1395_v60 = vcombine.high %v8081_v33, %v1386_v36 }
 0x3dd   : > { %v1730_v6 = vcombine.low %v1336_v27, %v1343_v41  ;;  %v6283_v17 = vcombine.high %v1336_v27, %v1343_v41  ;;  %v1746_v23 = vcombine.low %v1352_v54, %v1359_v2  ;;  %v6284_v24 = vcombine.high %v1352_v54, %v1359_v2 }
 0x3de   : > { %v3937_v8 = vcombine.low %v3928_v7, %v3936_v4  ;;  %v3938_v46 = vcombine.high %v3928_v7, %v3936_v4  ;;  %v1410_v12 = vcombine.low %v8088_v34, %v1393_v45  ;;  %v1411_v62 = vcombine.high %v8088_v34, %v1393_v45 }
 0x3df   : > { %v1402_v20 = vrot.slane %v1394_v50, %v7562_v43  ;;  %v1409_v1 = vrot.slane %v1395_v60, %v7562_v43  ;;  %v1737_v9 = vrot.slane %v1730_v6, %v7557_v37  ;;  %v1745_v55 = vrot.slane %v6283_v17, %v7557_v37 }
 0x3e0   : > { %v4073_v51 = vpack.i.b16 %v3937_v8, %v3887_v31  ;;  %v4076_v10 = vshrl.u32 %v3937_v8, 16  ;;  %v4081_v38 = vpack.i.b16 %v3938_v46, %v3888_v25  ;;  %v4084_v33 = vshrl.u32 %v3938_v46, 16 }
 0x3e1   : > { %v1418_v5 = vrot.slane %v1410_v12, %v7562_v43  ;;  %v1425_v15 = vrot.slane %v1411_v62, %v7562_v43  ;;  %v1762_v53 = vcombine.low %v1737_v9, %v1745_v55  ;;  %v1780_v30 = vcombine.low %v1402_v20, %v1409_v1 }
 0x3e2   : > { %v4077_v34 = vpack.i.b16 %v4076_v10, %v4075_v49  ;;  %v4085_v11 = vpack.i.b16 %v4084_v33, %v4083_v52  ;;  %4105 = vst.msk [vmem:[#allocation4 + $0x10] sm:$0xff] %vm1894_vm0, %v4073_v51  ;;  %4113 = vst.msk [vmem:[#allocation4 + $0x50] sm:$0xff] %vm1894_vm0, %v4081_v38  ;;  %v1753_v18 = vrot.slane %v1746_v23, %v7557_v37  ;;  %v3107_v0 = vshrl.u32 %v7750_v13, 16 }
 0x3e3   : > { %v1761_v22 = vrot.slane %v6284_v24, %v7557_v37  ;;  %v6285_v48 = vcombine.high %v1402_v20, %v1409_v1  ;;  %v1796_v61 = vcombine.low %v1418_v5, %v1425_v15  ;;  %v1787_v3 = vrot.slane %v1780_v30, %v7557_v37 }
 0x3e4   : > { %4109 = vst.msk [vmem:[#allocation4 + $0x30] sm:$0xff] %vm1894_vm0, %v4077_v34  ;;  %4117 = vst.msk [vmem:[#allocation4 + $0x70] sm:$0xff] %vm1894_vm0, %v4085_v11  ;;  %v6286_v14 = vcombine.high %v1418_v5, %v1425_v15  ;;  %v3105_v40 = vpack.i.b16 %v3046_v39, %v7750_v13  ;;  %v3108_v32 = vshrl.u32 %v3046_v39, 16  ;;  %v3587_v26 = vrot.slane %v3573_v35, %v7557_v37 }
 0x3e5   : > { %v1770_v63 = vcombine.low %v1753_v18, %v1761_v22  ;;  %v1795_v56 = vrot.slane %v6285_v48, %v7557_v37  ;;  %v1803_v19 = vrot.slane %v1796_v61, %v7557_v37  ;;  %v1769_v29 = vrot.slane %v1762_v53, %v7562_v43 }
 0x3e6   : > { %v1811_v36 = vrot.slane %v6286_v14, %v7557_v37  ;;  %v3522_v31 = vcombine.high %v3105_v40, %v7552_v21  ;;  %v3529_v25 = vrot.slane %v3105_v40, %v7557_v37  ;;  %v3109_v7 = vpack.i.b16 %v3108_v32, %v3107_v0 }
 0x3e7   : > { %v1777_v13 = vrot.slane %v1770_v63, %v7562_v43  ;;  %v1812_v58 = vcombine.low %v1787_v3, %v1795_v56 }
 0x3e8   : > { %v1820_v16 = vcombine.low %v1803_v19, %v1811_v36  ;;  %v3536_v59 = vrot.slane %v3522_v31, %v7557_v37  ;;  %v3537_v44 = vcombine.low %v7766_v42, %v3529_v25  ;;  %v3538_v28 = vcombine.high %v7766_v42, %v3529_v25 }
 0x3e9   : > { %v1778_v35 = vcombine.low %v1769_v29, %v1777_v13  ;;  %v1779_v49 = vcombine.high %v1769_v29, %v1777_v13  ;;  %v1819_v52 = vrot.slane %v1812_v58, %v7562_v43  ;;  %v3588_v27 = vcombine.high %v3109_v7, %v7552_v21 }
 0x3ea   : > { %v1827_v41 = vrot.slane %v1820_v16, %v7562_v43  ;;  %v3545_v4 = vrot.slane %v3537_v44, %v7562_v43  ;;  %v3552_v54 = vrot.slane %v3538_v28, %v7562_v43  ;;  %v3553_v2 = vcombine.low %v7775_v47, %v3536_v59 }
 0x3eb   : > { %v1882_v45 = vshrl.u32 %v1778_v35, 16  ;;  %v1890_v50 = vshrl.u32 %v1779_v49, 16  ;;  %v3554_v60 = vcombine.high %v7775_v47, %v3536_v59  ;;  %v3595_v42 = vrot.slane %v3109_v7, %v7557_v37 }
 0x3ec   : > { %v1828_v6 = vcombine.low %v1819_v52, %v1827_v41  ;;  %v1829_v17 = vcombine.high %v1819_v52, %v1827_v41  ;;  %v3561_v8 = vrot.slane %v3553_v2, %v7562_v43  ;;  %v3602_v21 = vrot.slane %v3588_v27, %v7557_v37 }
 0x3ed   : > { %v3568_v46 = vrot.slane %v3554_v60, %v7562_v43  ;;  %v3603_v12 = vcombine.low %v7772_v57, %v3595_v42  ;;  %v3604_v62 = vcombine.high %v7772_v57, %v3595_v42  ;;  %v3939_v20 = vcombine.low %v3545_v4, %v3552_v54 }
 0x3ee   : > { %v1880_v1 = vpack.i.b16 %v1828_v6, %v1778_v35  ;;  %v1883_v9 = vshrl.u32 %v1828_v6, 16  ;;  %v1888_v55 = vpack.i.b16 %v1829_v17, %v1779_v49  ;;  %v1891_v51 = vshrl.u32 %v1829_v17, 16 }
 0x3ef   : > { %v3611_v47 = vrot.slane %v3603_v12, %v7562_v43  ;;  %v3618_v10 = vrot.slane %v3604_v62, %v7562_v43  ;;  %v3619_v38 = vcombine.low %v3587_v26, %v3602_v21  ;;  %v3620_v33 = vcombine.high %v3587_v26, %v3602_v21 }
 0x3f0   : > { %v1884_v5 = vpack.i.b16 %v1883_v9, %v1882_v45  ;;  %v1892_v15 = vpack.i.b16 %v1891_v51, %v1890_v50  ;;  %1898 = vst.msk [vmem:[#allocation2 + $0x18] sm:$0xff] %vm1894_vm0, %v1880_v1  ;;  %1906 = vst.msk [vmem:[#allocation2 + $0x58] sm:$0xff] %vm1894_vm0, %v1888_v55  ;;  %v3946_v23 = vrot.slane %v3939_v20, %v7557_v37 }
 0x3f1   : > { %v6315_v57 = vcombine.high %v3545_v4, %v3552_v54  ;;  %v3627_v24 = vrot.slane %v3619_v38, %v7562_v43  ;;  %v3634_v39 = vrot.slane %v3620_v33, %v7562_v43  ;;  %v3955_v34 = vcombine.low %v3561_v8, %v3568_v46 }
 0x3f2   : > { %v6316_v11 = vcombine.high %v3561_v8, %v3568_v46  ;;  %1902 = vst.msk [vmem:[#allocation2 + $0x38] sm:$0xff] %vm1894_vm0, %v1884_v5  ;;  %1910 = vst.msk [vmem:[#allocation2 + $0x78] sm:$0xff] %vm1894_vm0, %v1892_v15  ;;  %v3989_v30 = vcombine.low %v3611_v47, %v3618_v10  ;;  %v6317_v18 = vcombine.high %v3611_v47, %v3618_v10 }
 0x3f3   : > { %v3954_v53 = vrot.slane %v6315_v57, %v7557_v37  ;;  %v3962_v22 = vrot.slane %v3955_v34, %v7557_v37  ;;  %v4005_v61 = vcombine.low %v3627_v24, %v3634_v39  ;;  %v6318_v0 = vcombine.high %v3627_v24, %v3634_v39 }
 0x3f4   : > { %v3970_v48 = vrot.slane %v6316_v11, %v7557_v37  ;;  %v3996_v14 = vrot.slane %v3989_v30, %v7557_v37  ;;  %v4004_v40 = vrot.slane %v6317_v18, %v7557_v37 }
 0x3f5   : > { %v3971_v3 = vcombine.low %v3946_v23, %v3954_v53  ;;  %v4012_v56 = vrot.slane %v4005_v61, %v7557_v37  ;;  %v4020_v19 = vrot.slane %v6318_v0, %v7557_v37 }
 0x3f6   : > { %v3979_v63 = vcombine.low %v3962_v22, %v3970_v48  ;;  %v4021_v32 = vcombine.low %v3996_v14, %v4004_v40 }
 0x3f7   : > { %v3978_v26 = vrot.slane %v3971_v3, %v7562_v43  ;;  %v4029_v31 = vcombine.low %v4012_v56, %v4020_v19 }
 0x3f8   : > { %v3986_v36 = vrot.slane %v3979_v63, %v7562_v43  ;;  %v4028_v13 = vrot.slane %v4021_v32, %v7562_v43 }
 0x3f9   : > { %v4036_v58 = vrot.slane %v4029_v31, %v7562_v43 }
 0x3fa   : > { %v3987_v25 = vcombine.low %v3978_v26, %v3986_v36  ;;  %v3988_v29 = vcombine.high %v3978_v26, %v3986_v36 }
 0x3fb   : > { %v4037_v7 = vcombine.low %v4028_v13, %v4036_v58  ;;  %v4038_v16 = vcombine.high %v4028_v13, %v4036_v58 }
 0x3fc   : > { %v4091_v59 = vshrl.u32 %v3987_v25, 16  ;;  %v4099_v44 = vshrl.u32 %v3988_v29, 16 }
 0x3fd   : > { %v4089_v28 = vpack.i.b16 %v4037_v7, %v3987_v25  ;;  %v4092_v35 = vshrl.u32 %v4037_v7, 16  ;;  %v4097_v49 = vpack.i.b16 %v4038_v16, %v3988_v29  ;;  %v4100_v37 = vshrl.u32 %v4038_v16, 16 }
 0x3ff   : > { %v4093_v52 = vpack.i.b16 %v4092_v35, %v4091_v59  ;;  %v4101_v27 = vpack.i.b16 %v4100_v37, %v4099_v44  ;;  %4106 = vst.msk [vmem:[#allocation4 + $0x18] sm:$0xff] %vm1894_vm0, %v4089_v28  ;;  %4114 = vst.msk [vmem:[#allocation4 + $0x58] sm:$0xff] %vm1894_vm0, %v4097_v49 }
 0x401   : > { %4110 = vst.msk [vmem:[#allocation4 + $0x38] sm:$0xff] %vm1894_vm0, %v4093_v52  ;;  %4118 = vst.msk [vmem:[#allocation4 + $0x78] sm:$0xff] %vm1894_vm0, %v4101_v27 }
 0x402 PF: > { %s8212_s3 = sshll.u32 %s7045_s30, 5  ;;  %vm4132_vm1 = vcmask 7168   ;;  %v4182_v43 = vlaneseq  ;;  %s4194_s12 = sadd.s32 1, %s7045_s30  ;;  %v7082_v41 = vmov -1e+30   ;;  %v7083_v54 = vmov 0.0  }
 0x403   : > { %s4120_s22 = sshra.s32 %s8212_s3, 4  ;;  %4133 = vst.msk [vmem:[#allocation5] sm:$0xff] %vm4132_vm1, %v7082_v41  ;;  %4134 = vst.msk [vmem:[#allocation5 + $0x8] sm:$0xff] %vm4132_vm1, %v7082_v41  ;;  %v4187_v4 = vstv %s8212_s3  ;;  %vm4165_vm2 = vcmask 261120   ;;  %p6321_p1 = scmp.le.s32.totalorder %s4194_s12, 0 }
 0x404   : > { %4135 = vst.msk [vmem:[#allocation5 + $0x10] sm:$0xff] %vm4132_vm1, %v7082_v41  ;;  %4136 = vst.msk [vmem:[#allocation5 + $0x18] sm:$0xff] %vm4132_vm1, %v7082_v41  ;;  %s6320_s20 = sshll.u32 %s4120_s22, 3  ;;  %v8251_v2 = vshrl.u32 %v4182_v43, 7  ;;  %v8253_v45 = vand.u32 127, %v4182_v43  ;;  %s8301_s14 = smov (!%p6321_p1), 0  }
 0x405   : > { %4137 = vst.msk [vmem:[#allocation5 + $0x20] sm:$0xff] %vm4132_vm1, %v7082_v41  ;;  %4138 = vst.msk [vmem:[#allocation5 + $0x28] sm:$0xff] %vm4132_vm1, %v7082_v41  ;;  %s4123_s19 = scalar_lea.vmem [#allocation2], %s6320_s20 }
 0x406   : > { %4139 = vst.msk [vmem:[#allocation5 + $0x30] sm:$0xff] %vm4132_vm1, %v7082_v41  ;;  %4140 = vst.msk [vmem:[#allocation5 + $0x38] sm:$0xff] %vm4132_vm1, %v7082_v41  ;;  %v8271_v50 = vld [vmem:[%s4123_s19] sm:$0xff]  ;;  %v8273_v60 = vld [vmem:[%s4123_s19 + $0x8] sm:$0xff]  ;;  %v4184_v6 = vadd.s32 8, %v8251_v2  ;;  %v4185_v17 = vadd.s32 16, %v8251_v2  ;;  %v8281_v21 = vadd.s32 %v4187_v4, %v8251_v2 }
 0x407   : > { %4141 = vst.msk [vmem:[#allocation5 + $0x40] sm:$0xff] %vm4132_vm1, %v7082_v41  ;;  %4142 = vst.msk [vmem:[#allocation5 + $0x48] sm:$0xff] %vm4132_vm1, %v7082_v41  ;;  %v8275_v42 = vld [vmem:[%s4123_s19 + $0x20] sm:$0xff]  ;;  %v4186_v8 = vadd.s32 24, %v8251_v2  ;;  %v8283_v46 = vld [vmem:[%s4123_s19 + $0x28] sm:$0xff] }
 0x408   : > { %4143 = vst.msk [vmem:[#allocation5 + $0x50] sm:$0xff] %vm4132_vm1, %v7082_v41  ;;  %4144 = vst.msk [vmem:[#allocation5 + $0x58] sm:$0xff] %vm4132_vm1, %v7082_v41  ;;  %v8285_v12 = vld [vmem:[%s4123_s19 + $0x40] sm:$0xff]  ;;  %v8287_v62 = vld [vmem:[%s4123_s19 + $0x48] sm:$0xff]  ;;  %v8293_v9 = vadd.s32 %v4187_v4, %v4184_v6  ;;  %v8295_v55 = vadd.s32 %v4187_v4, %v4185_v17 }
 0x409   : > { %4145 = vst.msk [vmem:[#allocation5 + $0x60] sm:$0xff] %vm4132_vm1, %v7082_v41  ;;  %4146 = vst.msk [vmem:[#allocation5 + $0x68] sm:$0xff] %vm4132_vm1, %v7082_v41  ;;  %v8289_v20 = vld [vmem:[%s4123_s19 + $0x60] sm:$0xff]  ;;  %v8291_v1 = vld [vmem:[%s4123_s19 + $0x68] sm:$0xff]  ;;  %v8297_v51 = vadd.s32 %v4187_v4, %v4186_v8 }
 0x40a   : > { %4147 = vst.msk [vmem:[#allocation5 + $0x70] sm:$0xff] %vm4132_vm1, %v7082_v41  ;;  %4148 = vst.msk [vmem:[#allocation5 + $0x78] sm:$0xff] %vm4132_vm1, %v7082_v41 }
 0x40b   : > { %4149 = vst.msk [vmem:[#allocation6] sm:$0xff] %vm4132_vm1, %v7083_v54  ;;  %4150 = vst.msk [vmem:[#allocation6 + $0x8] sm:$0xff] %vm4132_vm1, %v7083_v54 }
 0x40c   : > { %4151 = vst.msk [vmem:[#allocation6 + $0x10] sm:$0xff] %vm4132_vm1, %v7083_v54  ;;  %4152 = vst.msk [vmem:[#allocation6 + $0x18] sm:$0xff] %vm4132_vm1, %v7083_v54 }
 0x40d   : > { %4153 = vst.msk [vmem:[#allocation6 + $0x20] sm:$0xff] %vm4132_vm1, %v7083_v54  ;;  %4154 = vst.msk [vmem:[#allocation6 + $0x28] sm:$0xff] %vm4132_vm1, %v7083_v54 }
 0x40e   : > { %4155 = vst.msk [vmem:[#allocation6 + $0x30] sm:$0xff] %vm4132_vm1, %v7083_v54  ;;  %4156 = vst.msk [vmem:[#allocation6 + $0x38] sm:$0xff] %vm4132_vm1, %v7083_v54 }
 0x40f   : > { %4157 = vst.msk [vmem:[#allocation6 + $0x40] sm:$0xff] %vm4132_vm1, %v7083_v54  ;;  %4158 = vst.msk [vmem:[#allocation6 + $0x48] sm:$0xff] %vm4132_vm1, %v7083_v54 }
 0x410   : > { %4159 = vst.msk [vmem:[#allocation6 + $0x50] sm:$0xff] %vm4132_vm1, %v7083_v54  ;;  %4160 = vst.msk [vmem:[#allocation6 + $0x58] sm:$0xff] %vm4132_vm1, %v7083_v54 }
 0x411   : > { %4161 = vst.msk [vmem:[#allocation6 + $0x60] sm:$0xff] %vm4132_vm1, %v7083_v54  ;;  %4162 = vst.msk [vmem:[#allocation6 + $0x68] sm:$0xff] %vm4132_vm1, %v7083_v54 }
 0x412   : > { %4163 = vst.msk [vmem:[#allocation6 + $0x70] sm:$0xff] %vm4132_vm1, %v7083_v54  ;;  %4164 = vst.msk [vmem:[#allocation6 + $0x78] sm:$0xff] %vm4132_vm1, %v7083_v54 }
 0x413   : > { %4166 = vst.msk [vmem:[#allocation7] sm:$0xff] %vm4165_vm2, %v7083_v54  ;;  %4167 = vst.msk [vmem:[#allocation7 + $0x8] sm:$0xff] %vm4165_vm2, %v7083_v54 }
 0x414   : > { %4168 = vst.msk [vmem:[#allocation7 + $0x10] sm:$0xff] %vm4165_vm2, %v7083_v54  ;;  %4169 = vst.msk [vmem:[#allocation7 + $0x18] sm:$0xff] %vm4165_vm2, %v7083_v54 }
 0x415   : > { %4170 = vst.msk [vmem:[#allocation7 + $0x20] sm:$0xff] %vm4165_vm2, %v7083_v54  ;;  %4171 = vst.msk [vmem:[#allocation7 + $0x28] sm:$0xff] %vm4165_vm2, %v7083_v54  ;;  %6174 = sbr.rel (%p6321_p1) target bundleno = 1834 (0x72a), region = 110 }
 0x416   : > { %4172 = vst.msk [vmem:[#allocation7 + $0x30] sm:$0xff] %vm4165_vm2, %v7083_v54  ;;  %4173 = vst.msk [vmem:[#allocation7 + $0x38] sm:$0xff] %vm4165_vm2, %v7083_v54 }
 0x417   : > { %4174 = vst.msk [vmem:[#allocation7 + $0x40] sm:$0xff] %vm4165_vm2, %v7083_v54  ;;  %4175 = vst.msk [vmem:[#allocation7 + $0x48] sm:$0xff] %vm4165_vm2, %v7083_v54 }
 0x418   : > { %4176 = vst.msk [vmem:[#allocation7 + $0x50] sm:$0xff] %vm4165_vm2, %v7083_v54  ;;  %4177 = vst.msk [vmem:[#allocation7 + $0x58] sm:$0xff] %vm4165_vm2, %v7083_v54 }
 0x419   : > { %4178 = vst.msk [vmem:[#allocation7 + $0x60] sm:$0xff] %vm4165_vm2, %v7083_v54  ;;  %4179 = vst.msk [vmem:[#allocation7 + $0x68] sm:$0xff] %vm4165_vm2, %v7083_v54 }
 0x41a   : > { %4180 = vst.msk [vmem:[#allocation7 + $0x70] sm:$0xff] %vm4165_vm2, %v7083_v54  ;;  %4181 = vst.msk [vmem:[#allocation7 + $0x78] sm:$0xff] %vm4165_vm2, %v7083_v54 }
 0x41b   : > { %9015 = vst [vmem:[#allocation24_spill] sm:$0xff] %v8291_v1  ;;  %9016 = vst [vmem:[#allocation25_spill] sm:$0xff] %v8293_v9 }
 0x41c LB: >> { %6447 = vmatprep.mubr.msk.bf16.mxu0 %vm4165_vm2, %v8271_v50  ;;  %6455 = vmatprep.mubr.msk.bf16.mxu1 %vm4165_vm2, %v8275_v42  ;;  %s6322_s16 = sshll.u32 %s7065_s14, 5  ;;  %s4198_s14 = sadd.s32 1, %s7065_s14   ;;  %s7065_s14 = sphi %s8301_s14, %s4198_s14  }
 0x41d   : >> { %s8313_s15 = sshra.s32 %s6322_s16, 4  ;;  %v4468_v48 = vstv %s6322_s16  ;;  %p4197_p3 = scmp.ge.s32.totalorder %s4198_s14, %s4194_s12 }
 0x41e   : >> { %s6323_s13 = sshll.u32 %s8313_s15, 3  ;;  %v8349_v61 = vadd.s32 %v4468_v48, %v8253_v45 }
 0x41f   : >> { %s4205_s27 = scalar_lea.vmem [#allocation3], %s6323_s13  ;;  %s8573_s21 = scalar_lea.vmem [#allocation4], %s6323_s13 }
 0x420   : >> { %v4206_v47 = vld [vmem:[%s4205_s27] sm:$0xff]  ;;  %v4207_v38 = vld [vmem:[%s4205_s27 + $0x8] sm:$0xff]  ;;  %vm4472_vm3 = vcmp.ge.s32.totalorder %v8295_v55, %v8349_v61  ;;  %vm4470_vm4 = vcmp.ge.s32.totalorder %v8281_v21, %v8349_v61  ;;  %vm4473_vm5 = vcmp.ge.s32.totalorder %v8297_v51, %v8349_v61 }
 0x421   : >> { %v4208_v10 = vld [vmem:[%s4205_s27 + $0x20] sm:$0xff]  ;;  %6527 = vmatprep.subr.msk.bf16.mxu0 %vm4165_vm2, %v4206_v47  ;;  %v4231_v33 = vsel %vm4165_vm2, %v4206_v47, 0  ;;  %v4209_v15 = vld [vmem:[%s4205_s27 + $0x28] sm:$0xff]  ;;  %v4234_v23 = vsel %vm4165_vm2, %v4207_v38, 0 }
 0x422   : >> { %v9017_v9 = vld [vmem:[#allocation25_spill] sm:$0xff]  ;;  %6529 = vmatprep.subr.msk.bf16.mxu1 %vm4165_vm2, %v4208_v10  ;;  %v4292_v5 = vsel %vm4165_vm2, %v4208_v10, 0  ;;  %6444 = vmatpush3.bf16.xpose.msra.mxu0 %v4231_v33  ;;  %v4295_v57 = vsel %vm4165_vm2, %v4209_v15, 0  ;;  %v4210_v24 = vld [vmem:[%s4205_s27 + $0x40] sm:$0xff] }
 0x423   : >> { %6452 = vmatpush3.bf16.xpose.msra.mxu1 %v4292_v5  ;;  %6528 = vmatprep.subr.msk.bf16.mxu0 %vm4165_vm2, %v4207_v38  ;;  %v4212_v39 = vld [vmem:[%s4205_s27 + $0x60] sm:$0xff]  ;;  %v4353_v34 = vsel %vm4165_vm2, %v4210_v24, 0  ;;  %v4211_v53 = vld [vmem:[%s4205_s27 + $0x48] sm:$0xff]  ;;  %vm4471_vm6 = vcmp.ge.s32.totalorder %v9017_v9, %v8349_v61 }
 0x424   : >> { %6530 = vmatprep.subr.msk.bf16.mxu1 %vm4165_vm2, %v4209_v15  ;;  %v4414_v11 = vsel %vm4165_vm2, %v4212_v39, 0  ;;  %v4213_v30 = vld [vmem:[%s4205_s27 + $0x68] sm:$0xff]  ;;  %v4356_v18 = vsel %vm4165_vm2, %v4211_v53, 0  ;;  %v9018_v1 = vld [vmem:[#allocation24_spill] sm:$0xff] }
 0x425   : >> { %v4417_v22 = vsel %vm4165_vm2, %v4213_v30, 0 }
 0x42a   : >> { %6446 = vmatpush3.bf16.xpose.msra.mxu0 %v4234_v23 }
 0x42b   : >> { %6454 = vmatpush3.bf16.xpose.msra.mxu1 %v4295_v57  ;;  %6531 = vmatprep.subr.msk.bf16.mxu0 %vm4165_vm2, %v4210_v24 }
 0x42c   : >> { %6533 = vmatprep.subr.msk.bf16.mxu1 %vm4165_vm2, %v4212_v39  ;;  %v7084_v39 = vmov 0  }
 0x42d   : >> { %6737 = vset.pattern.permute.xlu1 %v7084_v39  ;;  %6738 = vset.pattern.permute.xlu0 %v7084_v39 }
 0x431   : >> { %6448 = vmatmul.mubr.msk.bf16.vlgmr.msra.gmra.mrb[0].mxu0 %vm4165_vm2, %v8273_v60 }
 0x432   : >> { %6456 = vmatmul.mubr.msk.bf16.vlgmr.msra.gmra.mrb[0].mxu1 %vm4165_vm2, %v8283_v46  ;;  %6460 = vmatpush3.bf16.xpose.msra.mxu0 %v4353_v34 }
 0x433   : >> { %6468 = vmatpush3.bf16.xpose.msra.mxu1 %v4414_v11  ;;  %6532 = vmatprep.subr.msk.bf16.mxu0 %vm4165_vm2, %v4211_v53 }
 0x434   : >> { %6534 = vmatprep.subr.msk.bf16.mxu1 %vm4165_vm2, %v4213_v30  ;;  %6463 = vmatprep.mubr.msk.bf16.mxu0 %vm4165_vm2, %v8285_v12 }
 0x435   : >> { %6471 = vmatprep.mubr.msk.bf16.mxu1 %vm4165_vm2, %v8289_v20 }
 0x43a   : >> { %6462 = vmatpush3.bf16.xpose.msra.mxu0 %v4356_v18 }
 0x43b   : >> { %6470 = vmatpush3.bf16.xpose.msra.mxu1 %v4417_v22 }
 0x441   : >> { %6464 = vmatmul.mubr.msk.bf16.vlgmr.msra.gmra.mrb[4].mxu0 %vm4165_vm2, %v8287_v62 }
 0x442   : >> { %6472 = vmatmul.mubr.msk.bf16.vlgmr.msra.gmra.mrb[4].mxu1 %vm4165_vm2, %v9018_v1 }
 0x504   : >> { %v6449_v0 = vpop.f32.mrb[0].mxu0 }
 0x505   : >> { %v6457_v3 = vpop.f32.mrb[0].mxu1  ;;  %v8358_v14 = vsel %vm4472_vm3, %v6449_v0, -1e+30  ;;  %v4270_v40 = vpop.f32.mrb[1].mxu0  ;;  %v8471_v0 = vld [vmem:[#allocation5 + $0x10] sm:$0xff] }
 0x506   : >> { %v4331_v63 = vpop.f32.mrb[1].mxu1  ;;  %v8363_v56 = vsel %vm4472_vm3, %v6457_v3, -1e+30  ;;  %v6450_v32 = vpop.f32.mrb[2].mxu0  ;;  %v4520_v36 = vsel %vm4165_vm2, %v8358_v14, -inf  ;;  %v8473_v3 = vld [vmem:[#allocation5 + $0x20] sm:$0xff] }
 0x507   : >> { %v8368_v19 = vsel %vm4470_vm4, %v4331_v63, -1e+30  ;;  %v6458_v26 = vpop.f32.mrb[2].mxu1  ;;  %v4273_v31 = vpop.f32.mrb[3].mxu0  ;;  %4521 = vmax.xlane.f32.xlu0 %v4520_v36  ;;  %v8379_v13 = vsel %vm4473_vm5, %v6450_v32, -1e+30 }
 0x508   : >> { %v4526_v25 = vsel %vm4165_vm2, %v8368_v19, -inf  ;;  %v4334_v29 = vpop.f32.mrb[3].mxu1  ;;  %v4532_v58 = vsel %vm4165_vm2, %v8363_v56, -inf  ;;  %v8386_v7 = vsel %vm4470_vm4, %v4270_v40, -1e+30  ;;  %v4523_v16 = vsel %vm4165_vm2, %v8379_v13, -inf }
 0x509   : >> { %4527 = vmax.xlane.f32.xlu1 %v4526_v25  ;;  %v8393_v59 = vsel %vm4473_vm5, %v6458_v26, -1e+30  ;;  %v4514_v44 = vsel %vm4165_vm2, %v8386_v7, -inf  ;;  %v8402_v28 = vsel %vm4471_vm6, %v4273_v31, -1e+30  ;;  %v8481_v26 = vld [vmem:[#allocation5 + $0x30] sm:$0xff] }
 0x50a   : >> { %v4535_v35 = vsel %vm4165_vm2, %v8393_v59, -inf  ;;  %v8409_v49 = vsel %vm4471_vm6, %v4334_v29, -1e+30  ;;  %v4517_v37 = vsel %vm4165_vm2, %v8402_v28, -inf  ;;  %v8486_v36 = vld [vmem:[#allocation5 + $0x18] sm:$0xff] }
 0x50b   : >> { %4533 = vmax.xlane.f32.xlu0 %v4532_v58  ;;  %v4529_v52 = vsel %vm4165_vm2, %v8409_v49, -inf }
 0x50d   : >> { %4524 = vmax.xlane.f32.xlu1 %v4523_v16  ;;  %v4498_v16 = vld [vmem:[#allocation5] sm:$0xff] }
 0x50f   : >> { %4515 = vmax.xlane.f32.xlu0 %v4514_v44  ;;  %v8497_v44 = vld [vmem:[#allocation5 + $0x38] sm:$0xff] }
 0x511   : >> { %4536 = vmax.xlane.f32.xlu1 %v4535_v35 }
 0x513   : >> { %4518 = vmax.xlane.f32.xlu0 %v4517_v37 }
 0x514   : >> { %v6465_v27 = vpop.f32.mrb[4].mxu0 }
 0x515   : >> { %v6473_v43 = vpop.f32.mrb[4].mxu1  ;;  %4530 = vmax.xlane.f32.xlu1 %v4529_v52  ;;  %v8418_v41 = vsel %vm4472_vm3, %v6465_v27, -1e+30  ;;  %v4392_v4 = vpop.f32.mrb[5].mxu0 }
 0x516   : >> { %v4453_v54 = vpop.f32.mrb[5].mxu1  ;;  %v8423_v6 = vsel %vm4470_vm4, %v4392_v4, -1e+30  ;;  %v6466_v17 = vpop.f32.mrb[6].mxu0  ;;  %v4544_v8 = vsel %vm4165_vm2, %v8418_v41, -inf  ;;  %v4503_v4 = vld [vmem:[#allocation5 + $0x28] sm:$0xff] }
 0x517   : >> { %v8430_v47 = vsel %vm4473_vm5, %v6466_v17, -1e+30  ;;  %v4395_v10 = vpop.f32.mrb[7].mxu0  ;;  %v6474_v38 = vpop.f32.mrb[6].mxu1  ;;  %4545 = vmax.xlane.f32.xlu0 %v4544_v8  ;;  %v4538_v23 = vsel %vm4165_vm2, %v8423_v6, -inf }
 0x518   : >> { %v4547_v33 = vsel %vm4165_vm2, %v8430_v47, -inf  ;;  %v8437_v5 = vsel %vm4473_vm5, %v6474_v38, -1e+30  ;;  %v4456_v15 = vpop.f32.mrb[7].mxu1  ;;  %v8444_v57 = vsel %vm4470_vm4, %v4453_v54, -1e+30 }
 0x519   : >> { %4548 = vmax.xlane.f32.xlu1 %v4547_v33  ;;  %v4559_v24 = vsel %vm4165_vm2, %v8437_v5, -inf  ;;  %v8451_v34 = vsel %vm4471_vm6, %v4395_v10, -1e+30  ;;  %v4550_v11 = vsel %vm4165_vm2, %v8444_v57, -inf  ;;  %v8458_v53 = vsel %vm4472_vm3, %v6473_v43, -1e+30 }
 0x51a   : >> { %v4541_v30 = vsel %vm4165_vm2, %v8451_v34, -inf  ;;  %v8465_v18 = vsel %vm4471_vm6, %v4456_v15, -1e+30  ;;  %v4556_v22 = vsel %vm4165_vm2, %v8458_v53, -inf  ;;  %v4499_v43 = vld [vmem:[#allocation5 + $0x8] sm:$0xff]  ;;  %v8507_v38 = vld [vmem:[#allocation5 + $0x50] sm:$0xff] }
 0x51b   : >> { %4539 = vmax.xlane.f32.xlu0 %v4538_v23  ;;  %v4553_v48 = vsel %vm4165_vm2, %v8465_v18, -inf  ;;  %v8510_v33 = vld [vmem:[#allocation5 + $0x58] sm:$0xff] }
 0x51d   : >> { %4560 = vmax.xlane.f32.xlu1 %v4559_v24 }
 0x51f   : >> { %4551 = vmax.xlane.f32.xlu0 %v4550_v11  ;;  %v8519_v11 = vld [vmem:[#allocation5 + $0x40] sm:$0xff] }
 0x521   : >> { %4542 = vmax.xlane.f32.xlu1 %v4541_v30  ;;  %v8524_v30 = vld [vmem:[#allocation5 + $0x78] sm:$0xff] }
 0x523   : >> { %4557 = vmax.xlane.f32.xlu0 %v4556_v22 }
 0x525   : >> { %4554 = vmax.xlane.f32.xlu1 %v4553_v48 }
 0x594   : >> { %v4522_v40 = vpop.xlane.xlu0 %4521 }
 0x595   : >> { %v8476_v63 = vmax.f32 %v8471_v0, %v4522_v40 }
 0x596   : >> { %v4528_v61 = vpop.xlane.xlu1 %4527 }
 0x597   : >> { %v8479_v32 = vmax.f32 %v8473_v3, %v4528_v61  ;;  %5240 = vst.msk [vmem:[#allocation5 + $0x10] sm:$0xff] %vm4132_vm1, %v8476_v63  ;;  %4638 = vperm.xlu1 %6737, %v8476_v63  }
 0x598   : >> { %v4534_v31 = vpop.xlane.xlu0 %4533 }
 0x599   : >> { %5242 = vst.msk [vmem:[#allocation5 + $0x20] sm:$0xff] %vm4132_vm1, %v8479_v32  ;;  %v8491_v25 = vmax.f32 %v8481_v26, %v4534_v31 }
 0x59a   : >> { %v4525_v29 = vpop.xlane.xlu1 %4524 }
 0x59b   : >> { %v4565_v58 = vmax.f32 %v8486_v36, %v4525_v29  ;;  %5244 = vst.msk [vmem:[#allocation5 + $0x30] sm:$0xff] %vm4132_vm1, %v8491_v25  ;;  %4658 = vperm.xlu1 %6737, %v8491_v25   ;;  %v8535_v29 = vld [vmem:[#allocation5 + $0x60] sm:$0xff] }
 0x59c   : >> { %v4516_v35 = vpop.xlane.xlu0 %4515 }
 0x59d   : >> { %5241 = vst.msk [vmem:[#allocation5 + $0x18] sm:$0xff] %vm4132_vm1, %v4565_v58  ;;  %v4562_v37 = vmax.f32 %v4498_v16, %v4516_v35  ;;  %v8539_v35 = vld [vmem:[#allocation5 + $0x48] sm:$0xff] }
 0x59e   : >> { %v4537_v52 = vpop.xlane.xlu1 %4536 }
 0x59f   : >> { %v8501_v27 = vmax.f32 %v8497_v44, %v4537_v52  ;;  %5238 = vst.msk [vmem:[#allocation5] sm:$0xff] %vm4132_vm1, %v4562_v37  ;;  %4628 = vperm.xlu0 %6738, %v4562_v37   ;;  %4648 = vperm.xlu1 %6737, %v8479_v32   ;;  %v4578_v48 = vsub.f32 %v4498_v16, %v4562_v37 }
 0x5a0   : >> { %v4519_v54 = vpop.xlane.xlu0 %4518  ;;  %v4581_v37 = vsub.f32 %v8486_v36, %v4565_v58 }
 0x5a1   : >> { %5245 = vst.msk [vmem:[#allocation5 + $0x38] sm:$0xff] %vm4132_vm1, %v8501_v27  ;;  %v4563_v17 = vmax.f32 %v4499_v43, %v4519_v54  ;;  %v4594_v54 = vmul.f32 1.442695, %v4578_v48 }
 0x5a2   : >> { %v4531_v8 = vpop.xlane.xlu1 %4530  ;;  %v4600_v36 = vmul.f32 1.442695, %v4581_v37  ;;  %v4218_v37 = vld [vmem:[%s8573_s21 + $0x20] sm:$0xff] }
 0x5a3   : >> { %v4567_v10 = vmax.f32 %v4503_v4, %v4531_v8  ;;  %5239 = vst.msk [vmem:[#allocation5 + $0x8] sm:$0xff] %vm4132_vm1, %v4563_v17  ;;  %4643 = vperm.xlu1 %6737, %v4565_v58   ;;  %v4579_v52 = vsub.f32 %v4499_v43, %v4563_v17  ;;  %6739 = vpow2.f32 %v4594_v54  ;;  %v4580_v43 = vsub.f32 %v8471_v0, %v8476_v63 }
 0x5a4   : >> { %v4546_v15 = vpop.xlane.xlu0 %4545  ;;  %6741 = vpow2.f32 %v4600_v36  ;;  %v4582_v63 = vsub.f32 %v8473_v3, %v8479_v32  ;;  %6483 = vmatprep.subr.bf16.mxu1 %v4218_v37  ;;  %v4584_v32 = vsub.f32 %v8481_v26, %v8491_v25  ;;  %v4219_v36 = vld [vmem:[%s8573_s21 + $0x28] sm:$0xff] }
 0x5a5   : >> { %5243 = vst.msk [vmem:[#allocation5 + $0x28] sm:$0xff] %vm4132_vm1, %v4567_v10  ;;  %v8514_v23 = vmax.f32 %v8507_v38, %v4546_v15  ;;  %v4583_v58 = vsub.f32 %v4503_v4, %v4567_v10  ;;  %v4598_v0 = vmul.f32 1.442695, %v4580_v43  ;;  %6484 = vmatpush3.bf16.msra.mxu1 %v4218_v37 }
 0x5a6   : >> { %v4549_v24 = vpop.xlane.xlu1 %4548  ;;  %v4602_v3 = vmul.f32 1.442695, %v4582_v63  ;;  %6485 = vmatprep.subr.bf16.mxu1 %v4219_v36 }
 0x5a7   : >> { %v8517_v39 = vmax.f32 %v8510_v33, %v4549_v24  ;;  %5248 = vst.msk [vmem:[#allocation5 + $0x50] sm:$0xff] %vm4132_vm1, %v8514_v23  ;;  %4663 = vperm.xlu1 %6737, %v8501_v27   ;;  %v4604_v4 = vmul.f32 1.442695, %v4583_v58  ;;  %v4588_v43 = vsub.f32 %v8507_v38, %v8514_v23 }
 0x5a8   : >> { %v4540_v22 = vpop.xlane.xlu0 %4539 }
 0x5a9   : >> { %5249 = vst.msk [vmem:[#allocation5 + $0x58] sm:$0xff] %vm4132_vm1, %v8517_v39  ;;  %4683 = vperm.xlu0 %6738, %v8517_v39   ;;  %v8530_v40 = vmax.f32 %v8519_v11, %v4540_v22  ;;  %v8550_v22 = vld [vmem:[#allocation5 + $0x70] sm:$0xff]  ;;  %6486 = vmatpush3.bf16.msra.mxu1 %v4219_v36  ;;  %v4614_v38 = vmul.f32 1.442695, %v4588_v43 }
 0x5aa   : >> { %v4561_v61 = vpop.xlane.xlu1 %4560 }
 0x5ab   : >> { %v8533_v31 = vmax.f32 %v8524_v30, %v4561_v61  ;;  %5246 = vst.msk [vmem:[#allocation5 + $0x40] sm:$0xff] %vm4132_vm1, %v8530_v40  ;;  %4633 = vperm.xlu1 %6737, %v4563_v17   ;;  %v8554_v61 = vld [vmem:[#allocation5 + $0x68] sm:$0xff]  ;;  %v4596_v17 = vmul.f32 1.442695, %v4579_v52 }
 0x5ac   : >> { %v4552_v16 = vpop.xlane.xlu0 %4551  ;;  %v4217_v52 = vld [vmem:[%s8573_s21 + $0x8] sm:$0xff] }
 0x5ad   : >> { %5253 = vst.msk [vmem:[#allocation5 + $0x78] sm:$0xff] %vm4132_vm1, %v8533_v31  ;;  %v8547_v8 = vmax.f32 %v8535_v29, %v4552_v16  ;;  %6743 = vpow2.f32 %v4596_v17  ;;  %v8584_v54 = vpop.eup %6739 }
 0x5ae   : >> { %v4543_v15 = vpop.xlane.xlu1 %4542  ;;  %6745 = vpow2.f32 %v4604_v4  ;;  %v8592_v58 = vpop.eup %6741  ;;  %v8617_v4 = vld [vmem:[%s8573_s21 + $0x60] sm:$0xff] }
 0x5af   : >> { %v4571_v24 = vmax.f32 %v8539_v35, %v4543_v15  ;;  %5250 = vst.msk [vmem:[#allocation5 + $0x60] sm:$0xff] %vm4132_vm1, %v8547_v8  ;;  %4653 = vperm.xlu1 %6737, %v4567_v10   ;;  %v4216_v10 = vld [vmem:[%s8573_s21] sm:$0xff]  ;;  %6747 = vpow2.f32 %v4598_v0  ;;  %v4590_v0 = vsub.f32 %v8535_v29, %v8547_v8  ;;  %6499 = vmatprep.subr.bf16.mxu1 %v8617_v4 }
 0x5b0   : >> { %v4558_v1 = vpop.xlane.xlu0 %4557  ;;  %6475 = vmatprep.subr.bf16.mxu0 %v4216_v10 }
 0x5b1   : >> { %5247 = vst.msk [vmem:[#allocation5 + $0x48] sm:$0xff] %vm4132_vm1, %v4571_v24  ;;  %4673 = vperm.xlu0 %6738, %v4571_v24   ;;  %v8558_v48 = vmax.f32 %v8550_v22, %v4558_v1  ;;  %v4585_v1 = vsub.f32 %v8497_v44, %v8501_v27  ;;  %6476 = vmatpush3.bf16.msra.mxu0 %v4216_v10  ;;  %v4618_v63 = vmul.f32 1.442695, %v4590_v0 }
 0x5b2   : >> { %v4555_v16 = vpop.xlane.xlu1 %4554  ;;  %v4589_v27 = vsub.f32 %v8510_v33, %v8517_v39  ;;  %6477 = vmatprep.subr.bf16.mxu0 %v4217_v52  ;;  %v4587_v39 = vsub.f32 %v8539_v35, %v4571_v24  ;;  %v8600_v35 = vld [vmem:[%s8573_s21 + $0x40] sm:$0xff] }
 0x5b3   : >> { %v4575_v15 = vmax.f32 %v8554_v61, %v4555_v16  ;;  %v4592_v9 = vsub.f32 %v8550_v22, %v8558_v48  ;;  %5252 = vst.msk [vmem:[#allocation5 + $0x70] sm:$0xff] %vm4132_vm1, %v8558_v48  ;;  %4678 = vperm.xlu1 %6737, %v8514_v23   ;;  %v4608_v44 = vmul.f32 1.442695, %v4585_v1  ;;  %v4606_v16 = vmul.f32 1.442695, %v4584_v32 }
 0x5b4   : >> { %v4616_v33 = vmul.f32 1.442695, %v4589_v27  ;;  %v4612_v26 = vmul.f32 1.442695, %v4587_v39  ;;  %v4586_v23 = vsub.f32 %v8519_v11, %v8530_v40 }
 0x5b5   : >> { %5251 = vst.msk [vmem:[#allocation5 + $0x68] sm:$0xff] %vm4132_vm1, %v4575_v15  ;;  %4693 = vperm.xlu0 %6738, %v4575_v15   ;;  %6478 = vmatpush3.bf16.msra.mxu0 %v4217_v52  ;;  %6749 = vpow2.f32 %v4608_v44  ;;  %v4591_v25 = vsub.f32 %v8554_v61, %v4575_v15 }
 0x5b6   : >> { %6751 = vpow2.f32 %v4602_v3  ;;  %6491 = vmatprep.subr.bf16.mxu0 %v8600_v35  ;;  %v4610_v10 = vmul.f32 1.442695, %v4586_v23 }
 0x5b7   : >> { %4668 = vperm.xlu1 %6737, %v8530_v40   ;;  %6753 = vpow2.f32 %v4616_v33  ;;  %v8602_v24 = vpop.eup %6743  ;;  %v4620_v1 = vmul.f32 1.442695, %v4591_v25 }
 0x5b8   : >> { %v8605_v17 = vpop.eup %6745  ;;  %6755 = vpow2.f32 %v4606_v16 }
 0x5b9   : >> { %4703 = vperm.xlu0 %6738, %v8533_v31   ;;  %6757 = vpow2.f32 %v4612_v26  ;;  %v8611_v61 = vpop.eup %6747 }
 0x5ba   : >> { %6759 = vpow2.f32 %v4614_v38 }
 0x5bb   : >> { %4688 = vperm.xlu1 %6737, %v8547_v8   ;;  %6761 = vpow2.f32 %v4620_v1 }
 0x5bc   : >> { %6763 = vpow2.f32 %v4610_v10 }
 0x5bd   : >> { %4884 = vperm.xlu0 %6738, %v8584_v54   ;;  %6765 = vpow2.f32 %v4618_v63 }
 0x5bf   : >> { %4698 = vperm.xlu1 %6737, %v8558_v48   ;;  %v8613_v15 = vpop.eup %6749 }
 0x5c0   : >> { %v8623_v11 = vpop.eup %6751 }
 0x5c1   : >> { %4899 = vperm.xlu0 %6738, %v8592_v58   ;;  %v8625_v40 = vpop.eup %6753 }
 0x5c2   : >> { %v8629_v44 = vpop.eup %6755 }
 0x5c3   : >> { %4889 = vperm.xlu1 %6737, %v8602_v24   ;;  %v8631_v27 = vpop.eup %6757 }
 0x5c4   : >> { %v8635_v29 = vpop.eup %6759 }
 0x5c5   : >> { %4909 = vperm.xlu0 %6738, %v8605_v17   ;;  %v8637_v8 = vpop.eup %6761 }
 0x5c6   : >> { %v8641_v52 = vpop.eup %6763 }
 0x5c7   : >> { %4894 = vperm.xlu1 %6737, %v8611_v61   ;;  %v8644_v37 = vpop.eup %6765 }
 0x5c9   : >> { %4919 = vperm.xlu0 %6738, %v8613_v15  }
 0x5cb   : >> { %4904 = vperm.xlu1 %6737, %v8623_v11  }
 0x5cd   : >> { %4939 = vperm.xlu0 %6738, %v8625_v40  }
 0x5cf   : >> { %4914 = vperm.xlu1 %6737, %v8629_v44  }
 0x5d1   : >> { %4929 = vperm.xlu0 %6738, %v8631_v27  }
 0x5d3   : >> { %4934 = vperm.xlu1 %6737, %v8635_v29  }
 0x5d5   : >> { %4949 = vperm.xlu0 %6738, %v8637_v8  }
 0x5d7   : >> { %4924 = vperm.xlu1 %6737, %v8641_v52  }
 0x5db   : >> { %4944 = vperm.xlu1 %6737, %v8644_v37  }
 0x616   : >> { %v4639_v3 = vpop.permute.xlu1 %4638 }
 0x617   : >> { %v4708_v32 = vsub.f32 %v8358_v14, %v4639_v3 }
 0x619   : >> { %v4726_v33 = vmul.f32 1.442695, %v4708_v32 }
 0x61a   : >> { %v4659_v39 = vpop.permute.xlu1 %4658 }
 0x61b   : >> { %6767 = vpow2.f32 %v4726_v33  ;;  %v4712_v36 = vsub.f32 %v8363_v56, %v4659_v39 }
 0x61d   : >> { %v4734_v16 = vmul.f32 1.442695, %v4712_v36 }
 0x61e   : >> { %v4629_v43 = vpop.permute.xlu0 %4628  ;;  %v4649_v26 = vpop.permute.xlu1 %4648 }
 0x61f   : >> { %6769 = vpow2.f32 %v4734_v16  ;;  %v4706_v25 = vsub.f32 %v8386_v7, %v4629_v43  ;;  %v4710_v38 = vsub.f32 %v8368_v19, %v4649_v26 }
 0x621   : >> { %v4722_v23 = vmul.f32 1.442695, %v4706_v25  ;;  %v4730_v1 = vmul.f32 1.442695, %v4710_v38 }
 0x622   : >> { %v4644_v10 = vpop.permute.xlu1 %4643 }
 0x623   : >> { %6771 = vpow2.f32 %v4722_v23  ;;  %v4709_v0 = vsub.f32 %v8379_v13, %v4644_v10 }
 0x624   : >> { %6773 = vpow2.f32 %v4730_v1 }
 0x625   : >> { %v8652_v14 = vpop.eup %6767  ;;  %v4728_v63 = vmul.f32 1.442695, %v4709_v0 }
 0x626   : >> { %v4664_v3 = vpop.permute.xlu1 %4663  ;;  %v4792_v56 = vsel %vm4165_vm2, %v8652_v14, 0.0 }
 0x627   : >> { %6775 = vpow2.f32 %v4728_v63  ;;  %v4713_v32 = vsub.f32 %v8393_v59, %v4664_v3  ;;  %4793 = vadd.xlane.f32.xlu0 %v4792_v56 }
 0x628   : >> { %v4684_v33 = vpop.permute.xlu0 %4683 }
 0x629   : >> { %v8657_v7 = vpop.eup %6769  ;;  %v4736_v19 = vmul.f32 1.442695, %v4713_v32  ;;  %v4717_v43 = vsub.f32 %v8430_v47, %v4684_v33 }
 0x62a   : >> { %v4634_v39 = vpop.permute.xlu1 %4633  ;;  %v4804_v13 = vsel %vm4165_vm2, %v8657_v7, 0.0 }
 0x62b   : >> { %6777 = vpow2.f32 %v4736_v19  ;;  %v4707_v36 = vsub.f32 %v8402_v28, %v4634_v39  ;;  %4805 = vadd.xlane.f32.xlu0 %v4804_v13  ;;  %v4744_v63 = vmul.f32 1.442695, %v4717_v43 }
 0x62d   : >> { %v6772_v16 = vpop.eup %6771  ;;  %v4724_v26 = vmul.f32 1.442695, %v4707_v36 }
 0x62e   : >> { %v6774_v25 = vpop.eup %6773  ;;  %v4654_v38 = vpop.permute.xlu1 %4653  ;;  %v4786_v59 = vsel %vm4165_vm2, %v6772_v16, 0.0 }
 0x62f   : >> { %6779 = vpow2.f32 %v4724_v26  ;;  %v4711_v23 = vsub.f32 %v8409_v49, %v4654_v38  ;;  %4787 = vadd.xlane.f32.xlu1 %v4786_v59  ;;  %v4798_v1 = vsel %vm4165_vm2, %v6774_v25, 0.0 }
 0x630   : >> { %v4674_v10 = vpop.permute.xlu0 %4673  ;;  %4799 = vadd.xlane.f32.xlu0 %v4798_v1 }
 0x631   : >> { %v6776_v0 = vpop.eup %6775  ;;  %v4732_v28 = vmul.f32 1.442695, %v4711_v23  ;;  %v4715_v3 = vsub.f32 %v8451_v34, %v4674_v10 }
 0x632   : >> { %v4679_v56 = vpop.permute.xlu1 %4678  ;;  %v4795_v47 = vsel %vm4165_vm2, %v6776_v0, 0.0 }
 0x633   : >> { %6781 = vpow2.f32 %v4732_v28  ;;  %v4716_v32 = vsub.f32 %v8418_v41, %v4679_v56  ;;  %4796 = vadd.xlane.f32.xlu1 %v4795_v47  ;;  %v4740_v49 = vmul.f32 1.442695, %v4715_v3  ;;  %v4221_v3 = vld [vmem:[%s8573_s21 + $0x48] sm:$0xff] }
 0x634   : >> { %v4694_v19 = vpop.permute.xlu0 %4693  ;;  %6783 = vpow2.f32 %v4744_v63 }
 0x635   : >> { %v6778_v33 = vpop.eup %6777  ;;  %v4742_v39 = vmul.f32 1.442695, %v4716_v32  ;;  %v4719_v13 = vsub.f32 %v8465_v18, %v4694_v19 }
 0x636   : >> { %v4669_v36 = vpop.permute.xlu1 %4668  ;;  %v4807_v43 = vsel %vm4165_vm2, %v6778_v33, 0.0 }
 0x637   : >> { %6785 = vpow2.f32 %v4742_v39  ;;  %v4714_v34 = vsub.f32 %v8423_v6, %v4669_v36  ;;  %4808 = vadd.xlane.f32.xlu1 %v4807_v43  ;;  %v4748_v23 = vmul.f32 1.442695, %v4719_v13  ;;  %v4979_v6 = vpack.c.bf16 %v6776_v0, %v8652_v14  ;;  %v4223_v39 = vld [vmem:[%s8573_s21 + $0x68] sm:$0xff] }
 0x638   : >> { %v4704_v26 = vpop.permute.xlu0 %4703  ;;  %6787 = vpow2.f32 %v4740_v49  ;;  %v4981_v0 = vpack.c.bf16 %v6778_v33, %v8657_v7 }
 0x639   : >> { %v4721_v38 = vsub.f32 %v8437_v5, %v4704_v26  ;;  %v6780_v41 = vpop.eup %6779  ;;  %v4738_v59 = vmul.f32 1.442695, %v4714_v34 }
 0x63a   : >> { %v4689_v10 = vpop.permute.xlu1 %4688  ;;  %v4789_v63 = vsel %vm4165_vm2, %v6780_v41, 0.0  ;;  %v4978_v18 = vpack.c.bf16 %v6780_v41, %v6772_v16 }
 0x63b   : >> { %v4752_v1 = vmul.f32 1.442695, %v4721_v38  ;;  %6789 = vpow2.f32 %v4738_v59  ;;  %v4718_v28 = vsub.f32 %v8444_v57, %v4689_v10  ;;  %4790 = vadd.xlane.f32.xlu0 %v4789_v63  ;;  %v4622_v10 = vmul.f32 1.442695, %v4592_v9 }
 0x63c   : >> { %6479 = vmatprep.mubr.msk.bf16.mxu0 %vm4165_vm2, %v4978_v18  ;;  %v8711_v9 = vpop.permute.xlu0 %4884 }
 0x63d   : >> { %6791 = vpow2.f32 %v4752_v1  ;;  %v6782_v5 = vpop.eup %6781  ;;  %v4746_v56 = vmul.f32 1.442695, %v4718_v28  ;;  %6480 = vmatmul.mubr.msk.bf16.vlgmr.msra.gmra.mrb[8].mxu0 %vm4165_vm2, %v4979_v6  ;;  %v9019_v28 = vsub.f32 %v8524_v30, %v8533_v31 }
 0x63e   : >> { %6793 = vpow2.f32 %v4748_v23  ;;  %v4699_v47 = vpop.permute.xlu1 %4698  ;;  %v4801_v32 = vsel %vm4165_vm2, %v6782_v5, 0.0  ;;  %v4980_v16 = vpack.c.bf16 %v6782_v5, %v6774_v25  ;;  %6492 = vmatpush3.bf16.msra.mxu0 %v8600_v35  ;;  %v6784_v57 = vpop.eup %6783 }
 0x63f   : >> { %6795 = vpow2.f32 %v4746_v56  ;;  %v4720_v14 = vsub.f32 %v8458_v53, %v4699_v47  ;;  %4802 = vadd.xlane.f32.xlu1 %v4801_v32  ;;  %6493 = vmatprep.subr.bf16.mxu0 %v4221_v3  ;;  %v4819_v13 = vsel %vm4165_vm2, %v6784_v57, 0.0  ;;  %v4624_v6 = vmul.f32 1.442695, %v9019_v28 }
 0x640   : >> { %6487 = vmatprep.mubr.msk.bf16.mxu1 %vm4165_vm2, %v4980_v16  ;;  %v8713_v22 = vpop.permute.xlu0 %4899 }
 0x641   : >> { %v6786_v19 = vpop.eup %6785  ;;  %v4750_v49 = vmul.f32 1.442695, %v4720_v14  ;;  %6488 = vmatmul.mubr.msk.bf16.vlgmr.msra.gmra.mrb[8].mxu1 %vm4165_vm2, %v4981_v0 }
 0x642   : >> { %v4816_v25 = vsel %vm4165_vm2, %v6786_v19, 0.0  ;;  %6494 = vmatpush3.bf16.msra.mxu0 %v4221_v3  ;;  %6500 = vmatpush3.bf16.msra.mxu1 %v8617_v4  ;;  %v6788_v35 = vpop.eup %6787  ;;  %v4983_v43 = vpack.c.bf16 %v6784_v57, %v6786_v19  ;;  %v8715_v48 = vpop.permute.xlu1 %4889  ;;  %v4756_v19 = vld [vmem:[#allocation6 + $0x10] sm:$0xff] }
 0x643   : >> { %6797 = vpow2.f32 %v4750_v49  ;;  %4820 = vadd.xlane.f32.xlu1 %v4819_v13  ;;  %4817 = vadd.xlane.f32.xlu0 %v4816_v25  ;;  %v4813_v38 = vsel %vm4165_vm2, %v6788_v35, 0.0  ;;  %v4760_v25 = vld [vmem:[#allocation6 + $0x30] sm:$0xff] }
 0x644   : >> { %6501 = vmatprep.subr.bf16.mxu1 %v4223_v39  ;;  %6799 = vpow2.f32 %v4622_v10  ;;  %v8717_v56 = vpop.permute.xlu0 %4909  ;;  %v4761_v10 = vld [vmem:[#allocation6 + $0x38] sm:$0xff] }
 0x645   : >> { %v6790_v53 = vpop.eup %6789  ;;  %6801 = vpow2.f32 %v4624_v6 }
 0x646   : >> { %v4982_v33 = vpack.c.bf16 %v6788_v35, %v6790_v53  ;;  %6502 = vmatpush3.bf16.msra.mxu1 %v4223_v39  ;;  %v4810_v63 = vsel %vm4165_vm2, %v6790_v53, 0.0  ;;  %v8719_v47 = vpop.permute.xlu1 %4894  ;;  %v4772_v39 = vmul.f32 %v8611_v61, %v4756_v19  ;;  %v4776_v53 = vmul.f32 %v8629_v44, %v4760_v25 }
 0x647   : >> { %v6792_v7 = vpop.eup %6791 }
 0x648   : >> { %v4831_v36 = vsel %vm4165_vm2, %v6792_v7, 0.0  ;;  %v6794_v34 = vpop.eup %6793  ;;  %6495 = vmatprep.mubr.msk.bf16.mxu0 %vm4165_vm2, %v4982_v33  ;;  %v8721_v30 = vpop.permute.xlu0 %4919 }
 0x649   : >> { %4832 = vadd.xlane.f32.xlu1 %v4831_v36  ;;  %v6796_v26 = vpop.eup %6795  ;;  %6496 = vmatmul.mubr.msk.bf16.vlgmr.msra.gmra.mrb[12].mxu0 %vm4165_vm2, %v4983_v43  ;;  %v4825_v1 = vsel %vm4165_vm2, %v6794_v34, 0.0  ;;  %v4754_v36 = vld [vmem:[#allocation6] sm:$0xff] }
 0x64a   : >> { %v4984_v4 = vpack.c.bf16 %v6794_v34, %v6796_v26  ;;  %v4822_v18 = vsel %vm4165_vm2, %v6796_v26, 0.0  ;;  %v8723_v31 = vpop.permute.xlu1 %4904  ;;  %v4758_v34 = vld [vmem:[#allocation6 + $0x20] sm:$0xff]  ;;  %v4770_v26 = vmul.f32 %v8584_v54, %v4754_v36  ;;  %v4777_v54 = vmul.f32 %v8613_v15, %v4761_v10 }
 0x64c   : >> { %6503 = vmatprep.mubr.msk.bf16.mxu1 %vm4165_vm2, %v4984_v4  ;;  %v8725_v32 = vpop.permute.xlu0 %4939  ;;  %v4774_v4 = vmul.f32 %v8623_v11, %v4758_v34  ;;  %v4755_v11 = vld [vmem:[#allocation6 + $0x8] sm:$0xff] }
 0x64d   : >> { %4814 = vadd.xlane.f32.xlu1 %v4813_v38  ;;  %v6798_v41 = vpop.eup %6797  ;;  %v4757_v38 = vld [vmem:[#allocation6 + $0x18] sm:$0xff]  ;;  %v4771_v6 = vmul.f32 %v8602_v24, %v4755_v11 }
 0x64e   : >> { %v4828_v59 = vsel %vm4165_vm2, %v6798_v41, 0.0  ;;  %v4985_v23 = vpack.c.bf16 %v6792_v7, %v6798_v41  ;;  %v8705_v3 = vpop.eup %6799  ;;  %v8727_v16 = vpop.permute.xlu1 %4914  ;;  %v4773_v44 = vmul.f32 %v8592_v58, %v4757_v38  ;;  %v4763_v38 = vld [vmem:[#allocation6 + $0x48] sm:$0xff] }
 0x64f   : >> { %4829 = vadd.xlane.f32.xlu0 %v4828_v59  ;;  %v8708_v5 = vpop.eup %6801 }
 0x650   : >> { %6504 = vmatmul.mubr.msk.bf16.vlgmr.msra.gmra.mrb[12].mxu1 %vm4165_vm2, %v4985_v23  ;;  %v8729_v57 = vpop.permute.xlu0 %4929 }
 0x651   : >> { %4826 = vadd.xlane.f32.xlu1 %v4825_v1 }
 0x652   : >> { %v8731_v14 = vpop.permute.xlu1 %4934 }
 0x653   : >> { %4811 = vadd.xlane.f32.xlu0 %v4810_v63 }
 0x654   : >> { %v8733_v0 = vpop.permute.xlu0 %4949 }
 0x656   : >> { %v8735_v49 = vpop.permute.xlu1 %4924 }
 0x657   : >> { %4823 = vadd.xlane.f32.xlu0 %v4822_v18 }
 0x65a   : >> { %v8740_v7 = vpop.permute.xlu1 %4944 }
 0x662   : >> { %4954 = vperm.xlu1 %6737, %v8705_v3  }
 0x66d   : >> { %4959 = vperm.xlu0 %6738, %v8708_v5  }
 0x6b4   : >> { %v4794_v13 = vpop.xlane.xlu0 %4793 }
 0x6b5   : >> { %v4836_v35 = vadd.f32 %v4794_v13, %v4772_v39  ;;  %v4759_v39 = vld [vmem:[#allocation6 + $0x28] sm:$0xff] }
 0x6b6   : >> { %v4775_v58 = vmul.f32 %v8605_v17, %v4759_v39 }
 0x6b7   : >> { %4852 = vst.msk [vmem:[#allocation6 + $0x10] sm:$0xff] %vm4132_vm1, %v4836_v35  ;;  %v4764_v35 = vld [vmem:[#allocation6 + $0x50] sm:$0xff] }
 0x6b8   : >> { %v4806_v33 = vpop.xlane.xlu0 %4805  ;;  %v4780_v15 = vmul.f32 %v8635_v29, %v4764_v35  ;;  %v4779_v29 = vmul.f32 %v8631_v27, %v4763_v38  ;;  %v4867_v35 = vld [vmem:[#allocation7 + $0x8] sm:$0xff] }
 0x6b9   : >> { %v4840_v43 = vadd.f32 %v4806_v33, %v4776_v53  ;;  %v4765_v53 = vld [vmem:[#allocation6 + $0x58] sm:$0xff] }
 0x6ba   : >> { %v4781_v36 = vmul.f32 %v8625_v40, %v4765_v53 }
 0x6bb   : >> { %4856 = vst.msk [vmem:[#allocation6 + $0x30] sm:$0xff] %vm4132_vm1, %v4840_v43 }
 0x6bc   : >> { %v4788_v61 = vpop.xlane.xlu1 %4787 }
 0x6bd   : >> { %v4800_v41 = vpop.xlane.xlu0 %4799  ;;  %v4834_v59 = vadd.f32 %v4788_v61, %v4770_v26 }
 0x6be   : >> { %v4838_v23 = vadd.f32 %v4800_v41, %v4774_v4  ;;  %v4769_v4 = vld [vmem:[#allocation6 + $0x78] sm:$0xff] }
 0x6bf   : >> { %4850 = vst.msk [vmem:[#allocation6] sm:$0xff] %vm4132_vm1, %v4834_v59  ;;  %v4785_v17 = vmul.f32 %v8708_v5, %v4769_v4  ;;  %v4768_v59 = vld [vmem:[#allocation6 + $0x70] sm:$0xff] }
 0x6c0   : >> { %4854 = vst.msk [vmem:[#allocation6 + $0x20] sm:$0xff] %vm4132_vm1, %v4838_v23  ;;  %v4797_v1 = vpop.xlane.xlu1 %4796  ;;  %v4767_v23 = vld [vmem:[#allocation6 + $0x68] sm:$0xff] }
 0x6c1   : >> { %v4837_v63 = vadd.f32 %v4797_v1, %v4773_v44  ;;  %v4784_v1 = vmul.f32 %v8705_v3, %v4768_v59 }
 0x6c3   : >> { %4853 = vst.msk [vmem:[#allocation6 + $0x18] sm:$0xff] %vm4132_vm1, %v4837_v63  ;;  %v4783_v63 = vmul.f32 %v8637_v8, %v4767_v23  ;;  %v4868_v8 = vld [vmem:[#allocation7 + $0x10] sm:$0xff] }
 0x6c4   : >> { %v4809_v18 = vpop.xlane.xlu1 %4808  ;;  %v4964_v53 = vmul.f32 %v8719_v47, %v4868_v8 }
 0x6c5   : >> { %v4841_v28 = vadd.f32 %v4809_v18, %v4777_v54  ;;  %v4762_v54 = vld [vmem:[#allocation6 + $0x40] sm:$0xff] }
 0x6c7   : >> { %4857 = vst.msk [vmem:[#allocation6 + $0x38] sm:$0xff] %vm4132_vm1, %v4841_v28  ;;  %v4778_v28 = vmul.f32 %v8641_v52, %v4762_v54  ;;  %v4874_v54 = vld [vmem:[#allocation7 + $0x40] sm:$0xff] }
 0x6c8   : >> { %v4791_v19 = vpop.xlane.xlu0 %4790 }
 0x6c9   : >> { %v4835_v13 = vadd.f32 %v4791_v19, %v4771_v6  ;;  %v4766_v6 = vld [vmem:[#allocation6 + $0x60] sm:$0xff] }
 0x6ca   : >> { %v4782_v3 = vmul.f32 %v8644_v37, %v4766_v6  ;;  %v4963_v37 = vmul.f32 %v8715_v48, %v4867_v35  ;;  %v4878_v35 = vld [vmem:[#allocation7 + $0x60] sm:$0xff] }
 0x6cb   : >> { %4851 = vst.msk [vmem:[#allocation6 + $0x8] sm:$0xff] %vm4132_vm1, %v4835_v13 }
 0x6cc   : >> { %v4803_v25 = vpop.xlane.xlu1 %4802 }
 0x6cd   : >> { %v4839_v33 = vadd.f32 %v4803_v25, %v4775_v58  ;;  %v4866_v58 = vld [vmem:[#allocation7] sm:$0xff]  ;;  %v4869_v25 = vld [vmem:[#allocation7 + $0x18] sm:$0xff] }
 0x6ce   : >> { %v4962_v52 = vmul.f32 %v8711_v9, %v4866_v58 }
 0x6cf   : >> { %4855 = vst.msk [vmem:[#allocation6 + $0x28] sm:$0xff] %vm4132_vm1, %v4839_v33  ;;  %v4872_v33 = vld [vmem:[#allocation7 + $0x30] sm:$0xff] }
 0x6d0   : >> { %v4818_v43 = vpop.xlane.xlu0 %4817  ;;  %v4821_v34 = vpop.xlane.xlu1 %4820  ;;  %v4968_v38 = vmul.f32 %v8727_v16, %v4872_v33 }
 0x6d1   : >> { %v4844_v24 = vadd.f32 %v4818_v43, %v4780_v15  ;;  %v4845_v26 = vadd.f32 %v4821_v34, %v4781_v36  ;;  %v4965_v36 = vmul.f32 %v8713_v22, %v4869_v25  ;;  %v4870_v43 = vld [vmem:[#allocation7 + $0x20] sm:$0xff] }
 0x6d2   : >> { %v4966_v9 = vmul.f32 %v8723_v31, %v4870_v43 }
 0x6d3   : >> { %4860 = vst.msk [vmem:[#allocation6 + $0x50] sm:$0xff] %vm4132_vm1, %v4844_v24  ;;  %4861 = vst.msk [vmem:[#allocation6 + $0x58] sm:$0xff] %vm4132_vm1, %v4845_v26  ;;  %v4873_v26 = vld [vmem:[#allocation7 + $0x38] sm:$0xff] }
 0x6d4   : >> { %v4969_v59 = vmul.f32 %v8721_v30, %v4873_v26  ;;  %v4877_v30 = vld [vmem:[#allocation7 + $0x58] sm:$0xff] }
 0x6d6   : >> { %v4833_v61 = vpop.xlane.xlu1 %4832 }
 0x6d7   : >> { %v4849_v41 = vadd.f32 %v4833_v61, %v4785_v17  ;;  %v4871_v61 = vld [vmem:[#allocation7 + $0x28] sm:$0xff] }
 0x6d8   : >> { %v4967_v23 = vmul.f32 %v8717_v56, %v4871_v61 }
 0x6d9   : >> { %4865 = vst.msk [vmem:[#allocation6 + $0x78] sm:$0xff] %vm4132_vm1, %v4849_v41 }
 0x6da   : >> { %v4815_v40 = vpop.xlane.xlu1 %4814 }
 0x6db   : >> { %v4843_v44 = vadd.f32 %v4815_v40, %v4779_v29 }
 0x6dc   : >> { %v4830_v10 = vpop.xlane.xlu0 %4829 }
 0x6dd   : >> { %4859 = vst.msk [vmem:[#allocation6 + $0x48] sm:$0xff] %vm4132_vm1, %v4843_v44  ;;  %v4848_v5 = vadd.f32 %v4830_v10, %v4784_v1  ;;  %v4876_v10 = vld [vmem:[#allocation7 + $0x50] sm:$0xff] }
 0x6de   : >> { %v4827_v18 = vpop.xlane.xlu1 %4826  ;;  %v4972_v56 = vmul.f32 %v8731_v14, %v4876_v10 }
 0x6df   : >> { %v4847_v11 = vadd.f32 %v4827_v18, %v4783_v63  ;;  %4864 = vst.msk [vmem:[#allocation6 + $0x70] sm:$0xff] %vm4132_vm1, %v4848_v5  ;;  %v4875_v5 = vld [vmem:[#allocation7 + $0x48] sm:$0xff]  ;;  %v4970_v18 = vmul.f32 %v8735_v49, %v4874_v54  ;;  %v4881_v49 = vld [vmem:[#allocation7 + $0x78] sm:$0xff] }
 0x6e0   : >> { %v4812_v27 = vpop.xlane.xlu0 %4811 }
 0x6e1   : >> { %4863 = vst.msk [vmem:[#allocation6 + $0x68] sm:$0xff] %vm4132_vm1, %v4847_v11  ;;  %v4842_v19 = vadd.f32 %v4812_v27, %v4778_v28  ;;  %v4973_v28 = vmul.f32 %v8725_v32, %v4877_v30  ;;  %v4879_v32 = vld [vmem:[#allocation7 + $0x68] sm:$0xff] }
 0x6e2   : >> { %v4955_v8 = vpop.permute.xlu1 %4954 }
 0x6e3   : >> { %4858 = vst.msk [vmem:[#allocation6 + $0x40] sm:$0xff] %vm4132_vm1, %v4842_v19  ;;  %v4971_v19 = vmul.f32 %v8729_v57, %v4875_v5  ;;  %v4974_v57 = vmul.f32 %v8740_v7, %v4878_v35 }
 0x6e4   : >> { %v4824_v39 = vpop.xlane.xlu0 %4823 }
 0x6e5   : >> { %v4846_v13 = vadd.f32 %v4824_v39, %v4782_v3 }
 0x6e7   : >> { %4862 = vst.msk [vmem:[#allocation6 + $0x60] sm:$0xff] %vm4132_vm1, %v4846_v13  ;;  %v4880_v13 = vld [vmem:[#allocation7 + $0x70] sm:$0xff] }
 0x710   : >> { %v6481_v15 = vpop.f32.mrb[8].mxu0 }
 0x711   : >> { %v5208_v34 = vadd.f32 %v6481_v15, %v4964_v53  ;;  %v5026_v24 = vpop.f32.mrb[9].mxu0  ;;  %v4960_v53 = vpop.permute.xlu0 %4959 }
 0x712   : >> { %v5206_v4 = vadd.f32 %v5026_v24, %v4962_v52  ;;  %v6482_v17 = vpop.f32.mrb[10].mxu0  ;;  %v4976_v52 = vmul.f32 %v4955_v8, %v4880_v13  ;;  %v4977_v15 = vmul.f32 %v4960_v53, %v4881_v49 }
 0x713   : >> { %5224 = vst.msk [vmem:[#allocation7 + $0x10] sm:$0xff] %vm4165_vm2, %v5208_v34  ;;  %v5209_v47 = vadd.f32 %v6482_v17, %v4965_v36  ;;  %v5029_v41 = vpop.f32.mrb[11].mxu0  ;;  %v4975_v34 = vmul.f32 %v8733_v0, %v4879_v32 }
 0x714   : >> { %5222 = vst.msk [vmem:[#allocation7] sm:$0xff] %vm4165_vm2, %v5206_v4  ;;  %v5207_v22 = vadd.f32 %v5029_v41, %v4963_v37  ;;  %v6489_v29 = vpop.f32.mrb[8].mxu1 }
 0x715   : >> { %5225 = vst.msk [vmem:[#allocation7 + $0x18] sm:$0xff] %vm4165_vm2, %v5209_v47  ;;  %v5212_v48 = vadd.f32 %v6489_v29, %v4968_v38  ;;  %v5081_v40 = vpop.f32.mrb[9].mxu1 }
 0x716   : >> { %5223 = vst.msk [vmem:[#allocation7 + $0x8] sm:$0xff] %vm4165_vm2, %v5207_v22  ;;  %v5210_v16 = vadd.f32 %v5081_v40, %v4966_v9  ;;  %v6490_v44 = vpop.f32.mrb[10].mxu1 }
 0x717   : >> { %5228 = vst.msk [vmem:[#allocation7 + $0x30] sm:$0xff] %vm4165_vm2, %v5212_v48  ;;  %v5213_v1 = vadd.f32 %v6490_v44, %v4969_v59  ;;  %v5084_v31 = vpop.f32.mrb[11].mxu1 }
 0x718   : >> { %5226 = vst.msk [vmem:[#allocation7 + $0x20] sm:$0xff] %vm4165_vm2, %v5210_v16  ;;  %v5211_v63 = vadd.f32 %v5084_v31, %v4967_v23 }
 0x719   : >> { %5229 = vst.msk [vmem:[#allocation7 + $0x38] sm:$0xff] %vm4165_vm2, %v5213_v1 }
 0x71a   : >> { %5227 = vst.msk [vmem:[#allocation7 + $0x28] sm:$0xff] %vm4165_vm2, %v5211_v63 }
 0x71c   : >> { %v6497_v11 = vpop.f32.mrb[12].mxu0 }
 0x71d   : >> { %v5216_v27 = vadd.f32 %v6497_v11, %v4972_v56  ;;  %v5136_v6 = vpop.f32.mrb[13].mxu0 }
 0x71e   : >> { %v5214_v3 = vadd.f32 %v5136_v6, %v4970_v18  ;;  %v6498_v39 = vpop.f32.mrb[14].mxu0 }
 0x71f   : >> { %5232 = vst.msk [vmem:[#allocation7 + $0x50] sm:$0xff] %vm4165_vm2, %v5216_v27  ;;  %v5217_v58 = vadd.f32 %v6498_v39, %v4973_v28  ;;  %v5139_v25 = vpop.f32.mrb[15].mxu0 }
 0x720   : >> { %5230 = vst.msk [vmem:[#allocation7 + $0x40] sm:$0xff] %vm4165_vm2, %v5214_v3  ;;  %v5215_v14 = vadd.f32 %v5139_v25, %v4971_v19 }
 0x721   : >> { %5233 = vst.msk [vmem:[#allocation7 + $0x58] sm:$0xff] %vm4165_vm2, %v5217_v58 }
 0x722   : >> { %5231 = vst.msk [vmem:[#allocation7 + $0x48] sm:$0xff] %vm4165_vm2, %v5215_v14 }
 0x723   : >> { %v6505_v33 = vpop.f32.mrb[12].mxu1  ;;  %4200 = sbr.rel (!%p4197_p3) target bundleno = 1052 (0x41c), region = 116 }
 0x724   : >> { %v5220_v36 = vadd.f32 %v6505_v33, %v4976_v52  ;;  %v5191_v43 = vpop.f32.mrb[13].mxu1 }
 0x725   : >> { %v5218_v24 = vadd.f32 %v5191_v43, %v4974_v57  ;;  %v6506_v37 = vpop.f32.mrb[14].mxu1 }
 0x726   : >> { %5236 = vst.msk [vmem:[#allocation7 + $0x70] sm:$0xff] %vm4165_vm2, %v5220_v36  ;;  %v5221_v26 = vadd.f32 %v6506_v37, %v4977_v15  ;;  %v5194_v4 = vpop.f32.mrb[15].mxu1 }
 0x727   : >> { %5234 = vst.msk [vmem:[#allocation7 + $0x60] sm:$0xff] %vm4165_vm2, %v5218_v24  ;;  %v5219_v17 = vadd.f32 %v5194_v4, %v4975_v34 }
 0x728   : >> { %5237 = vst.msk [vmem:[#allocation7 + $0x78] sm:$0xff] %vm4165_vm2, %v5221_v26 }
 0x729   : >> { %5235 = vst.msk [vmem:[#allocation7 + $0x68] sm:$0xff] %vm4165_vm2, %v5219_v17 }
 0x72a PF: > { %v5274_v0 = vld [vmem:[#allocation6 + $0x20] sm:$0xff]  ;;  %v5275_v61 = vld [vmem:[#allocation6 + $0x28] sm:$0xff]  ;;  %v7085_v38 = vmov 0   ;;  %v5273_v60 = vld [vmem:[#allocation6 + $0x18] sm:$0xff]  ;;  %v7086_v49 = vmov 1983009808   ;;  %s6082_s22 = scalar_lea.vmem %s7352_s23, %s8212_s3 [#allocation8] }
 0x72b   : > { %v5270_v7 = vld [vmem:[#allocation6] sm:$0xff]  ;;  %6804 = vset.pattern.permute.xlu1 %v7085_v38  ;;  %6803 = vset.pattern.permute.xlu0 %v7085_v38  ;;  %6813 = vrcp.f32 %v5274_v0  ;;  %v5271_v47 = vld [vmem:[#allocation6 + $0x8] sm:$0xff]  ;;  %v5272_v21 = vld [vmem:[#allocation6 + $0x10] sm:$0xff]  ;;  %v5446_v53 = vunpack.c.l.s4 %v7086_v49  ;;  %v7087_v17 = vmov 1934713408   ;;  %s7088_s6 = smov 64  }
 0x72c   : > { %6815 = vrcp.f32 %v5270_v7  ;;  %v5279_v41 = vld [vmem:[#allocation6 + $0x48] sm:$0xff]  ;;  %v5278_v9 = vld [vmem:[#allocation6 + $0x40] sm:$0xff]  ;;  %v5277_v12 = vld [vmem:[#allocation6 + $0x38] sm:$0xff]  ;;  %v5477_v0 = vunpack.c.l.s4 %v7087_v17  ;;  %s7089_s8 = smov 32   ;;  %s7090_s24 = smov 96   ;;  %vm5950_vm7 = vcmask 523264  }
 0x72d   : > { %6817 = vrcp.f32 %v5275_v61  ;;  %v5283_v22 = vld [vmem:[#allocation6 + $0x68] sm:$0xff]  ;;  %v5282_v29 = vld [vmem:[#allocation6 + $0x60] sm:$0xff]  ;;  %v5276_v20 = vld [vmem:[#allocation6 + $0x30] sm:$0xff]  ;;  %v5447_v37 = vunpack.c.0.s8 %v5446_v53  ;;  %s9020_s12 = sld [smem:[#allocation19_spill]]  ;;  %vm5955_vm8 = vcmask 785408   ;;  %s6359_s20 = sshll.u32 %s7045_s30, 2 }
 0x72e   : > { %6819 = vrcp.f32 %v5271_v47  ;;  %v5281_v51 = vld [vmem:[#allocation6 + $0x58] sm:$0xff]  ;;  %v5280_v48 = vld [vmem:[#allocation6 + $0x50] sm:$0xff]  ;;  %v6805_v56 = vld [vmem:[#allocation13] sm:$0xff]   ;;  %s9021_s15 = sld [smem:[#allocation28_spill]]  ;;  %s6111_s23 = sshll.u32 %s7365_s17, 4  ;;  %s8897_s23 = int_to_ptr.vmem [resolvable:$true] %s6111_s23 }
 0x72f   : > { %6821 = vrcp.f32 %v5279_v41  ;;  %v5285_v23 = vld [vmem:[#allocation6 + $0x78] sm:$0xff]  ;;  %v5284_v44 = vld [vmem:[#allocation6 + $0x70] sm:$0xff]  ;;  %v6806_v18 = vld [vmem:[#allocation13 + $0x8] sm:$0xff]   ;;  %6507 = vmatprep.subr.bf16.mxu0 %v6805_v56  ;;  %v8810_v41 = vpack.i.b16 %v7085_v38, %v7085_v38  ;;  %s9022_s30 = sld [smem:[#allocation21_spill]] }
 0x730   : > { %6823 = vrcp.f32 %v5278_v9  ;;  %6508 = vmatpush3.bf16.msra.mxu0 %v6805_v56  ;;  %v5259_v27 = vld [vmem:[#allocation7 + $0x28] sm:$0xff]  ;;  %v5258_v6 = vld [vmem:[#allocation7 + $0x20] sm:$0xff] }
 0x731   : > { %6825 = vrcp.f32 %v5283_v22  ;;  %6509 = vmatprep.subr.bf16.mxu0 %v6806_v18  ;;  %v5254_v19 = vld [vmem:[#allocation7] sm:$0xff]  ;;  %v5255_v3 = vld [vmem:[#allocation7 + $0x8] sm:$0xff] }
 0x732   : > { %6827 = vrcp.f32 %v5282_v29  ;;  %v5263_v57 = vld [vmem:[#allocation7 + $0x48] sm:$0xff]  ;;  %v5262_v33 = vld [vmem:[#allocation7 + $0x40] sm:$0xff] }
 0x733   : > { %6829 = vrcp.f32 %v5273_v60  ;;  %v5267_v36 = vld [vmem:[#allocation7 + $0x68] sm:$0xff]  ;;  %v5266_v7 = vld [vmem:[#allocation7 + $0x60] sm:$0xff]  ;;  %v8813_v60 = vsub.s32 %v5447_v37, %v8251_v2  ;;  %s6360_s19 = sshll.u32 %s9020_s12, 3  ;;  %s6931_s12 = scalar_lea.vmem %s8897_s23, 512 }
 0x734   : > { %6831 = vrcp.f32 %v5272_v21  ;;  %6510 = vmatpush3.bf16.msra.mxu0 %v6806_v18  ;;  %v5478_v21 = vunpack.c.0.s8 %v5477_v0  ;;  %s6108_s13 = sadd.s32 %s6360_s19, %s6359_s20  ;;  %p6932_p13 = scmp.ne.s32.totalorder %s8897_s23, %s6931_s12 }
 0x735   : > { %v6814_v45 = vpop.eup %6813  ;;  %6833 = vrcp.f32 %v5277_v12  ;;  %s6361_s3 = sshll.u32 %s6108_s13, 7  ;;  %p9024_p7 = scmp.ne.s32.totalorder %s9022_s30, 0 }
 0x736   : > { %v6816_v50 = vpop.eup %6815  ;;  %5324 = vperm.xlu1 %6804, %v6814_v45   ;;  %6835 = vrcp.f32 %v5276_v20  ;;  %v5257_v45 = vld [vmem:[#allocation7 + $0x18] sm:$0xff] }
 0x737   : > { %v6818_v42 = vpop.eup %6817  ;;  %5304 = vperm.xlu0 %6803, %v6816_v50   ;;  %6837 = vrcp.f32 %v5281_v51  ;;  %v5256_v50 = vld [vmem:[#allocation7 + $0x10] sm:$0xff]  ;;  %p6933_p9 = pnand %p6932_p13, %p9024_p7 }
 0x738   : > { %v6820_v46 = vpop.eup %6819  ;;  %6839 = vrcp.f32 %v5280_v48 }
 0x739   : > { %v6822_v62 = vpop.eup %6821  ;;  %6841 = vrcp.f32 %v5285_v23  ;;  %v5260_v23 = vld [vmem:[#allocation7 + $0x30] sm:$0xff]  ;;  %p6934_p11 = pneg %p6933_p9 }
 0x73a   : > { %5329 = vperm.xlu1 %6804, %v6818_v42   ;;  %v6824_v55 = vpop.eup %6823  ;;  %6843 = vrcp.f32 %v5284_v44 }
 0x73b   : > { %5309 = vperm.xlu0 %6803, %v6820_v46   ;;  %v6826_v59 = vpop.eup %6825 }
 0x73c   : > { %v6828_v40 = vpop.eup %6827 }
 0x73d   : > { %v6830_v16 = vpop.eup %6829 }
 0x73e   : > { %5349 = vperm.xlu1 %6804, %v6822_v62   ;;  %v6832_v1 = vpop.eup %6831 }
 0x73f   : > { %5344 = vperm.xlu0 %6803, %v6824_v55   ;;  %v6834_v31 = vpop.eup %6833 }
 0x740   : > { %v6836_v10 = vpop.eup %6835 }
 0x741   : > { %v6838_v63 = vpop.eup %6837 }
 0x742   : > { %5369 = vperm.xlu1 %6804, %v6826_v59   ;;  %v6840_v54 = vpop.eup %6839  ;;  %v5261_v59 = vld [vmem:[#allocation7 + $0x38] sm:$0xff] }
 0x743   : > { %5364 = vperm.xlu0 %6803, %v6828_v40   ;;  %v6842_v30 = vpop.eup %6841 }
 0x744   : > { %v6844_v5 = vpop.eup %6843 }
 0x746   : > { %5319 = vperm.xlu1 %6804, %v6830_v16  }
 0x747   : > { %5314 = vperm.xlu0 %6803, %v6832_v1   ;;  %v8819_v1 = vsub.s32 %v5478_v21, %v8251_v2 }
 0x74a   : > { %5339 = vperm.xlu1 %6804, %v6834_v31  }
 0x74b   : > { %5334 = vperm.xlu0 %6803, %v6836_v10  }
 0x74e   : > { %5359 = vperm.xlu1 %6804, %v6838_v63  }
 0x74f   : > { %5354 = vperm.xlu0 %6803, %v6840_v54  }
 0x752   : > { %5379 = vperm.xlu1 %6804, %v6842_v30  }
 0x753   : > { %5374 = vperm.xlu0 %6803, %v6844_v5  }
 0x7b5   : > { %v5325_v11 = vpop.permute.xlu1 %5324 }
 0x7b6   : > { %v5305_v28 = vpop.permute.xlu0 %5304  ;;  %v5386_v58 = vmul.f32 %v5325_v11, %v5258_v6 }
 0x7b7   : > { %v5382_v25 = vmul.f32 %v5305_v28, %v5254_v19 }
 0x7b9   : > { %v5330_v39 = vpop.permute.xlu1 %5329 }
 0x7ba   : > { %v5387_v13 = vmul.f32 %v5330_v39, %v5259_v27  ;;  %v5310_v8 = vpop.permute.xlu0 %5309 }
 0x7bb   : > { %v5383_v35 = vmul.f32 %v5310_v8, %v5255_v3 }
 0x7bc   : > { %v5400_v14 = vpack.c.bf16 %v5387_v13, %v5386_v58 }
 0x7bd   : > { %v5398_v32 = vpack.c.bf16 %v5383_v35, %v5382_v25  ;;  %v5350_v52 = vpop.permute.xlu1 %5349 }
 0x7be   : > { %v5345_v15 = vpop.permute.xlu0 %5344  ;;  %v5391_v43 = vmul.f32 %v5350_v52, %v5263_v57  ;;  %v5411_v24 = vshrl.u32 %v5400_v14, 16 }
 0x7bf   : > { %v5390_v34 = vmul.f32 %v5345_v15, %v5262_v33  ;;  %v5410_v26 = vshrl.u32 %v5398_v32, 16  ;;  %v5408_v9 = vpack.i.b16 %v5400_v14, %v5398_v32  ;;  %v5265_v33 = vld [vmem:[#allocation7 + $0x58] sm:$0xff] }
 0x7c1   : > { %v5370_v4 = vpop.permute.xlu1 %5369  ;;  %v5402_v22 = vpack.c.bf16 %v5391_v43, %v5390_v34  ;;  %v5412_v42 = vpack.i.b16 %v5411_v24, %v5410_v26  ;;  %v5444_v20 = vcombine.high %v5408_v9, %v8810_v41  ;;  %v5451_v16 = vrot.slane %v5408_v9, %v8813_v60  ;;  %v5264_v34 = vld [vmem:[#allocation7 + $0x50] sm:$0xff]  ;;  %v5269_v24 = vld [vmem:[#allocation7 + $0x78] sm:$0xff] }
 0x7c2   : > { %v5395_v61 = vmul.f32 %v5370_v4, %v5267_v36  ;;  %v5365_v47 = vpop.permute.xlu0 %5364 }
 0x7c3   : > { %v5394_v29 = vmul.f32 %v5365_v47, %v5266_v7  ;;  %v5418_v38 = vshrl.u32 %v5402_v22, 16  ;;  %v5510_v44 = vcombine.high %v5412_v42, %v8810_v41  ;;  %v5458_v56 = vrot.slane %v5444_v20, %v8813_v60  ;;  %v5268_v7 = vld [vmem:[#allocation7 + $0x70] sm:$0xff] }
 0x7c4   : > { %v5517_v2 = vrot.slane %v5412_v42, %v8813_v60 }
 0x7c5   : > { %v5320_v46 = vpop.permute.xlu1 %5319  ;;  %v5404_v12 = vpack.c.bf16 %v5395_v61, %v5394_v29  ;;  %v5524_v3 = vrot.slane %v5510_v44, %v8813_v60 }
 0x7c6   : > { %v5315_v62 = vpop.permute.xlu0 %5314  ;;  %v5385_v55 = vmul.f32 %v5320_v46, %v5257_v45 }
 0x7c7   : > { %v5384_v51 = vmul.f32 %v5315_v62, %v5256_v50  ;;  %v5416_v48 = vpack.i.b16 %v5404_v12, %v5402_v22  ;;  %v5419_v40 = vshrl.u32 %v5404_v12, 16 }
 0x7c9   : > { %v5340_v31 = vpop.permute.xlu1 %5339  ;;  %v5420_v10 = vpack.i.b16 %v5419_v40, %v5418_v38  ;;  %v5459_v63 = vcombine.high %v5416_v48, %v8810_v41  ;;  %v5466_v54 = vrot.slane %v5416_v48, %v8813_v60  ;;  %v5399_v18 = vpack.c.bf16 %v5385_v55, %v5384_v51 }
 0x7ca   : > { %v5389_v30 = vmul.f32 %v5340_v31, %v5261_v59  ;;  %v5335_v5 = vpop.permute.xlu0 %5334 }
 0x7cb   : > { %v5388_v11 = vmul.f32 %v5335_v5, %v5260_v23  ;;  %v5473_v28 = vrot.slane %v5459_v63, %v8813_v60  ;;  %v5474_v27 = vcombine.low %v5451_v16, %v5466_v54  ;;  %v5475_v6 = vcombine.high %v5451_v16, %v5466_v54 }
 0x7cc   : > { %v5525_v19 = vcombine.high %v5420_v10, %v8810_v41  ;;  %v5532_v39 = vrot.slane %v5420_v10, %v8813_v60  ;;  %v5432_v43 = vshrl.u32 %v5399_v18, 16 }
 0x7cd   : > { %v5401_v13 = vpack.c.bf16 %v5389_v30, %v5388_v11  ;;  %v5360_v8 = vpop.permute.xlu1 %5359  ;;  %v5482_v58 = vrot.slane %v5474_v27, %v8819_v1  ;;  %v5489_v25 = vrot.slane %v5475_v6, %v8819_v1  ;;  %v5490_v35 = vcombine.low %v5458_v56, %v5473_v28 }
 0x7ce   : > { %v5491_v14 = vcombine.high %v5458_v56, %v5473_v28  ;;  %v5355_v49 = vpop.permute.xlu0 %5354  ;;  %v5539_v53 = vrot.slane %v5525_v19, %v8813_v60  ;;  %v5540_v32 = vcombine.low %v5517_v2, %v5532_v39  ;;  %v5541_v52 = vcombine.high %v5517_v2, %v5532_v39 }
 0x7cf   : > { %v5430_v57 = vpack.i.b16 %v5401_v13, %v5399_v18  ;;  %v5498_v15 = vrot.slane %v5490_v35, %v8819_v1  ;;  %v5708_v17 = vcombine.low %v5482_v58, %v5489_v25  ;;  %v5433_v47 = vshrl.u32 %v5401_v13, 16 }
 0x7d0   : > { %v5505_v36 = vrot.slane %v5491_v14, %v8819_v1  ;;  %v5548_v37 = vrot.slane %v5540_v32, %v8819_v1  ;;  %v5556_v26 = vcombine.low %v5524_v3, %v5539_v53  ;;  %v5557_v4 = vcombine.high %v5524_v3, %v5539_v53 }
 0x7d1   : > { %v5380_v0 = vpop.permute.xlu1 %5379  ;;  %v5555_v61 = vrot.slane %v5541_v52, %v8819_v1  ;;  %v5576_v9 = vcombine.high %v5430_v57, %v8810_v41  ;;  %v5393_v22 = vmul.f32 %v5360_v8, %v5265_v33  ;;  %v6341_v45 = vcombine.high %v5482_v58, %v5489_v25 }
 0x7d2   : > { %v5375_v29 = vpop.permute.xlu0 %5374  ;;  %v5392_v50 = vmul.f32 %v5355_v49, %v5264_v34  ;;  %v5397_v42 = vmul.f32 %v5380_v0, %v5269_v24  ;;  %v5564_v21 = vrot.slane %v5556_v26, %v8819_v1  ;;  %v5434_v46 = vpack.i.b16 %v5433_v47, %v5432_v43  ;;  %v6807_v49 = vld [vmem:[#allocation13 + $0x10] sm:$0xff]  }
 0x7d3   : > { %v5583_v12 = vrot.slane %v5430_v57, %v8813_v60  ;;  %v5396_v62 = vmul.f32 %v5375_v29, %v5268_v7  ;;  %v5571_v20 = vrot.slane %v5557_v4, %v8819_v1  ;;  %v5724_v51 = vcombine.low %v5498_v15, %v5505_v36  ;;  %6511 = vmatprep.subr.bf16.mxu0 %v6807_v49 }
 0x7d4   : > { %v5403_v55 = vpack.c.bf16 %v5393_v22, %v5392_v50  ;;  %v6342_v59 = vcombine.high %v5498_v15, %v5505_v36  ;;  %v5590_v38 = vrot.slane %v5576_v9, %v8813_v60  ;;  %v5715_v40 = vrot.slane %v5708_v17, %v8813_v60  ;;  %6512 = vmatpush3.bf16.msra.mxu0 %v6807_v49  ;;  %v6808_v22 = vld [vmem:[#allocation13 + $0x18] sm:$0xff]  }
 0x7d5   : > { %v5405_v48 = vpack.c.bf16 %v5397_v42, %v5396_v62  ;;  %v5758_v23 = vcombine.low %v5548_v37, %v5555_v61  ;;  %v5642_v16 = vcombine.high %v5434_v46, %v8810_v41  ;;  %v5723_v44 = vrot.slane %v6341_v45, %v8813_v60  ;;  %6513 = vmatprep.subr.bf16.mxu0 %v6808_v22 }
 0x7d6   : > { %v5731_v31 = vrot.slane %v5724_v51, %v8813_v60  ;;  %v5739_v10 = vrot.slane %v6342_v59, %v8813_v60  ;;  %v5649_v63 = vrot.slane %v5434_v46, %v8813_v60  ;;  %v5440_v54 = vshrl.u32 %v5403_v55, 16  ;;  %v6809_v59 = vld [vmem:[#allocation13 + $0x20] sm:$0xff]  }
 0x7d7   : > { %v5438_v30 = vpack.i.b16 %v5405_v48, %v5403_v55  ;;  %v5441_v5 = vshrl.u32 %v5405_v48, 16  ;;  %v5765_v18 = vrot.slane %v5758_v23, %v8813_v60  ;;  %v6343_v11 = vcombine.high %v5548_v37, %v5555_v61 }
 0x7d8   : > { %v5748_v56 = vcombine.low %v5731_v31, %v5739_v10  ;;  %v5774_v28 = vcombine.low %v5564_v21, %v5571_v20  ;;  %v6344_v2 = vcombine.high %v5564_v21, %v5571_v20  ;;  %v5656_v3 = vrot.slane %v5642_v16, %v8813_v60  ;;  %6514 = vmatpush3.bf16.msra.mxu0 %v6808_v22 }
 0x7d9   : > { %v5442_v27 = vpack.i.b16 %v5441_v5, %v5440_v54  ;;  %v5591_v6 = vcombine.high %v5438_v30, %v8810_v41  ;;  %v5598_v19 = vrot.slane %v5438_v30, %v8813_v60  ;;  %v5740_v39 = vcombine.low %v5715_v40, %v5723_v44  ;;  %6515 = vmatprep.subr.bf16.mxu0 %v6809_v59 }
 0x7da   : > { %v5755_v13 = vrot.slane %v5748_v56, %v8819_v1  ;;  %v5773_v8 = vrot.slane %v6343_v11, %v8813_v60  ;;  %v5781_v32 = vrot.slane %v5774_v28, %v8813_v60  ;;  %v5789_v52 = vrot.slane %v6344_v2, %v8813_v60  ;;  %v6811_v2 = vld [vmem:[#allocation13 + $0x30] sm:$0xff]  }
 0x7db   : > { %v5605_v58 = vrot.slane %v5591_v6, %v8813_v60  ;;  %v5606_v25 = vcombine.low %v5583_v12, %v5598_v19  ;;  %v5607_v35 = vcombine.high %v5583_v12, %v5598_v19  ;;  %v5657_v14 = vcombine.high %v5442_v27, %v8810_v41 }
 0x7dc   : > { %v5664_v53 = vrot.slane %v5442_v27, %v8813_v60  ;;  %v5790_v57 = vcombine.low %v5765_v18, %v5773_v8  ;;  %v5747_v41 = vrot.slane %v5740_v39, %v8819_v1  ;;  %v5798_v50 = vcombine.low %v5781_v32, %v5789_v52  ;;  %6516 = vmatpush3.bf16.msra.mxu0 %v6809_v59  ;;  %v6086_v59 = vld [vmem:[%s6082_s22 + $0x18] sm:$0xff] }
 0x7dd   : > { %v5614_v33 = vrot.slane %v5606_v25, %v8819_v1  ;;  %v5621_v15 = vrot.slane %v5607_v35, %v8819_v1  ;;  %v5622_v36 = vcombine.low %v5590_v38, %v5605_v58  ;;  %v5623_v43 = vcombine.high %v5590_v38, %v5605_v58 }
 0x7de   : > { %v5671_v34 = vrot.slane %v5657_v14, %v8813_v60  ;;  %v5672_v24 = vcombine.low %v5649_v63, %v5664_v53  ;;  %v5673_v37 = vcombine.high %v5649_v63, %v5664_v53  ;;  %v5757_v29 = vcombine.high %v5747_v41, %v5755_v13  ;;  %v6810_v63 = vld [vmem:[#allocation13 + $0x28] sm:$0xff]   ;;  %v6812_v14 = vld [vmem:[#allocation13 + $0x38] sm:$0xff]  }
 0x7df   : > { %v5630_v26 = vrot.slane %v5622_v36, %v8819_v1  ;;  %v5637_v4 = vrot.slane %v5623_v43, %v8819_v1  ;;  %v5808_v17 = vcombine.low %v5614_v33, %v5621_v15  ;;  %v6345_v0 = vcombine.high %v5614_v33, %v5621_v15  ;;  %6517 = vmatprep.subr.bf16.mxu0 %v6810_v63 }
 0x7e0   : > { %v5680_v7 = vrot.slane %v5672_v24, %v8819_v1  ;;  %v5687_v61 = vrot.slane %v5673_v37, %v8819_v1  ;;  %v5688_v47 = vcombine.low %v5656_v3, %v5671_v34  ;;  %v5689_v9 = vcombine.high %v5656_v3, %v5671_v34  ;;  %6518 = vmatpush3.bf16.msra.mxu0 %v6810_v63 }
 0x7e1   : > { %v5797_v45 = vrot.slane %v5790_v57, %v8819_v1  ;;  %v8869_v46 = vcombine.low %v5747_v41, %v5755_v13  ;;  %v5824_v12 = vcombine.low %v5630_v26, %v5637_v4  ;;  %v5805_v62 = vrot.slane %v5798_v50, %v8819_v1  ;;  %6519 = vmatprep.subr.bf16.mxu0 %v6811_v2 }
 0x7e2   : > { %v5696_v42 = vrot.slane %v5688_v47, %v8819_v1  ;;  %v5703_v21 = vrot.slane %v5689_v9, %v8819_v1  ;;  %v5815_v20 = vrot.slane %v5808_v17, %v8813_v60  ;;  %v6346_v55 = vcombine.high %v5630_v26, %v5637_v4 }
 0x7e3   : > { %v5858_v51 = vcombine.low %v5680_v7, %v5687_v61  ;;  %v5823_v38 = vrot.slane %v6345_v0, %v8813_v60  ;;  %v5831_v48 = vrot.slane %v5824_v12, %v8813_v60  ;;  %v6347_v40 = vcombine.high %v5680_v7, %v5687_v61 }
 0x7e4   : > { %v5874_v23 = vcombine.low %v5696_v42, %v5703_v21  ;;  %v5807_v16 = vcombine.high %v5797_v45, %v5805_v62  ;;  %v5806_v44 = vcombine.low %v5797_v45, %v5805_v62  ;;  %v5839_v31 = vrot.slane %v6346_v55, %v8813_v60  ;;  %6520 = vmatpush3.bf16.msra.mxu0 %v6811_v2 }
 0x7e5   : > { %v5865_v10 = vrot.slane %v5858_v51, %v8813_v60  ;;  %v5873_v54 = vrot.slane %v6347_v40, %v8813_v60  ;;  %v6348_v5 = vcombine.high %v5696_v42, %v5703_v21  ;;  %v5840_v28 = vcombine.low %v5815_v20, %v5823_v38  ;;  %6521 = vmatprep.subr.bf16.mxu0 %v6812_v14  ;;  %v6349_v42 = vld [vmem:[%s9021_s15] ss:$0 sm:$0xff] }
 0x7e6   : > { %v5881_v30 = vrot.slane %v5874_v23, %v8813_v60  ;;  %v5916_v56 = vpack.i.b16 %v5807_v16, %v5757_v29  ;;  %v5912_v18 = vshrl.u32 %v5806_v44, 16  ;;  %v5848_v11 = vcombine.low %v5831_v48, %v5839_v31  ;;  %v6083_v20 = vld [vmem:[%s6082_s22] sm:$0xff]  ;;  %v6084_v23 = vld [vmem:[%s6082_s22 + $0x8] sm:$0xff] }
 0x7e7   : > { %v5889_v27 = vrot.slane %v6348_v5, %v8813_v60  ;;  %v5890_v6 = vcombine.low %v5865_v10, %v5873_v54  ;;  %v5910_v19 = vpack.i.b16 %v5806_v44, %v8869_v46  ;;  %v5911_v3 = vshrl.u32 %v8869_v46, 16  ;;  %v6085_v46 = vld [vmem:[%s6082_s22 + $0x10] sm:$0xff]  ;;  %s7091_s22 = smov [#allocation14]  }
 0x7e8   : > { %5936 = vrot.lane.b32.xlu0 %v5916_v56, %s7088_s6  ;;  %v5855_v39 = vrot.slane %v5848_v11, %v8819_v1  ;;  %v5918_v58 = vshrl.u32 %v5807_v16, 16  ;;  %v5847_v25 = vrot.slane %v5840_v28, %v8819_v1  ;;  %v5917_v49 = vshrl.u32 %v5757_v29, 16  ;;  %6522 = vmatpush3.bf16.msra.mxu0 %v6812_v14  ;;  %s6935_s20 = sshll.u32 %s7091_s22, 4  ;;  %s6936_s20 = int_to_ptr.vmem [resolvable:$false] %s6935_s20 }
 0x7e9   : > { %v5898_v13 = vcombine.low %v5881_v30, %v5889_v27  ;;  %v5913_v8 = vpack.i.b16 %v5912_v18, %v5911_v3  ;;  %v5897_v35 = vrot.slane %v5890_v6, %v8819_v1  ;;  %s6937_s19 = scalar_lea.vmem %s6936_s20, 1024  ;;  %p6938_p5 = scmp.lt.s32.totalorder %s8897_s23, %s6936_s20 }
 0x7ea   : > { %v5857_v53 = vcombine.high %v5847_v25, %v5855_v39  ;;  %v5856_v52 = vcombine.low %v5847_v25, %v5855_v39  ;;  %v5919_v33 = vpack.i.b16 %v5918_v58, %v5917_v49  ;;  %p6939_p8 = scmp.lt.s32.totalorder %s6937_s19, %s6931_s12 }
 0x7eb   : > { %v5905_v60 = vrot.slane %v5898_v13, %v8819_v1 }
 0x7ec   : > { %5932 = vrot.lane.b32.xlu0 %v5913_v8, %s7089_s8  ;;  %v5923_v34 = vshrl.u32 %v5856_v52, 16  ;;  %v5929_v37 = vshrl.u32 %v5857_v53, 16  ;;  %p6940_p12 = por %p6939_p8, %p6938_p5 }
 0x7ed   : > { %v5907_v32 = vcombine.high %v5897_v35, %v5905_v60  ;;  %v5906_v57 = vcombine.low %v5897_v35, %v5905_v60 }
 0x7ee   : > { %p6941_p2 = pnand %p6940_p12, %p6934_p11 }
 0x7ef   : > { %v5928_v15 = vpack.i.b16 %v5907_v32, %v5857_v53  ;;  %v5924_v36 = vshrl.u32 %v5906_v57, 16  ;;  %v5922_v43 = vpack.i.b16 %v5906_v57, %v5856_v52  ;;  %v5930_v24 = vshrl.u32 %v5907_v32, 16 }
 0x7f0   : > { %5940 = vrot.lane.b32.xlu0 %v5919_v33, %s7090_s24 }
 0x7f1   : > { %5938 = vrot.lane.b32.xlu1 %v5928_v15, %s7088_s6  ;;  %v5925_v1 = vpack.i.b16 %v5924_v36, %v5923_v34  ;;  %v5931_v41 = vpack.i.b16 %v5930_v24, %v5929_v37  ;;  %s9023_s6 = sld [smem:[#allocation29_spill]] }
 0x7f5   : > { %5934 = vrot.lane.b32.xlu1 %v5925_v1, %s7089_s8 }
 0x7f7   : > { %s8903_s8 = scalar_lea.hbm %s9023_s6, %s6361_s3 }
 0x7f9   : > { %5942 = vrot.lane.b32.xlu1 %v5931_v41, %s7090_s24  ;;  %s8909_s24 = scalar_lea.sflag [#allocation10], %s337_s9 }
 0x85a   : > { %v5937_v26 = vpop.permute.xlu0 %5936 }
 0x85e   : > { %v5933_v4 = vpop.permute.xlu0 %5932 }
 0x85f   : > { %v5946_v17 = vsel %vm4165_vm2, %v5910_v19, %v5933_v4 }
 0x860   : > { %v5952_v7 = vsel %vm5950_vm7, %v5946_v17, %v5937_v26 }
 0x862   : > { %v5941_v0 = vpop.permute.xlu0 %5940 }
 0x863   : > { %v5957_v61 = vsel %vm5955_vm8, %v5952_v7, %v5941_v0  ;;  %v5939_v47 = vpop.permute.xlu1 %5938 }
 0x864   : > { %6523 = vmatprep.mubr.bf16.mxu0 %v5957_v61 }
 0x867   : > { %v5935_v9 = vpop.permute.xlu1 %5934 }
 0x868   : > { %v5949_v22 = vsel %vm4165_vm2, %v5922_v43, %v5935_v9 }
 0x869   : > { %v5954_v29 = vsel %vm5950_vm7, %v5949_v22, %v5939_v47 }
 0x86b   : > { %v5943_v45 = vpop.permute.xlu1 %5942 }
 0x86c   : > { %v5960_v50 = vsel %vm5955_vm8, %v5954_v29, %v5943_v45 }
 0x86d   : > { %6524 = vmatmul.mubr.bf16.vlgmr.msra.gmra.mrb[0].mxu0 %v5960_v50 }
 0x940   : > { %v6525_v21 = vpop.f32.mrb[0].mxu0 }
 0x941   : > { %v6076_v12 = vadd.f32 %v6525_v21, %v6349_v42  ;;  %v6067_v62 = vpop.f32.mrb[1].mxu0 }
 0x942   : > { %v6068_v55 = vadd.f32 %v6349_v42, %v6067_v62  ;;  %v6526_v51 = vpop.f32.mrb[2].mxu0 }
 0x943   : > { %v6089_v38 = vadd.f32 %v6085_v46, %v6076_v12  ;;  %v6079_v48 = vadd.f32 %v6526_v51, %v6349_v42  ;;  %v6070_v40 = vpop.f32.mrb[3].mxu0 }
 0x944   : > { %v6087_v16 = vadd.f32 %v6083_v20, %v6068_v55  ;;  %v6071_v44 = vadd.f32 %v6349_v42, %v6070_v40 }
 0x945   : > { %6093 = vst [vmem:[%s7365_s17 + $0x10] sm:$0xff] %v6089_v38  ;;  %v6090_v31 = vadd.f32 %v6086_v59, %v6079_v48 }
 0x946   : > { %6091 = vst [vmem:[%s7365_s17] sm:$0xff] %v6087_v16  ;;  %v6088_v10 = vadd.f32 %v6084_v23, %v6071_v44 }
 0x947   : > { %6094 = vst [vmem:[%s7365_s17 + $0x18] sm:$0xff] %v6090_v31 }
 0x948   : > { %6092 = vst [vmem:[%s7365_s17 + $0x8] sm:$0xff] %v6088_v10 }
 0x949   : > { %6944 = shalt.err (!%p6941_p2)
}
 0x94a   : > { %s6945_s9 = scalar_lea.hbm %s8903_s8, 512  ;;  %s6949_s16 = scalar_lea.hbm %s9023_s6, 2048 }
 0x94b   : > { %p6946_p6 = scmp.ne.s32.totalorder %s8903_s8, %s6945_s9  ;;  %p6950_p4 = scmp.lt.u32.totalorder %s8903_s8, %s9023_s6 }
 0x94c   : > { %p6951_p1 = scmp.lt.u32.totalorder %s6949_s16, %s6945_s9  ;;  %p6953_p13 = scmp.lt.u32.totalorder %s6945_s9, %s8903_s8 }
 0x94d   : > { %p6947_p10 = pnand %p6946_p6, %p9024_p7 }
 0x94e   : > { %p6952_p3 = por %p6951_p1, %p6950_p4 }
 0x94f   : > { %p6948_p0 = pneg %p6947_p10 }
 0x950   : > { %p6954_p9 = por %p6953_p13, %p6952_p3 }
 0x952   : > { %p6955_p11 = pnand %p6954_p9, %p6948_p0 }
 0x954   : > { %6958 = shalt.err (!%p6955_p11)
}
 0x955   : > { %s7092_s3 = smov 128   ;;  %s7093_s27 = smov 8  }
 0x956   : > { %6545 = dma.vmem_to_hbm [thread:$0]  (%p9024_p7), %s8897_s23, 512, %s8903_s8, %s8909_s24, %s7092_s3, %s7092_s3, %s7093_s27  }
 0x957 PF: > { %s9025_s21 = sld [smem:[#allocation18_spill]]  ;;  %s9026_s12 = sld [smem:[#allocation22_spill]] }
 0x958   : > { %p6567_p5 = scmp.ge.s32.totalorder %s7061_s11, 2 }
 0x95d   : > { %s6126_s22 = sand.u32 1, %s9025_s21   ;;  %p9027_p8 = scmp.ne.s32.totalorder %s9026_s12, 0 }
 0x95e   : > { %s6127_s20 = scalar_lea.sflag [#allocation10], %s6126_s22 }
 0x95f   : > { %p6559_p12 = pnand %p6567_p5, %p9027_p8 }
 0x961   : > { %7016 = dma.done.wait (!%p6559_p12), %s6127_s20, 512  }
 0x962   : > { %7018 = vsyncadd (!%p6559_p12), %s6127_s20, 4294966784  ;;  %s24_s11 = sadd.s32 1, %s7061_s11   ;;  %s9028_s30 = sld [smem:[#allocation20_spill]] }
 0x963   : > { %p21_p2 = scmp.ge.s32.totalorder %s24_s11, 6   ;;  %s9029_s9 = sld [smem:[#allocation23_spill]] }
 0x964   : > { %s9030_s24 = smov %s7025_s25  ;;  %s9031_s25 = smov %s7029_s26 }
 0x965   : > { %s9032_s26 = smov %s7309_s5  ;;  %s9033_s27 = smov %s7037_s28 }
 0x966   : > { %s9034_s28 = smov %s7041_s29  ;;  %s9035_s29 = smov %s7304_s18 }
 0x967   : > { %s9036_s8 = smov %s7057_s10  ;;  %s9037_s10 = smov %s9043_s7 }
 0x968   :  { %23 = sbr.rel (!%p21_p2) target bundleno = 15 (0xf), region = 127 }
 0x96f   :  { %6132 = vsyncpa [#allocation9], 1 }
 0x970   :  { %6134 = vsyncpa [#allocation9 + $0x1], 1 }
 0x971   :  { %6135 = vsyncpa [#allocation12], 1 }
 0x972   :  { %6136 = vsyncpa [#allocation10], 1 }
 0x973   :  { %6138 = vsyncpa [#allocation10 + $0x1], 1 }

</bundles_post_ra>
